<compile_context>
chip_gen: v5e
topology: v5e:2x2
jax: 0.10.0
libtpu: 0.0.40
codegen_flags: <defaults>
</compile_context>

<pallas_src>
import jax
import jax.numpy as jnp
from jax.experimental import pallas as pl
from jax.experimental.pallas import tpu as pltpu


# Hidden-layer call schedule for levels 2..12 (index into the 10 distinct hidden
# parameter sets).  Index 2 (== layer4) appears twice because the reference
# forward intentionally reuses self.layer4 for x5.
_HIDDEN_SCHEDULE = (0, 1, 2, 2, 3, 4, 5, 6, 7, 8, 9)


# --------------------------------------------------------------------------
# Fused Pallas kernel: full 13-layer forward + all weighted skip combines
# --------------------------------------------------------------------------

def _gnn_fused_kernel(skip_ref, src_ref, dst_ref, x_ref, ea_ref,
                      wn1_ref, bn1_ref, wnh_ref, bnh_ref, wnl_ref, bnl_ref,
                      wec_ref, bec_ref,
                      out_ref,
                      src_oh_ref, dst_oh_ref, ep_all_ref, eph_ref, hist_ref):
    n_nodes = x_ref.shape[0]
    n_edges = ea_ref.shape[0]
    hidden = wn1_ref.shape[1]
    n_levels = wnh_ref.shape[0]                 # 11 (levels 2..12)
    out_pad = wnl_ref.shape[1]                  # lane-dense padded output width
    n_terms = n_levels + 1                      # 12 skip terms max

    # ---- Incidence one-hots: built ONCE from the index vectors, VMEM-resident,
    #      exact 0/1 values in bf16 (MXU-native on v5e/v6e/v7x).
    src_ids = src_ref[...]                                                 # (E, 1)
    dst_ids = dst_ref[...]                                                 # (1, E)
    edge_vs_node = jax.lax.broadcasted_iota(jnp.int32, (n_edges, n_nodes), 1)
    node_vs_edge = jax.lax.broadcasted_iota(jnp.int32, (n_nodes, n_edges), 0)
    src_oh_ref[...] = jnp.where(edge_vs_node == src_ids, 1.0, 0.0).astype(jnp.bfloat16)
    dst_oh_ref[...] = jnp.where(node_vs_edge == dst_ids, 1.0, 0.0).astype(jnp.bfloat16)

    # ---- ALL 13 edge projections in ONE lane-dense matmul (bf16 x bf16 -> f32).
    ep_all_ref[...] = (
        jnp.dot(ea_ref[...].astype(jnp.bfloat16), wec_ref[...],
                preferred_element_type=jnp.float32) + bec_ref[...])
    # Stage the 11 hidden-level slabs as (11, E, H) so the fori_loop can index
    # them dynamically on the leading axis.
    for l in range(n_levels):
        eph_ref[l] = ep_all_ref[:, hidden * (1 + l):hidden * (2 + l)]

    def message_pass(xin, wn, bn, ep):
        # CustomGraphLayer: relu(scatter_add(relu(Lin_n(x)[src] + Lin_e(e)), dst))
        xn = jnp.dot(xin.astype(jnp.bfloat16), wn,
                     preferred_element_type=jnp.float32) + bn              # (N, F)
        gathered = jnp.dot(src_oh_ref[...], xn.astype(jnp.bfloat16),
                           preferred_element_type=jnp.float32)             # (E, F)
        msg = jnp.maximum(gathered + ep, 0.0)
        agg = jnp.dot(dst_oh_ref[...], msg.astype(jnp.bfloat16),
                      preferred_element_type=jnp.float32)                  # (N, F)
        return jnp.maximum(agg, 0.0)

    # ---- Level 1.  History scratch is zeroed so unused rows (weight 0 in the
    #      skip table) contribute exactly 0 and never touch garbage.
    hist_ref[...] = jnp.zeros_like(hist_ref)
    hist_ref[0] = message_pass(x_ref[...], wn1_ref[...], bn1_ref[...],
                               ep_all_ref[:, :hidden])

    # ---- Levels 2..12: fori_loop with VMEM-scratch history + dynamic indexing
    #      into the schedule-expanded hidden weights.
    def level_body(lvl, carry):
        xk = message_pass(hist_ref[lvl], wnh_ref[lvl], bnh_ref[lvl], eph_ref[lvl])
        hist_ref[lvl + 1] = xk
        # Weighted skip combine over the history scratch.  SMEM scalars are read
        # once up-front; grouped partial sums keep the live set small.
        w = [skip_ref[lvl, j] for j in range(n_terms)]
        acc = None
        for j0 in range(0, n_terms, 4):
            part = hist_ref[j0] * w[j0]
            for j in range(j0 + 1, min(j0 + 4, n_terms)):
                part = part + hist_ref[j] * w[j]
            acc = part if acc is None else acc + part
        hist_ref[lvl + 1] = acc
        return carry

    jax.lax.fori_loop(0, n_levels, level_body, 0)

    # ---- Final layer -> lane-dense padded output (wrapper slices to out_features).
    col0 = hidden * (1 + n_levels)
    out = message_pass(hist_ref[n_levels], wnl_ref[...], bnl_ref[...],
                       ep_all_ref[:, col0:col0 + out_pad])
    out_ref[...] = out.astype(out_ref.dtype)


# --------------------------------------------------------------------------
# Wrapper
# --------------------------------------------------------------------------

_VMEM_SPEC = pl.BlockSpec(memory_space=pltpu.MemorySpace.VMEM)
_SMEM_SPEC = pl.BlockSpec(memory_space=pltpu.MemorySpace.SMEM)


@jax.jit
def gnn_forward(params, x, edge_index, edge_attr):
    n_nodes, node_in = x.shape
    n_edges, edge_in = edge_attr.shape

    wn1, bn1, we1, be1 = params["layer1"]
    wnh, bnh, weh, beh = params["hidden"]
    wnl, bnl, wel, bel = params["layer_last"]

    hidden = wn1.shape[1]
    out_features = wnl.shape[1]
    out_pad = ((out_features + 127) // 128) * 128        # lane-dense output width
    n_levels = len(_HIDDEN_SCHEDULE)
    proj_tot = hidden * (1 + n_levels) + out_pad
    sched = list(_HIDDEN_SCHEDULE)

    # Schedule-expanded hidden node weights (layer4 reuse folded into the stack).
    wnh_s = jnp.stack([wnh[i] for i in sched]).astype(jnp.bfloat16)       # (11,H,H)
    bnh_s = jnp.stack([bnh[i] for i in sched]).astype(jnp.float32)        # (11,1,H)

    # Last layer zero-padded to a 128-multiple output width (lane-dense store).
    wnl_p = jnp.pad(wnl, ((0, 0), (0, out_pad - out_features))).astype(jnp.bfloat16)
    bnl_p = jnp.pad(bnl, ((0, 0), (0, out_pad - out_features))).astype(jnp.float32)
    wel_p = jnp.pad(wel, ((0, 0), (0, out_pad - out_features)))
    bel_p = jnp.pad(bel, ((0, 0), (0, out_pad - out_features)))

    # All 13 layers' edge projections column-concatenated -> ONE matmul in-kernel.
    we_cat = jnp.concatenate([we1] + [weh[i] for i in sched] + [wel_p],
                             axis=1).astype(jnp.bfloat16)                 # (Fe, proj_tot)
    be_cat = jnp.concatenate([be1] + [beh[i] for i in sched] + [bel_p],
                             axis=1).astype(jnp.float32)                  # (1, proj_tot)

    src_ids = edge_index[0].astype(jnp.int32).reshape(n_edges, 1)
    dst_ids = edge_index[1].astype(jnp.int32).reshape(1, n_edges)

    # VMEM budget sized from the actual resident footprint (+2x headroom).
    fp32, bf16 = 4, 2
    vmem_est = (2 * n_edges * n_nodes * bf16                        # incidence
                + n_edges * proj_tot * fp32                         # ep_all scratch
                + n_levels * n_edges * hidden * fp32                # eph slabs
                + (n_levels + 1) * n_nodes * hidden * fp32          # skip history
                + n_levels * hidden * hidden * bf16                 # hidden weights
                + (node_in + hidden) * hidden * bf16 + hidden * out_pad * bf16
                + edge_in * proj_tot * bf16
                + n_nodes * (node_in + out_pad) * fp32
                + n_edges * edge_in * fp32)
    vmem_bytes = int(min(100 * 1024 * 1024, max(32 * 1024 * 1024, 2 * vmem_est)))

    out_padded = pl.pallas_call(
        _gnn_fused_kernel,
        out_shape=jax.ShapeDtypeStruct((n_nodes, out_pad), jnp.float32),
        in_specs=[_SMEM_SPEC] + [_VMEM_SPEC] * 12,
        out_specs=_VMEM_SPEC,
        scratch_shapes=[
            pltpu.VMEM((n_edges, n_nodes), jnp.bfloat16),                 # src one-hot
            pltpu.VMEM((n_nodes, n_edges), jnp.bfloat16),                 # dst one-hot
            pltpu.VMEM((n_edges, proj_tot), jnp.float32),                 # ep_all
            pltpu.VMEM((n_levels, n_edges, hidden), jnp.float32),         # eph slabs
            pltpu.VMEM((n_levels + 1, n_nodes, hidden), jnp.float32),     # history
        ],
        compiler_params=pltpu.CompilerParams(vmem_limit_bytes=vmem_bytes),
    )(params["skip"], src_ids, dst_ids,
      x.astype(jnp.float32), edge_attr.astype(jnp.float32),
      wn1.astype(jnp.bfloat16), bn1.astype(jnp.float32),
      wnh_s, bnh_s, wnl_p, bnl_p, we_cat, be_cat)

    return out_padded[:, :out_features]


# --------------------------------------------------------------------------
# Pure-JAX f32 reference (numerical self-check)
# --------------------------------------------------------------------------

def gnn_reference(params, x, edge_index, edge_attr):
    src = edge_index[0]
    dst = edge_index[1]
    n_nodes = x.shape[0]
    ea = edge_attr.astype(jnp.float32)

    def layer(xin, wn, bn, we, be):
        xn = xin @ wn + bn
        ep = ea @ we + be
        msg = jax.nn.relu(xn[src] + ep)
        agg = jax.ops.segment_sum(msg, dst, num_segments=n_nodes)
        return jax.nn.relu(agg)

    skip = params["skip"]
    wnh, bnh, weh, beh = params["hidden"]

    x1 = layer(x, *params["layer1"])
    hist = [x1]
    xin = x1
    for lvl, li in enumerate(_HIDDEN_SCHEDULE):
        xk = layer(xin, wnh[li], bnh[li], weh[li], beh[li])
        terms = hist + [xk]
        acc = terms[0] * skip[lvl, 0]
        for j in range(1, len(terms)):
            acc = acc + terms[j] * skip[lvl, j]
        hist.append(acc)
        xin = acc
    return layer(xin, *params["layer_last"])


# --------------------------------------------------------------------------
# Parameter construction (deterministic, synthetic)
# --------------------------------------------------------------------------

def make_layer_params(key, in_features, edge_in_features, out_features):
    k1, k2, k3, k4 = jax.random.split(key, 4)
    wn = 0.1 * jax.random.normal(k1, (in_features, out_features), jnp.float32)
    bn = 0.1 * jax.random.normal(k2, (1, out_features), jnp.float32)
    we = 0.1 * jax.random.normal(k3, (edge_in_features, out_features), jnp.float32)
    be = 0.1 * jax.random.normal(k4, (1, out_features), jnp.float32)
    return wn, bn, we, be


def make_gnn_params(key, node_in, edge_in, hidden, out_features):
    keys = jax.random.split(key, 12)
    layer1 = make_layer_params(keys[0], node_in, edge_in, hidden)
    # 10 distinct hidden layers: layer2 .. layer11 (9/10/11 are the TODO extras).
    hidden_list = [make_layer_params(keys[i], hidden, edge_in, hidden)
                   for i in range(1, 11)]
    layer_last = make_layer_params(keys[11], hidden, edge_in, out_features)

    wn_h = jnp.stack([p[0] for p in hidden_list])   # (10, H, H)
    bn_h = jnp.stack([p[1] for p in hidden_list])   # (10, 1, H)
    we_h = jnp.stack([p[2] for p in hidden_list])   # (10, Fe, H)
    be_h = jnp.stack([p[3] for p in hidden_list])   # (10, 1, H)

    # Skip-connection scalar weights (PyTorch init values), padded to (11, 12).
    n_levels = len(_HIDDEN_SCHEDULE)      # 11 (levels 2..12)
    max_terms = n_levels + 1              # 12
    rows = []
    for lvl in range(n_levels):
        vals = [0.6, 0.4] + [0.2] * lvl
        vals = vals + [0.0] * (max_terms - len(vals))
        rows.append(vals)
    skip = jnp.asarray(rows, dtype=jnp.float32)

    return {"layer1": layer1,
            "hidden": (wn_h, bn_h, we_h, be_h),
            "layer_last": layer_last,
            "skip": skip}


# --------------------------------------------------------------------------
# Demo
# --------------------------------------------------------------------------

if __name__ == "__main__":
    NODE_IN, EDGE_IN, HIDDEN, OUT = 4, 6, 32, 16
    N_NODES, N_EDGES = 64, 128

    key = jax.random.PRNGKey(0)
    k_params, k_x, k_ei, k_ea = jax.random.split(key, 4)

    params = make_gnn_params(k_params, NODE_IN, EDGE_IN, HIDDEN, OUT)

    x = jax.random.normal(k_x, (N_NODES, NODE_IN), jnp.float32)
    edge_index = jax.random.randint(k_ei, (2, N_EDGES), 0, N_NODES, jnp.int32)
    edge_attr = jax.random.normal(k_ea, (N_EDGES, EDGE_IN), jnp.float32)

    out = gnn_forward(params, x, edge_index, edge_attr)
    out = jax.block_until_ready(out)

    assert out.shape == (N_NODES, OUT), out.shape
    assert bool(jnp.all(jnp.isfinite(out)))

    # Check vs. the f32 pure-JAX reference.  Kernel matmuls use bf16 operands
    # with f32 accumulation across 13 layers, so a few percent of drift at the
    # largest outputs is expected; 0.1 normalized max-error bound is comfortable.
    ref = gnn_reference(params, x, edge_index, edge_attr)
    rel_err = float(jnp.max(jnp.abs(out - ref)) / (jnp.max(jnp.abs(ref)) + 1e-6))
    assert rel_err < 0.1, rel_err

    print("KERNEL_OK")
</pallas_src>

<mosaic_0001>
module attributes {stable_mosaic.version = 11 : i64} {
  func.func @_gnn_fused_kernel(%arg0: memref<11x12xf32, #tpu.memory_space<smem>>, %arg1: memref<128x1xi32, #tpu.memory_space<vmem>>, %arg2: memref<1x128xi32, #tpu.memory_space<vmem>>, %arg3: memref<64x4xf32, #tpu.memory_space<vmem>>, %arg4: memref<128x6xf32, #tpu.memory_space<vmem>>, %arg5: memref<4x32xbf16, #tpu.memory_space<vmem>>, %arg6: memref<1x32xf32, #tpu.memory_space<vmem>>, %arg7: memref<11x32x32xbf16, #tpu.memory_space<vmem>>, %arg8: memref<11x1x32xf32, #tpu.memory_space<vmem>>, %arg9: memref<32x128xbf16, #tpu.memory_space<vmem>>, %arg10: memref<1x128xf32, #tpu.memory_space<vmem>>, %arg11: memref<6x512xbf16, #tpu.memory_space<vmem>>, %arg12: memref<1x512xf32, #tpu.memory_space<vmem>>, %arg13: memref<64x128xf32, #tpu.memory_space<vmem>>, %arg14: memref<128x64xbf16, #tpu.memory_space<vmem>>, %arg15: memref<64x128xbf16, #tpu.memory_space<vmem>>, %arg16: memref<128x512xf32, #tpu.memory_space<vmem>>, %arg17: memref<11x128x32xf32, #tpu.memory_space<vmem>>, %arg18: memref<12x64x32xf32, #tpu.memory_space<vmem>>) attributes {dimension_semantics = [], scalar_prefetch = 0 : i64, scratch_operands = 5 : i64, tpu.core_type = #tpu.core_type<tc>} {
    %c0 = arith.constant 0 : index
    %c0_0 = arith.constant 0 : index
    %0 = vector.load %arg1[%c0, %c0_0] : memref<128x1xi32, #tpu.memory_space<vmem>>, vector<128x1xi32>
    %c0_1 = arith.constant 0 : index
    %c0_2 = arith.constant 0 : index
    %1 = vector.load %arg2[%c0_1, %c0_2] : memref<1x128xi32, #tpu.memory_space<vmem>>, vector<1x128xi32>
    %2 = tpu.iota {dimensions = array<i32: 1>} : vector<128x64xi32>
    %3 = tpu.iota {dimensions = array<i32: 0>} : vector<64x128xi32>
    %4 = vector.broadcast %0 : vector<128x1xi32> to vector<128x64xi32>
    %5 = arith.cmpi eq, %2, %4 : vector<128x64xi32>
    %cst = arith.constant 1.000000e+00 : f32
    %cst_3 = arith.constant 0.000000e+00 : f32
    %6 = vector.broadcast %cst : f32 to vector<128x64xf32>
    %7 = vector.broadcast %cst_3 : f32 to vector<128x64xf32>
    %8 = arith.select %5, %6, %7 : vector<128x64xi1>, vector<128x64xf32>
    %9 = arith.truncf %8 : vector<128x64xf32> to vector<128x64xbf16>
    %c0_4 = arith.constant 0 : index
    %c0_5 = arith.constant 0 : index
    %10 = vector.load %arg14[%c0_4, %c0_5] : memref<128x64xbf16, #tpu.memory_space<vmem>>, vector<128x64xbf16>
    tpu.vector_store %arg14[%c0_4, %c0_5], %9 {strides = array<i32>} : memref<128x64xbf16, #tpu.memory_space<vmem>>, vector<128x64xbf16>,
    %11 = vector.broadcast %1 : vector<1x128xi32> to vector<64x128xi32>
    %12 = arith.cmpi eq, %3, %11 : vector<64x128xi32>
    %cst_6 = arith.constant 1.000000e+00 : f32
    %cst_7 = arith.constant 0.000000e+00 : f32
    %13 = vector.broadcast %cst_6 : f32 to vector<64x128xf32>
    %14 = vector.broadcast %cst_7 : f32 to vector<64x128xf32>
    %15 = arith.select %12, %13, %14 : vector<64x128xi1>, vector<64x128xf32>
    %16 = arith.truncf %15 : vector<64x128xf32> to vector<64x128xbf16>
    %c0_8 = arith.constant 0 : index
    %c0_9 = arith.constant 0 : index
    %17 = vector.load %arg15[%c0_8, %c0_9] : memref<64x128xbf16, #tpu.memory_space<vmem>>, vector<64x128xbf16>
    tpu.vector_store %arg15[%c0_8, %c0_9], %16 {strides = array<i32>} : memref<64x128xbf16, #tpu.memory_space<vmem>>, vector<64x128xbf16>,
    %c0_10 = arith.constant 0 : index
    %c0_11 = arith.constant 0 : index
    %18 = vector.load %arg4[%c0_10, %c0_11] : memref<128x6xf32, #tpu.memory_space<vmem>>, vector<128x6xf32>
    %19 = arith.truncf %18 : vector<128x6xf32> to vector<128x6xbf16>
    %c0_12 = arith.constant 0 : index
    %c0_13 = arith.constant 0 : index
    %20 = vector.load %arg11[%c0_12, %c0_13] : memref<6x512xbf16, #tpu.memory_space<vmem>>, vector<6x512xbf16>
    %cst_14 = arith.constant dense<0.000000e+00> : vector<128x512xf32>
    %21 = tpu.matmul %19, %20, %cst_14 {dimension_numbers = #tpu.dot_dimension_numbers<[1], [0], [0], [1], [0, 0, 1, 1], [], []>} : vector<128x6xbf16>, vector<6x512xbf16>, vector<128x512xf32> -> vector<128x512xf32>
    %c0_15 = arith.constant 0 : index
    %c0_16 = arith.constant 0 : index
    %22 = vector.load %arg12[%c0_15, %c0_16] : memref<1x512xf32, #tpu.memory_space<vmem>>, vector<1x512xf32>
    %23 = vector.broadcast %22 : vector<1x512xf32> to vector<128x512xf32>
    %24 = arith.addf %21, %23 : vector<128x512xf32>
    %c0_17 = arith.constant 0 : index
    %c0_18 = arith.constant 0 : index
    %25 = vector.load %arg16[%c0_17, %c0_18] : memref<128x512xf32, #tpu.memory_space<vmem>>, vector<128x512xf32>
    tpu.vector_store %arg16[%c0_17, %c0_18], %24 {strides = array<i32>} : memref<128x512xf32, #tpu.memory_space<vmem>>, vector<128x512xf32>,
    %c0_19 = arith.constant 0 : index
    %c32 = arith.constant 32 : index
    %26 = vector.load %arg16[%c0_19, %c32] : memref<128x512xf32, #tpu.memory_space<vmem>>, vector<128x32xf32>
    %c0_20 = arith.constant 0 : index
    %c0_21 = arith.constant 0 : index
    %c0_22 = arith.constant 0 : index
    %27 = vector.load %arg17[%c0_20, %c0_21, %c0_22] : memref<11x128x32xf32, #tpu.memory_space<vmem>>, vector<1x128x32xf32>
    %28 = vector.shape_cast %27 : vector<1x128x32xf32> to vector<128x32xf32>
    %29 = vector.shape_cast %26 : vector<128x32xf32> to vector<1x128x32xf32>
    tpu.vector_store %arg17[%c0_20, %c0_21, %c0_22], %29 {strides = array<i32>} : memref<11x128x32xf32, #tpu.memory_space<vmem>>, vector<1x128x32xf32>,
    %c0_23 = arith.constant 0 : index
    %c64 = arith.constant 64 : index
    %30 = vector.load %arg16[%c0_23, %c64] : memref<128x512xf32, #tpu.memory_space<vmem>>, vector<128x32xf32>
    %c1 = arith.constant 1 : index
    %c0_24 = arith.constant 0 : index
    %c0_25 = arith.constant 0 : index
    %31 = vector.load %arg17[%c1, %c0_24, %c0_25] : memref<11x128x32xf32, #tpu.memory_space<vmem>>, vector<1x128x32xf32>
    %32 = vector.shape_cast %31 : vector<1x128x32xf32> to vector<128x32xf32>
    %33 = vector.shape_cast %30 : vector<128x32xf32> to vector<1x128x32xf32>
    tpu.vector_store %arg17[%c1, %c0_24, %c0_25], %33 {strides = array<i32>} : memref<11x128x32xf32, #tpu.memory_space<vmem>>, vector<1x128x32xf32>,
    %c0_26 = arith.constant 0 : index
    %c96 = arith.constant 96 : index
    %34 = vector.load %arg16[%c0_26, %c96] : memref<128x512xf32, #tpu.memory_space<vmem>>, vector<128x32xf32>
    %c2 = arith.constant 2 : index
    %c0_27 = arith.constant 0 : index
    %c0_28 = arith.constant 0 : index
    %35 = vector.load %arg17[%c2, %c0_27, %c0_28] : memref<11x128x32xf32, #tpu.memory_space<vmem>>, vector<1x128x32xf32>
    %36 = vector.shape_cast %35 : vector<1x128x32xf32> to vector<128x32xf32>
    %37 = vector.shape_cast %34 : vector<128x32xf32> to vector<1x128x32xf32>
    tpu.vector_store %arg17[%c2, %c0_27, %c0_28], %37 {strides = array<i32>} : memref<11x128x32xf32, #tpu.memory_space<vmem>>, vector<1x128x32xf32>,
    %c0_29 = arith.constant 0 : index
    %c128 = arith.constant 128 : index
    %38 = vector.load %arg16[%c0_29, %c128] : memref<128x512xf32, #tpu.memory_space<vmem>>, vector<128x32xf32>
    %c3 = arith.constant 3 : index
    %c0_30 = arith.constant 0 : index
    %c0_31 = arith.constant 0 : index
    %39 = vector.load %arg17[%c3, %c0_30, %c0_31] : memref<11x128x32xf32, #tpu.memory_space<vmem>>, vector<1x128x32xf32>
    %40 = vector.shape_cast %39 : vector<1x128x32xf32> to vector<128x32xf32>
    %41 = vector.shape_cast %38 : vector<128x32xf32> to vector<1x128x32xf32>
    tpu.vector_store %arg17[%c3, %c0_30, %c0_31], %41 {strides = array<i32>} : memref<11x128x32xf32, #tpu.memory_space<vmem>>, vector<1x128x32xf32>,
    %c0_32 = arith.constant 0 : index
    %c160 = arith.constant 160 : index
    %42 = vector.load %arg16[%c0_32, %c160] : memref<128x512xf32, #tpu.memory_space<vmem>>, vector<128x32xf32>
    %c4 = arith.constant 4 : index
    %c0_33 = arith.constant 0 : index
    %c0_34 = arith.constant 0 : index
    %43 = vector.load %arg17[%c4, %c0_33, %c0_34] : memref<11x128x32xf32, #tpu.memory_space<vmem>>, vector<1x128x32xf32>
    %44 = vector.shape_cast %43 : vector<1x128x32xf32> to vector<128x32xf32>
    %45 = vector.shape_cast %42 : vector<128x32xf32> to vector<1x128x32xf32>
    tpu.vector_store %arg17[%c4, %c0_33, %c0_34], %45 {strides = array<i32>} : memref<11x128x32xf32, #tpu.memory_space<vmem>>, vector<1x128x32xf32>,
    %c0_35 = arith.constant 0 : index
    %c192 = arith.constant 192 : index
    %46 = vector.load %arg16[%c0_35, %c192] : memref<128x512xf32, #tpu.memory_space<vmem>>, vector<128x32xf32>
    %c5 = arith.constant 5 : index
    %c0_36 = arith.constant 0 : index
    %c0_37 = arith.constant 0 : index
    %47 = vector.load %arg17[%c5, %c0_36, %c0_37] : memref<11x128x32xf32, #tpu.memory_space<vmem>>, vector<1x128x32xf32>
    %48 = vector.shape_cast %47 : vector<1x128x32xf32> to vector<128x32xf32>
    %49 = vector.shape_cast %46 : vector<128x32xf32> to vector<1x128x32xf32>
    tpu.vector_store %arg17[%c5, %c0_36, %c0_37], %49 {strides = array<i32>} : memref<11x128x32xf32, #tpu.memory_space<vmem>>, vector<1x128x32xf32>,
    %c0_38 = arith.constant 0 : index
    %c224 = arith.constant 224 : index
    %50 = vector.load %arg16[%c0_38, %c224] : memref<128x512xf32, #tpu.memory_space<vmem>>, vector<128x32xf32>
    %c6 = arith.constant 6 : index
    %c0_39 = arith.constant 0 : index
    %c0_40 = arith.constant 0 : index
    %51 = vector.load %arg17[%c6, %c0_39, %c0_40] : memref<11x128x32xf32, #tpu.memory_space<vmem>>, vector<1x128x32xf32>
    %52 = vector.shape_cast %51 : vector<1x128x32xf32> to vector<128x32xf32>
    %53 = vector.shape_cast %50 : vector<128x32xf32> to vector<1x128x32xf32>
    tpu.vector_store %arg17[%c6, %c0_39, %c0_40], %53 {strides = array<i32>} : memref<11x128x32xf32, #tpu.memory_space<vmem>>, vector<1x128x32xf32>,
    %c0_41 = arith.constant 0 : index
    %c256 = arith.constant 256 : index
    %54 = vector.load %arg16[%c0_41, %c256] : memref<128x512xf32, #tpu.memory_space<vmem>>, vector<128x32xf32>
    %c7 = arith.constant 7 : index
    %c0_42 = arith.constant 0 : index
    %c0_43 = arith.constant 0 : index
    %55 = vector.load %arg17[%c7, %c0_42, %c0_43] : memref<11x128x32xf32, #tpu.memory_space<vmem>>, vector<1x128x32xf32>
    %56 = vector.shape_cast %55 : vector<1x128x32xf32> to vector<128x32xf32>
    %57 = vector.shape_cast %54 : vector<128x32xf32> to vector<1x128x32xf32>
    tpu.vector_store %arg17[%c7, %c0_42, %c0_43], %57 {strides = array<i32>} : memref<11x128x32xf32, #tpu.memory_space<vmem>>, vector<1x128x32xf32>,
    %c0_44 = arith.constant 0 : index
    %c288 = arith.constant 288 : index
    %58 = vector.load %arg16[%c0_44, %c288] : memref<128x512xf32, #tpu.memory_space<vmem>>, vector<128x32xf32>
    %c8 = arith.constant 8 : index
    %c0_45 = arith.constant 0 : index
    %c0_46 = arith.constant 0 : index
    %59 = vector.load %arg17[%c8, %c0_45, %c0_46] : memref<11x128x32xf32, #tpu.memory_space<vmem>>, vector<1x128x32xf32>
    %60 = vector.shape_cast %59 : vector<1x128x32xf32> to vector<128x32xf32>
    %61 = vector.shape_cast %58 : vector<128x32xf32> to vector<1x128x32xf32>
    tpu.vector_store %arg17[%c8, %c0_45, %c0_46], %61 {strides = array<i32>} : memref<11x128x32xf32, #tpu.memory_space<vmem>>, vector<1x128x32xf32>,
    %c0_47 = arith.constant 0 : index
    %c320 = arith.constant 320 : index
    %62 = vector.load %arg16[%c0_47, %c320] : memref<128x512xf32, #tpu.memory_space<vmem>>, vector<128x32xf32>
    %c9 = arith.constant 9 : index
    %c0_48 = arith.constant 0 : index
    %c0_49 = arith.constant 0 : index
    %63 = vector.load %arg17[%c9, %c0_48, %c0_49] : memref<11x128x32xf32, #tpu.memory_space<vmem>>, vector<1x128x32xf32>
    %64 = vector.shape_cast %63 : vector<1x128x32xf32> to vector<128x32xf32>
    %65 = vector.shape_cast %62 : vector<128x32xf32> to vector<1x128x32xf32>
    tpu.vector_store %arg17[%c9, %c0_48, %c0_49], %65 {strides = array<i32>} : memref<11x128x32xf32, #tpu.memory_space<vmem>>, vector<1x128x32xf32>,
    %c0_50 = arith.constant 0 : index
    %c352 = arith.constant 352 : index
    %66 = vector.load %arg16[%c0_50, %c352] : memref<128x512xf32, #tpu.memory_space<vmem>>, vector<128x32xf32>
    %c10 = arith.constant 10 : index
    %c0_51 = arith.constant 0 : index
    %c0_52 = arith.constant 0 : index
    %67 = vector.load %arg17[%c10, %c0_51, %c0_52] : memref<11x128x32xf32, #tpu.memory_space<vmem>>, vector<1x128x32xf32>
    %68 = vector.shape_cast %67 : vector<1x128x32xf32> to vector<128x32xf32>
    %69 = vector.shape_cast %66 : vector<128x32xf32> to vector<1x128x32xf32>
    tpu.vector_store %arg17[%c10, %c0_51, %c0_52], %69 {strides = array<i32>} : memref<11x128x32xf32, #tpu.memory_space<vmem>>, vector<1x128x32xf32>,
    %cst_53 = arith.constant 0.000000e+00 : f32
    %70 = vector.broadcast %cst_53 : f32 to vector<12x64x32xf32>
    %c0_54 = arith.constant 0 : index
    %c0_55 = arith.constant 0 : index
    %c0_56 = arith.constant 0 : index
    %71 = vector.load %arg18[%c0_54, %c0_55, %c0_56] : memref<12x64x32xf32, #tpu.memory_space<vmem>>, vector<12x64x32xf32>
    tpu.vector_store %arg18[%c0_54, %c0_55, %c0_56], %70 {strides = array<i32>} : memref<12x64x32xf32, #tpu.memory_space<vmem>>, vector<12x64x32xf32>,
    %c0_57 = arith.constant 0 : index
    %c0_58 = arith.constant 0 : index
    %72 = vector.load %arg3[%c0_57, %c0_58] : memref<64x4xf32, #tpu.memory_space<vmem>>, vector<64x4xf32>
    %c0_59 = arith.constant 0 : index
    %c0_60 = arith.constant 0 : index
    %73 = vector.load %arg5[%c0_59, %c0_60] : memref<4x32xbf16, #tpu.memory_space<vmem>>, vector<4x32xbf16>
    %c0_61 = arith.constant 0 : index
    %c0_62 = arith.constant 0 : index
    %74 = vector.load %arg6[%c0_61, %c0_62] : memref<1x32xf32, #tpu.memory_space<vmem>>, vector<1x32xf32>
    %c0_63 = arith.constant 0 : index
    %c0_64 = arith.constant 0 : index
    %75 = vector.load %arg16[%c0_63, %c0_64] : memref<128x512xf32, #tpu.memory_space<vmem>>, vector<128x32xf32>
    %76 = arith.truncf %72 : vector<64x4xf32> to vector<64x4xbf16>
    %cst_65 = arith.constant dense<0.000000e+00> : vector<64x32xf32>
    %77 = tpu.matmul %76, %73, %cst_65 {dimension_numbers = #tpu.dot_dimension_numbers<[1], [0], [0], [1], [0, 0, 1, 1], [], []>} : vector<64x4xbf16>, vector<4x32xbf16>, vector<64x32xf32> -> vector<64x32xf32>
    %78 = vector.broadcast %74 : vector<1x32xf32> to vector<64x32xf32>
    %79 = arith.addf %77, %78 : vector<64x32xf32>
    %c0_66 = arith.constant 0 : index
    %c0_67 = arith.constant 0 : index
    %80 = vector.load %arg14[%c0_66, %c0_67] : memref<128x64xbf16, #tpu.memory_space<vmem>>, vector<128x64xbf16>
    %81 = arith.truncf %79 : vector<64x32xf32> to vector<64x32xbf16>
    %cst_68 = arith.constant dense<0.000000e+00> : vector<128x32xf32>
    %82 = tpu.matmul %80, %81, %cst_68 {dimension_numbers = #tpu.dot_dimension_numbers<[1], [0], [0], [1], [0, 0, 1, 1], [], []>} : vector<128x64xbf16>, vector<64x32xbf16>, vector<128x32xf32> -> vector<128x32xf32>
    %83 = arith.addf %82, %75 : vector<128x32xf32>
    %cst_69 = arith.constant 0.000000e+00 : f32
    %84 = vector.broadcast %cst_69 : f32 to vector<128x32xf32>
    %85 = arith.maximumf %83, %84 : vector<128x32xf32>
    %c0_70 = arith.constant 0 : index
    %c0_71 = arith.constant 0 : index
    %86 = vector.load %arg15[%c0_70, %c0_71] : memref<64x128xbf16, #tpu.memory_space<vmem>>, vector<64x128xbf16>
    %87 = arith.truncf %85 : vector<128x32xf32> to vector<128x32xbf16>
    %cst_72 = arith.constant dense<0.000000e+00> : vector<64x32xf32>
    %88 = tpu.matmul %86, %87, %cst_72 {dimension_numbers = #tpu.dot_dimension_numbers<[1], [0], [0], [1], [0, 0, 1, 1], [], []>} : vector<64x128xbf16>, vector<128x32xbf16>, vector<64x32xf32> -> vector<64x32xf32>
    %cst_73 = arith.constant 0.000000e+00 : f32
    %89 = vector.broadcast %cst_73 : f32 to vector<64x32xf32>
    %90 = arith.maximumf %88, %89 : vector<64x32xf32>
    %c0_74 = arith.constant 0 : index
    %c0_75 = arith.constant 0 : index
    %c0_76 = arith.constant 0 : index
    %91 = vector.load %arg18[%c0_74, %c0_75, %c0_76] : memref<12x64x32xf32, #tpu.memory_space<vmem>>, vector<1x64x32xf32>
    %92 = vector.shape_cast %91 : vector<1x64x32xf32> to vector<64x32xf32>
    %93 = vector.shape_cast %90 : vector<64x32xf32> to vector<1x64x32xf32>
    tpu.vector_store %arg18[%c0_74, %c0_75, %c0_76], %93 {strides = array<i32>} : memref<12x64x32xf32, #tpu.memory_space<vmem>>, vector<1x64x32xf32>,
    %c0_i32 = arith.constant 0 : i32
    %c11_i32 = arith.constant 11 : i32
    %94 = arith.addi %c0_i32, %c11_i32 : i32
    %c1_i32 = arith.constant 1 : i32
    scf.for %arg19 = %c0_i32 to %94 step %c1_i32  : i32 {
      %116 = arith.index_cast %arg19 : i32 to index
      %c0_96 = arith.constant 0 : index
      %c0_97 = arith.constant 0 : index
      %117 = vector.load %arg18[%116, %c0_96, %c0_97] : memref<12x64x32xf32, #tpu.memory_space<vmem>>, vector<1x64x32xf32>
      %118 = vector.shape_cast %117 : vector<1x64x32xf32> to vector<64x32xf32>
      %119 = arith.index_cast %arg19 : i32 to index
      %c0_98 = arith.constant 0 : index
      %c0_99 = arith.constant 0 : index
      %120 = vector.load %arg7[%119, %c0_98, %c0_99] : memref<11x32x32xbf16, #tpu.memory_space<vmem>>, vector<1x32x32xbf16>
      %121 = vector.shape_cast %120 : vector<1x32x32xbf16> to vector<32x32xbf16>
      %122 = arith.index_cast %arg19 : i32 to index
      %c0_100 = arith.constant 0 : index
      %c0_101 = arith.constant 0 : index
      %123 = vector.load %arg8[%122, %c0_100, %c0_101] : memref<11x1x32xf32, #tpu.memory_space<vmem>>, vector<1x1x32xf32>
      %124 = vector.shape_cast %123 : vector<1x1x32xf32> to vector<1x32xf32>
      %125 = arith.index_cast %arg19 : i32 to index
      %c0_102 = arith.constant 0 : index
      %c0_103 = arith.constant 0 : index
      %126 = vector.load %arg17[%125, %c0_102, %c0_103] : memref<11x128x32xf32, #tpu.memory_space<vmem>>, vector<1x128x32xf32>
      %127 = vector.shape_cast %126 : vector<1x128x32xf32> to vector<128x32xf32>
      %128 = arith.truncf %118 : vector<64x32xf32> to vector<64x32xbf16>
      %cst_104 = arith.constant dense<0.000000e+00> : vector<64x32xf32>
      %129 = tpu.matmul %128, %121, %cst_104 {dimension_numbers = #tpu.dot_dimension_numbers<[1], [0], [0], [1], [0, 0, 1, 1], [], []>} : vector<64x32xbf16>, vector<32x32xbf16>, vector<64x32xf32> -> vector<64x32xf32>
      %130 = vector.broadcast %124 : vector<1x32xf32> to vector<64x32xf32>
      %131 = arith.addf %129, %130 : vector<64x32xf32>
      %c0_105 = arith.constant 0 : index
      %c0_106 = arith.constant 0 : index
      %132 = vector.load %arg14[%c0_105, %c0_106] : memref<128x64xbf16, #tpu.memory_space<vmem>>, vector<128x64xbf16>
      %133 = arith.truncf %131 : vector<64x32xf32> to vector<64x32xbf16>
      %cst_107 = arith.constant dense<0.000000e+00> : vector<128x32xf32>
      %134 = tpu.matmul %132, %133, %cst_107 {dimension_numbers = #tpu.dot_dimension_numbers<[1], [0], [0], [1], [0, 0, 1, 1], [], []>} : vector<128x64xbf16>, vector<64x32xbf16>, vector<128x32xf32> -> vector<128x32xf32>
      %135 = arith.addf %134, %127 : vector<128x32xf32>
      %cst_108 = arith.constant 0.000000e+00 : f32
      %136 = vector.broadcast %cst_108 : f32 to vector<128x32xf32>
      %137 = arith.maximumf %135, %136 : vector<128x32xf32>
      %c0_109 = arith.constant 0 : index
      %c0_110 = arith.constant 0 : index
      %138 = vector.load %arg15[%c0_109, %c0_110] : memref<64x128xbf16, #tpu.memory_space<vmem>>, vector<64x128xbf16>
      %139 = arith.truncf %137 : vector<128x32xf32> to vector<128x32xbf16>
      %cst_111 = arith.constant dense<0.000000e+00> : vector<64x32xf32>
      %140 = tpu.matmul %138, %139, %cst_111 {dimension_numbers = #tpu.dot_dimension_numbers<[1], [0], [0], [1], [0, 0, 1, 1], [], []>} : vector<64x128xbf16>, vector<128x32xbf16>, vector<64x32xf32> -> vector<64x32xf32>
      %cst_112 = arith.constant 0.000000e+00 : f32
      %141 = vector.broadcast %cst_112 : f32 to vector<64x32xf32>
      %142 = arith.maximumf %140, %141 : vector<64x32xf32>
      %c1_i32_113 = arith.constant 1 : i32
      %143 = arith.addi %arg19, %c1_i32_113 : i32
      %144 = arith.index_cast %143 : i32 to index
      %c0_114 = arith.constant 0 : index
      %c0_115 = arith.constant 0 : index
      %145 = vector.load %arg18[%144, %c0_114, %c0_115] : memref<12x64x32xf32, #tpu.memory_space<vmem>>, vector<1x64x32xf32>
      %146 = vector.shape_cast %145 : vector<1x64x32xf32> to vector<64x32xf32>
      %147 = vector.shape_cast %142 : vector<64x32xf32> to vector<1x64x32xf32>
      tpu.vector_store %arg18[%144, %c0_114, %c0_115], %147 {strides = array<i32>} : memref<12x64x32xf32, #tpu.memory_space<vmem>>, vector<1x64x32xf32>,
      %148 = arith.index_cast %arg19 : i32 to index
      %c0_116 = arith.constant 0 : index
      %149 = memref.load %arg0[%148, %c0_116] : memref<11x12xf32, #tpu.memory_space<smem>>
      %150 = arith.index_cast %arg19 : i32 to index
      %c1_117 = arith.constant 1 : index
      %151 = memref.load %arg0[%150, %c1_117] : memref<11x12xf32, #tpu.memory_space<smem>>
      %152 = arith.index_cast %arg19 : i32 to index
      %c2_118 = arith.constant 2 : index
      %153 = memref.load %arg0[%152, %c2_118] : memref<11x12xf32, #tpu.memory_space<smem>>
      %154 = arith.index_cast %arg19 : i32 to index
      %c3_119 = arith.constant 3 : index
      %155 = memref.load %arg0[%154, %c3_119] : memref<11x12xf32, #tpu.memory_space<smem>>
      %156 = arith.index_cast %arg19 : i32 to index
      %c4_120 = arith.constant 4 : index
      %157 = memref.load %arg0[%156, %c4_120] : memref<11x12xf32, #tpu.memory_space<smem>>
      %158 = arith.index_cast %arg19 : i32 to index
      %c5_121 = arith.constant 5 : index
      %159 = memref.load %arg0[%158, %c5_121] : memref<11x12xf32, #tpu.memory_space<smem>>
      %160 = arith.index_cast %arg19 : i32 to index
      %c6_122 = arith.constant 6 : index
      %161 = memref.load %arg0[%160, %c6_122] : memref<11x12xf32, #tpu.memory_space<smem>>
      %162 = arith.index_cast %arg19 : i32 to index
      %c7_123 = arith.constant 7 : index
      %163 = memref.load %arg0[%162, %c7_123] : memref<11x12xf32, #tpu.memory_space<smem>>
      %164 = arith.index_cast %arg19 : i32 to index
      %c8_124 = arith.constant 8 : index
      %165 = memref.load %arg0[%164, %c8_124] : memref<11x12xf32, #tpu.memory_space<smem>>
      %166 = arith.index_cast %arg19 : i32 to index
      %c9_125 = arith.constant 9 : index
      %167 = memref.load %arg0[%166, %c9_125] : memref<11x12xf32, #tpu.memory_space<smem>>
      %168 = arith.index_cast %arg19 : i32 to index
      %c10_126 = arith.constant 10 : index
      %169 = memref.load %arg0[%168, %c10_126] : memref<11x12xf32, #tpu.memory_space<smem>>
      %170 = arith.index_cast %arg19 : i32 to index
      %c11_127 = arith.constant 11 : index
      %171 = memref.load %arg0[%170, %c11_127] : memref<11x12xf32, #tpu.memory_space<smem>>
      %c0_128 = arith.constant 0 : index
      %c0_129 = arith.constant 0 : index
      %c0_130 = arith.constant 0 : index
      %172 = vector.load %arg18[%c0_128, %c0_129, %c0_130] : memref<12x64x32xf32, #tpu.memory_space<vmem>>, vector<1x64x32xf32>
      %173 = vector.shape_cast %172 : vector<1x64x32xf32> to vector<64x32xf32>
      %174 = vector.broadcast %149 : f32 to vector<64x32xf32>
      %175 = arith.mulf %173, %174 : vector<64x32xf32>
      %c1_131 = arith.constant 1 : index
      %c0_132 = arith.constant 0 : index
      %c0_133 = arith.constant 0 : index
      %176 = vector.load %arg18[%c1_131, %c0_132, %c0_133] : memref<12x64x32xf32, #tpu.memory_space<vmem>>, vector<1x64x32xf32>
      %177 = vector.shape_cast %176 : vector<1x64x32xf32> to vector<64x32xf32>
      %178 = vector.broadcast %151 : f32 to vector<64x32xf32>
      %179 = arith.mulf %177, %178 : vector<64x32xf32>
      %180 = arith.addf %175, %179 : vector<64x32xf32>
      %c2_134 = arith.constant 2 : index
      %c0_135 = arith.constant 0 : index
      %c0_136 = arith.constant 0 : index
      %181 = vector.load %arg18[%c2_134, %c0_135, %c0_136] : memref<12x64x32xf32, #tpu.memory_space<vmem>>, vector<1x64x32xf32>
      %182 = vector.shape_cast %181 : vector<1x64x32xf32> to vector<64x32xf32>
      %183 = vector.broadcast %153 : f32 to vector<64x32xf32>
      %184 = arith.mulf %182, %183 : vector<64x32xf32>
      %185 = arith.addf %180, %184 : vector<64x32xf32>
      %c3_137 = arith.constant 3 : index
      %c0_138 = arith.constant 0 : index
      %c0_139 = arith.constant 0 : index
      %186 = vector.load %arg18[%c3_137, %c0_138, %c0_139] : memref<12x64x32xf32, #tpu.memory_space<vmem>>, vector<1x64x32xf32>
      %187 = vector.shape_cast %186 : vector<1x64x32xf32> to vector<64x32xf32>
      %188 = vector.broadcast %155 : f32 to vector<64x32xf32>
      %189 = arith.mulf %187, %188 : vector<64x32xf32>
      %190 = arith.addf %185, %189 : vector<64x32xf32>
      %c4_140 = arith.constant 4 : index
      %c0_141 = arith.constant 0 : index
      %c0_142 = arith.constant 0 : index
      %191 = vector.load %arg18[%c4_140, %c0_141, %c0_142] : memref<12x64x32xf32, #tpu.memory_space<vmem>>, vector<1x64x32xf32>
      %192 = vector.shape_cast %191 : vector<1x64x32xf32> to vector<64x32xf32>
      %193 = vector.broadcast %157 : f32 to vector<64x32xf32>
      %194 = arith.mulf %192, %193 : vector<64x32xf32>
      %c5_143 = arith.constant 5 : index
      %c0_144 = arith.constant 0 : index
      %c0_145 = arith.constant 0 : index
      %195 = vector.load %arg18[%c5_143, %c0_144, %c0_145] : memref<12x64x32xf32, #tpu.memory_space<vmem>>, vector<1x64x32xf32>
      %196 = vector.shape_cast %195 : vector<1x64x32xf32> to vector<64x32xf32>
      %197 = vector.broadcast %159 : f32 to vector<64x32xf32>
      %198 = arith.mulf %196, %197 : vector<64x32xf32>
      %199 = arith.addf %194, %198 : vector<64x32xf32>
      %c6_146 = arith.constant 6 : index
      %c0_147 = arith.constant 0 : index
      %c0_148 = arith.constant 0 : index
      %200 = vector.load %arg18[%c6_146, %c0_147, %c0_148] : memref<12x64x32xf32, #tpu.memory_space<vmem>>, vector<1x64x32xf32>
      %201 = vector.shape_cast %200 : vector<1x64x32xf32> to vector<64x32xf32>
      %202 = vector.broadcast %161 : f32 to vector<64x32xf32>
      %203 = arith.mulf %201, %202 : vector<64x32xf32>
      %204 = arith.addf %199, %203 : vector<64x32xf32>
      %c7_149 = arith.constant 7 : index
      %c0_150 = arith.constant 0 : index
      %c0_151 = arith.constant 0 : index
      %205 = vector.load %arg18[%c7_149, %c0_150, %c0_151] : memref<12x64x32xf32, #tpu.memory_space<vmem>>, vector<1x64x32xf32>
      %206 = vector.shape_cast %205 : vector<1x64x32xf32> to vector<64x32xf32>
      %207 = vector.broadcast %163 : f32 to vector<64x32xf32>
      %208 = arith.mulf %206, %207 : vector<64x32xf32>
      %209 = arith.addf %204, %208 : vector<64x32xf32>
      %210 = arith.addf %190, %209 : vector<64x32xf32>
      %c8_152 = arith.constant 8 : index
      %c0_153 = arith.constant 0 : index
      %c0_154 = arith.constant 0 : index
      %211 = vector.load %arg18[%c8_152, %c0_153, %c0_154] : memref<12x64x32xf32, #tpu.memory_space<vmem>>, vector<1x64x32xf32>
      %212 = vector.shape_cast %211 : vector<1x64x32xf32> to vector<64x32xf32>
      %213 = vector.broadcast %165 : f32 to vector<64x32xf32>
      %214 = arith.mulf %212, %213 : vector<64x32xf32>
      %c9_155 = arith.constant 9 : index
      %c0_156 = arith.constant 0 : index
      %c0_157 = arith.constant 0 : index
      %215 = vector.load %arg18[%c9_155, %c0_156, %c0_157] : memref<12x64x32xf32, #tpu.memory_space<vmem>>, vector<1x64x32xf32>
      %216 = vector.shape_cast %215 : vector<1x64x32xf32> to vector<64x32xf32>
      %217 = vector.broadcast %167 : f32 to vector<64x32xf32>
      %218 = arith.mulf %216, %217 : vector<64x32xf32>
      %219 = arith.addf %214, %218 : vector<64x32xf32>
      %c10_158 = arith.constant 10 : index
      %c0_159 = arith.constant 0 : index
      %c0_160 = arith.constant 0 : index
      %220 = vector.load %arg18[%c10_158, %c0_159, %c0_160] : memref<12x64x32xf32, #tpu.memory_space<vmem>>, vector<1x64x32xf32>
      %221 = vector.shape_cast %220 : vector<1x64x32xf32> to vector<64x32xf32>
      %222 = vector.broadcast %169 : f32 to vector<64x32xf32>
      %223 = arith.mulf %221, %222 : vector<64x32xf32>
      %224 = arith.addf %219, %223 : vector<64x32xf32>
      %c11_161 = arith.constant 11 : index
      %c0_162 = arith.constant 0 : index
      %c0_163 = arith.constant 0 : index
      %225 = vector.load %arg18[%c11_161, %c0_162, %c0_163] : memref<12x64x32xf32, #tpu.memory_space<vmem>>, vector<1x64x32xf32>
      %226 = vector.shape_cast %225 : vector<1x64x32xf32> to vector<64x32xf32>
      %227 = vector.broadcast %171 : f32 to vector<64x32xf32>
      %228 = arith.mulf %226, %227 : vector<64x32xf32>
      %229 = arith.addf %224, %228 : vector<64x32xf32>
      %230 = arith.addf %210, %229 : vector<64x32xf32>
      %c1_i32_164 = arith.constant 1 : i32
      %231 = arith.addi %arg19, %c1_i32_164 : i32
      %232 = arith.index_cast %231 : i32 to index
      %c0_165 = arith.constant 0 : index
      %c0_166 = arith.constant 0 : index
      %233 = vector.load %arg18[%232, %c0_165, %c0_166] : memref<12x64x32xf32, #tpu.memory_space<vmem>>, vector<1x64x32xf32>
      %234 = vector.shape_cast %233 : vector<1x64x32xf32> to vector<64x32xf32>
      %235 = vector.shape_cast %230 : vector<64x32xf32> to vector<1x64x32xf32>
      tpu.vector_store %arg18[%232, %c0_165, %c0_166], %235 {strides = array<i32>} : memref<12x64x32xf32, #tpu.memory_space<vmem>>, vector<1x64x32xf32>,
    }
    %c11_i32_77 = arith.constant 11 : i32
    %c11 = arith.constant 11 : index
    %c0_78 = arith.constant 0 : index
    %c0_79 = arith.constant 0 : index
    %95 = vector.load %arg18[%c11, %c0_78, %c0_79] : memref<12x64x32xf32, #tpu.memory_space<vmem>>, vector<1x64x32xf32>
    %96 = vector.shape_cast %95 : vector<1x64x32xf32> to vector<64x32xf32>
    %c0_80 = arith.constant 0 : index
    %c0_81 = arith.constant 0 : index
    %97 = vector.load %arg9[%c0_80, %c0_81] : memref<32x128xbf16, #tpu.memory_space<vmem>>, vector<32x128xbf16>
    %c0_82 = arith.constant 0 : index
    %c0_83 = arith.constant 0 : index
    %98 = vector.load %arg10[%c0_82, %c0_83] : memref<1x128xf32, #tpu.memory_space<vmem>>, vector<1x128xf32>
    %c0_84 = arith.constant 0 : index
    %c384 = arith.constant 384 : index
    %99 = vector.load %arg16[%c0_84, %c384] : memref<128x512xf32, #tpu.memory_space<vmem>>, vector<128x128xf32>
    %100 = arith.truncf %96 : vector<64x32xf32> to vector<64x32xbf16>
    %cst_85 = arith.constant dense<0.000000e+00> : vector<64x128xf32>
    %101 = tpu.matmul %100, %97, %cst_85 {dimension_numbers = #tpu.dot_dimension_numbers<[1], [0], [0], [1], [0, 0, 1, 1], [], []>} : vector<64x32xbf16>, vector<32x128xbf16>, vector<64x128xf32> -> vector<64x128xf32>
    %102 = vector.broadcast %98 : vector<1x128xf32> to vector<64x128xf32>
    %103 = arith.addf %101, %102 : vector<64x128xf32>
    %c0_86 = arith.constant 0 : index
    %c0_87 = arith.constant 0 : index
    %104 = vector.load %arg14[%c0_86, %c0_87] : memref<128x64xbf16, #tpu.memory_space<vmem>>, vector<128x64xbf16>
    %105 = arith.truncf %103 : vector<64x128xf32> to vector<64x128xbf16>
    %cst_88 = arith.constant dense<0.000000e+00> : vector<128x128xf32>
    %106 = tpu.matmul %104, %105, %cst_88 {dimension_numbers = #tpu.dot_dimension_numbers<[1], [0], [0], [1], [0, 0, 1, 1], [], []>} : vector<128x64xbf16>, vector<64x128xbf16>, vector<128x128xf32> -> vector<128x128xf32>
    %107 = arith.addf %106, %99 : vector<128x128xf32>
    %cst_89 = arith.constant 0.000000e+00 : f32
    %108 = vector.broadcast %cst_89 : f32 to vector<128x128xf32>
    %109 = arith.maximumf %107, %108 : vector<128x128xf32>
    %c0_90 = arith.constant 0 : index
    %c0_91 = arith.constant 0 : index
    %110 = vector.load %arg15[%c0_90, %c0_91] : memref<64x128xbf16, #tpu.memory_space<vmem>>, vector<64x128xbf16>
    %111 = arith.truncf %109 : vector<128x128xf32> to vector<128x128xbf16>
    %cst_92 = arith.constant dense<0.000000e+00> : vector<64x128xf32>
    %112 = tpu.matmul %110, %111, %cst_92 {dimension_numbers = #tpu.dot_dimension_numbers<[1], [0], [0], [1], [0, 0, 1, 1], [], []>} : vector<64x128xbf16>, vector<128x128xbf16>, vector<64x128xf32> -> vector<64x128xf32>
    %cst_93 = arith.constant 0.000000e+00 : f32
    %113 = vector.broadcast %cst_93 : f32 to vector<64x128xf32>
    %114 = arith.maximumf %112, %113 : vector<64x128xf32>
    %c0_94 = arith.constant 0 : index
    %c0_95 = arith.constant 0 : index
    %115 = vector.load %arg13[%c0_94, %c0_95] : memref<64x128xf32, #tpu.memory_space<vmem>>, vector<64x128xf32>
    tpu.vector_store %arg13[%c0_94, %c0_95], %114 {strides = array<i32>} : memref<64x128xf32, #tpu.memory_space<vmem>>, vector<64x128xf32>,
    return
  }
}

</mosaic_0001>

<bundles_post_ra>
// kernel: gnn_forward.1
= control target key start
LH: loop header
LB: loop body
LE: loop exit
PB: predicated region body
PF: predicated region fallthrough
CT: control target
= control target key end

     0   :  { %18 = vsyncpa [#allocation8], 0  ;;  %s3306_s28 = smov [#allocation7]   ;;  %s3307_s29 = smov 128   ;;  %s5006_s0 = inlined_call_operand.vmem [shape: f32[11,12], index: 0, kind: input, shape index: {}]   ;;  %s5007_s1 = inlined_call_operand.vmem [shape: s32[128,1], index: 1, kind: input, shape index: {}]   ;;  %s5008_s2 = inlined_call_operand.vmem [shape: s32[1,128], index: 2, kind: input, shape index: {}]   ;;  %s5009_s3 = inlined_call_operand.vmem [shape: f32[64,4], index: 3, kind: input, shape index: {}]   ;;  %s5010_s4 = inlined_call_operand.vmem [shape: f32[128,6], index: 4, kind: input, shape index: {}]   ;;  %s5011_s5 = inlined_call_operand.vmem [shape: bf16[4,32], index: 5, kind: input, shape index: {}]   ;;  %s5012_s6 = inlined_call_operand.vmem [shape: f32[1,32], index: 6, kind: input, shape index: {}]   ;;  %s5013_s7 = inlined_call_operand.vmem [shape: bf16[11,32,32], index: 7, kind: input, shape index: {}]   ;;  %s5014_s8 = inlined_call_operand.vmem [shape: f32[11,1,32], index: 8, kind: input, shape index: {}]   ;;  %s5015_s9 = inlined_call_operand.vmem [shape: bf16[32,128], index: 9, kind: input, shape index: {}]   ;;  %s5016_s10 = inlined_call_operand.vmem [shape: f32[1,128], index: 10, kind: input, shape index: {}]   ;;  %s5017_s11 = inlined_call_operand.vmem [shape: bf16[6,512], index: 11, kind: input, shape index: {}]   ;;  %s5018_s12 = inlined_call_operand.vmem [shape: f32[1,512], index: 12, kind: input, shape index: {}]   ;;  %s5019_s13 = inlined_call_operand.vmem [shape: f32[64,128], index: 13, kind: output, shape index: {}]  }
   0x1   :  { %s23_s27 = sshll.u32 %s5006_s0, 4  ;;  %s3308_s30 = smov 8   ;;  %s24_s27 = int_to_ptr.vmem [resolvable:$true] %s23_s27 }
   0x2   :  { %29 = dma.vmem_to_smem %s24_s27, 256, %s3306_s28, [#allocation8], %s3307_s29, %s3307_s29, %s3308_s30  }
   0x3   :  { %3300 = dma.done.wait [#allocation8], 256  }
   0x4   :  { %3301 = vsyncadd [#allocation8], 4294967040 }
   0x5   :  { %58 = sfence }
   0x6   :  { %v258_v0 = vld [vmem:[%s5017_s11] sm:$0x77]  ;;  %vm305_vm0 = vcmask 1042432   ;;  %v235_v4 = vld [vmem:[%s5010_s4 + $0x8] sm:$0xff]  ;;  %vm280_vm1 = vcmask 48128   ;;  %v236_v13 = vld [vmem:[%s5010_s4 + $0x10] sm:$0xff] }
   0x7   :  { %v272_v1 = vunpack.c.l.b16 %v258_v0  ;;  %v273_v2 = vunpack.c.h.b16 %v258_v0  ;;  %v234_v3 = vld [vmem:[%s5010_s4] sm:$0xff]  ;;  %v243_v8 = vld [vmem:[%s5010_s4 + $0x48] sm:$0xff]  ;;  %v237_v14 = vld [vmem:[%s5010_s4 + $0x18] sm:$0xff]  ;;  %v3309_v25 = vmov 0   ;;  %vm1659_vm2 = vcmask 1041408   ;;  %s3311_s30 = smov 96  }
   0x8   :  { %v242_v5 = vld [vmem:[%s5010_s4 + $0x40] sm:$0xff]  ;;  %v3403_v10 = vpack.c.bf16 %v235_v4, %v234_v3  ;;  %v3420_v15 = vpack.c.bf16 %v237_v14, %v236_v13  ;;  %v244_v16 = vld [vmem:[%s5010_s4 + $0x50] sm:$0xff]  ;;  %v245_v17 = vld [vmem:[%s5010_s4 + $0x58] sm:$0xff]  ;;  %3275 = vset.pattern.permute.xlu0 %v3309_v25  ;;  %3277 = vset.pattern.permute.xlu2 %v3309_v25  ;;  %vm1646_vm3 = vcmask 31744   ;;  %vm658_vm4 = vcmask 261120   ;;  %s3312_s14 = smov 32  }
   0x9   :  { %v276_v6 = vpack.c.b16 %v272_v1, %v272_v1  ;;  %v277_v7 = vpack.c.b16 %v273_v2, %v273_v2  ;;  %v3406_v12 = vpack.c.bf16 %v243_v8, %v242_v5  ;;  %v3432_v18 = vpack.c.bf16 %v245_v17, %v244_v16  ;;  %v238_v19 = vld [vmem:[%s5010_s4 + $0x20] sm:$0xff]  ;;  %v239_v20 = vld [vmem:[%s5010_s4 + $0x28] sm:$0xff]  ;;  %v240_v22 = vld [vmem:[%s5010_s4 + $0x30] sm:$0xff]  ;;  %3276 = vset.pattern.permute.xlu1 %v3309_v25 }
   0xa   :  { %v3442_v21 = vpack.c.bf16 %v239_v20, %v238_v19  ;;  %v241_v23 = vld [vmem:[%s5010_s4 + $0x38] sm:$0xff]  ;;  %v60_v26 = vld [vmem:[%s5007_s1] sm:$0xff]  ;;  %v247_v28 = vld [vmem:[%s5010_s4 + $0x68] sm:$0xff]  ;;  %v77_v19 = vlaneseq  ;;  %vm184_vm6 = vcmask 519168  }
   0xb   :  { %v307_v9 = vsel %vm305_vm0, %v276_v6, 0  ;;  %v310_v11 = vsel %vm305_vm0, %v277_v7, 0  ;;  %v3454_v24 = vpack.c.bf16 %v241_v23, %v240_v22  ;;  %89 = vperm.xlu0 %3275, %v60_v26   ;;  %v246_v27 = vld [vmem:[%s5010_s4 + $0x60] sm:$0xff]  ;;  %v62_v31 = vld [vmem:[%s5007_s1 + $0x10] sm:$0xff]  ;;  %v61_v32 = vld [vmem:[%s5007_s1 + $0x8] sm:$0xff]  ;;  %v3313_v26 = vmov 0.0  }
   0xc   :  { %325 = vmatpush.bf16.msra.mxu0 %v307_v9  ;;  %374 = vmatpush.bf16.msra.mxu1 %v310_v11  ;;  %v3467_v29 = vpack.c.bf16 %v247_v28, %v246_v27  ;;  %v64_v30 = vld [vmem:[%s5007_s1 + $0x20] sm:$0xff]  ;;  %v65_v33 = vld [vmem:[%s5007_s1 + $0x28] sm:$0xff]  ;;  %v63_v34 = vld [vmem:[%s5007_s1 + $0x18] sm:$0xff]  ;;  %v3608_v23 = vand.u32 127, %v77_v19  ;;  %1517 = vst.msk [vmem:[#allocation6] sm:$0xff] %vm658_vm4, %v3313_v26 }
   0xd   :  { %3250 = vmatpush.bf16.msra.mxu3 %v310_v11  ;;  %101 = vperm.xlu2 %3277, %v64_v30   ;;  %v66_v35 = vld [vmem:[%s5007_s1 + $0x30] sm:$0xff]  ;;  %v1621_v36 = vld [vmem:[%s5011_s5] sm:$0x3]  ;;  %v249_v38 = vld [vmem:[%s5010_s4 + $0x78] sm:$0xff]  ;;  %1518 = vst.msk [vmem:[#allocation6 + $0x8] sm:$0xff] %vm658_vm4, %v3313_v26 }
   0xe   :  { %95 = vperm.xlu1 %3276, %v62_v31   ;;  %v248_v37 = vld [vmem:[%s5010_s4 + $0x70] sm:$0xff]  ;;  %v1661_v39 = vsel %vm1659_vm2, %v1621_v36, 0  ;;  %v68_v41 = vld [vmem:[%s5007_s1 + $0x40] sm:$0xff]  ;;  %v67_v42 = vld [vmem:[%s5007_s1 + $0x38] sm:$0xff]  ;;  %1519 = vst.msk [vmem:[#allocation6 + $0x10] sm:$0xff] %vm658_vm4, %v3313_v26 }
   0xf   :  { %2945 = vmatmul.msk.bf16.vlgmr.msra.gmra.mxu0 %vm280_vm1, %v3403_v10  ;;  %2953 = vmatmul.msk.bf16.vlgmr.msra.gmra.mxu1 %vm280_vm1, %v3403_v10  ;;  %v3502_v40 = vpack.c.bf16 %v249_v38, %v248_v37  ;;  %v69_v43 = vld [vmem:[%s5007_s1 + $0x48] sm:$0xff]  ;;  %v71_v44 = vld [vmem:[%s5007_s1 + $0x58] sm:$0xff]  ;;  %v70_v45 = vld [vmem:[%s5007_s1 + $0x50] sm:$0xff]  ;;  %1520 = vst.msk [vmem:[#allocation6 + $0x18] sm:$0xff] %vm658_vm4, %v3313_v26 }
  0x10   :  { %2957 = vmatmul.msk.bf16.vlgmr.msra.gmra.mxu3 %vm280_vm1, %v3406_v12  ;;  %1670 = vmatpush.bf16.msrb.mxu0 %v1661_v39  ;;  %v72_v46 = vld [vmem:[%s5007_s1 + $0x60] sm:$0xff]  ;;  %v74_v47 = vld [vmem:[%s5007_s1 + $0x70] sm:$0xff]  ;;  %v73_v48 = vld [vmem:[%s5007_s1 + $0x68] sm:$0xff]  ;;  %1521 = vst.msk [vmem:[#allocation6 + $0x20] sm:$0xff] %vm658_vm4, %v3313_v26 }
  0x11   :  { %v75_v49 = vld [vmem:[%s5007_s1 + $0x78] sm:$0xff]  ;;  %v260_v50 = vld [vmem:[%s5018_s12] sm:$0xf]  ;;  %v1614_v52 = vld [vmem:[%s5009_s3 + $0x8] sm:$0xff]  ;;  %s3310_s1 = smov 64   ;;  %1522 = vst.msk [vmem:[#allocation6 + $0x28] sm:$0xff] %vm658_vm4, %v3313_v26 }
  0x12   :  { %v1613_v51 = vld [vmem:[%s5009_s3] sm:$0xff]  ;;  %v3548_v53 = vperm.slane %v260_v50, 0  ;;  %v3550_v54 = vperm.slane %v260_v50, 1  ;;  %v1615_v2 = vld [vmem:[%s5009_s3 + $0x10] sm:$0xff]  ;;  %v1616_v3 = vld [vmem:[%s5009_s3 + $0x18] sm:$0xff]  ;;  %1523 = vst.msk [vmem:[#allocation6 + $0x30] sm:$0xff] %vm658_vm4, %v3313_v26 }
  0x13   :  { %92 = vperm.xlu0 %3275, %v61_v32   ;;  %v1639_v55 = vpack.c.bf16 %v1614_v52, %v1613_v51  ;;  %v1640_v4 = vpack.c.bf16 %v1616_v3, %v1615_v2  ;;  %v1617_v20 = vld [vmem:[%s5009_s3 + $0x20] sm:$0xff]  ;;  %v1618_v22 = vld [vmem:[%s5009_s3 + $0x28] sm:$0xff]  ;;  %1524 = vst.msk [vmem:[#allocation6 + $0x38] sm:$0xff] %vm658_vm4, %v3313_v26  ;;  %v1620_v36 = vld [vmem:[%s5009_s3 + $0x38] sm:$0xff] }
  0x14   :  { %v1641_v27 = vpack.c.bf16 %v1618_v22, %v1617_v20  ;;  %1525 = vst.msk [vmem:[#allocation6 + $0x40] sm:$0xff] %vm658_vm4, %v3313_v26 }
  0x15   :  { %104 = vperm.xlu2 %3277, %v65_v33   ;;  %1526 = vst.msk [vmem:[#allocation6 + $0x48] sm:$0xff] %vm658_vm4, %v3313_v26 }
  0x16   :  { %98 = vperm.xlu1 %3276, %v63_v34   ;;  %1527 = vst.msk [vmem:[#allocation6 + $0x50] sm:$0xff] %vm658_vm4, %v3313_v26 }
  0x17   :  { %1528 = vst.msk [vmem:[#allocation6 + $0x58] sm:$0xff] %vm658_vm4, %v3313_v26 }
  0x18   :  { %1529 = vst.msk [vmem:[#allocation6 + $0x60] sm:$0xff] %vm658_vm4, %v3313_v26 }
  0x19   :  { %1530 = vst.msk [vmem:[#allocation6 + $0x68] sm:$0xff] %vm658_vm4, %v3313_v26 }
  0x1a   :  { %1531 = vst.msk [vmem:[#allocation6 + $0x70] sm:$0xff] %vm658_vm4, %v3313_v26 }
  0x1b   :  { %107 = vperm.xlu0 %3275, %v66_v35   ;;  %v1619_v35 = vld [vmem:[%s5009_s3 + $0x30] sm:$0xff]  ;;  %1532 = vst.msk [vmem:[#allocation6 + $0x78] sm:$0xff] %vm658_vm4, %v3313_v26 }
  0x1c   :  { %v1642_v37 = vpack.c.bf16 %v1620_v36, %v1619_v35  ;;  %1533 = vst.msk [vmem:[#allocation6 + $0x80] sm:$0xff] %vm658_vm4, %v3313_v26 }
  0x1d   :  { %113 = vperm.xlu2 %3277, %v68_v41   ;;  %1534 = vst.msk [vmem:[#allocation6 + $0x88] sm:$0xff] %vm658_vm4, %v3313_v26 }
  0x1e   :  { %110 = vperm.xlu1 %3276, %v67_v42   ;;  %1535 = vst.msk [vmem:[#allocation6 + $0x90] sm:$0xff] %vm658_vm4, %v3313_v26 }
  0x1f   :  { %2946 = vmatmul.msk.bf16.gmra.mxu0 %vm280_vm1, %v3420_v15  ;;  %2954 = vmatmul.msk.bf16.gmra.mxu1 %vm280_vm1, %v3420_v15  ;;  %1536 = vst.msk [vmem:[#allocation6 + $0x98] sm:$0xff] %vm658_vm4, %v3313_v26 }
  0x20   :  { %2958 = vmatmul.msk.bf16.gmra.mxu3 %vm280_vm1, %v3432_v18  ;;  %1537 = vst.msk [vmem:[#allocation6 + $0xa0] sm:$0xff] %vm658_vm4, %v3313_v26 }
  0x21   :  { %1538 = vst.msk [vmem:[#allocation6 + $0xa8] sm:$0xff] %vm658_vm4, %v3313_v26 }
  0x22   :  { %1539 = vst.msk [vmem:[#allocation6 + $0xb0] sm:$0xff] %vm658_vm4, %v3313_v26 }
  0x23   :  { %116 = vperm.xlu0 %3275, %v69_v43   ;;  %1540 = vst.msk [vmem:[#allocation6 + $0xb8] sm:$0xff] %vm658_vm4, %v3313_v26  ;;  %v259_v43 = vld [vmem:[%s5017_s11 + $0x8] sm:$0x77] }
  0x24   :  { %1541 = vst.msk [vmem:[#allocation6 + $0xc0] sm:$0xff] %vm658_vm4, %v3313_v26 }
  0x25   :  { %122 = vperm.xlu2 %3277, %v71_v44   ;;  %1542 = vst.msk [vmem:[#allocation6 + $0xc8] sm:$0xff] %vm658_vm4, %v3313_v26  ;;  %v274_v44 = vunpack.c.l.b16 %v259_v43 }
  0x26   :  { %119 = vperm.xlu1 %3276, %v70_v45   ;;  %1543 = vst.msk [vmem:[#allocation6 + $0xd0] sm:$0xff] %vm658_vm4, %v3313_v26 }
  0x27   :  { %1544 = vst.msk [vmem:[#allocation6 + $0xd8] sm:$0xff] %vm658_vm4, %v3313_v26  ;;  %v278_v45 = vpack.c.b16 %v274_v44, %v274_v44 }
  0x28   :  { %1545 = vst.msk [vmem:[#allocation6 + $0xe0] sm:$0xff] %vm658_vm4, %v3313_v26 }
  0x29   :  { %1546 = vst.msk [vmem:[#allocation6 + $0xe8] sm:$0xff] %vm658_vm4, %v3313_v26 }
  0x2a   :  { %1547 = vst.msk [vmem:[#allocation6 + $0xf0] sm:$0xff] %vm658_vm4, %v3313_v26 }
  0x2b   :  { %125 = vperm.xlu0 %3275, %v72_v46   ;;  %1548 = vst.msk [vmem:[#allocation6 + $0xf8] sm:$0xff] %vm658_vm4, %v3313_v26  ;;  %v313_v46 = vsel %vm305_vm0, %v278_v45, 0 }
  0x2c   :  { %1549 = vst.msk [vmem:[#allocation6 + $0x100] sm:$0xff] %vm658_vm4, %v3313_v26  ;;  %423 = vmatpush.bf16.msra.mxu2 %v313_v46 }
  0x2d   :  { %131 = vperm.xlu2 %3277, %v74_v47   ;;  %1550 = vst.msk [vmem:[#allocation6 + $0x108] sm:$0xff] %vm658_vm4, %v3313_v26 }
  0x2e   :  { %128 = vperm.xlu1 %3276, %v73_v48   ;;  %1551 = vst.msk [vmem:[#allocation6 + $0x110] sm:$0xff] %vm658_vm4, %v3313_v26 }
  0x2f   :  { %2947 = vmatmul.msk.bf16.gmra.mxu0 %vm280_vm1, %v3442_v21  ;;  %2955 = vmatmul.msk.bf16.gmra.mxu1 %vm280_vm1, %v3442_v21  ;;  %1552 = vst.msk [vmem:[#allocation6 + $0x118] sm:$0xff] %vm658_vm4, %v3313_v26 }
  0x30   :  { %2959 = vmatmul.msk.bf16.gmra.mxu3 %vm280_vm1, %v3467_v29  ;;  %1553 = vst.msk [vmem:[#allocation6 + $0x120] sm:$0xff] %vm658_vm4, %v3313_v26  ;;  %2961 = vmatmul.msk.bf16.vlgmr.msra.gmra.mxu2 %vm280_vm1, %v3403_v10 }
  0x31   :  { %1554 = vst.msk [vmem:[#allocation6 + $0x128] sm:$0xff] %vm658_vm4, %v3313_v26 }
  0x32   :  { %1555 = vst.msk [vmem:[#allocation6 + $0x130] sm:$0xff] %vm658_vm4, %v3313_v26 }
  0x33   :  { %134 = vperm.xlu0 %3275, %v75_v49   ;;  %1556 = vst.msk [vmem:[#allocation6 + $0x138] sm:$0xff] %vm658_vm4, %v3313_v26 }
  0x34   :  { %1557 = vst.msk [vmem:[#allocation6 + $0x140] sm:$0xff] %vm658_vm4, %v3313_v26 }
  0x35   :  { %1558 = vst.msk [vmem:[#allocation6 + $0x148] sm:$0xff] %vm658_vm4, %v3313_v26 }
  0x36   :  { %1559 = vst.msk [vmem:[#allocation6 + $0x150] sm:$0xff] %vm658_vm4, %v3313_v26 }
  0x37   :  { %1560 = vst.msk [vmem:[#allocation6 + $0x158] sm:$0xff] %vm658_vm4, %v3313_v26 }
  0x38   :  { %1561 = vst.msk [vmem:[#allocation6 + $0x160] sm:$0xff] %vm658_vm4, %v3313_v26 }
  0x39   :  { %1562 = vst.msk [vmem:[#allocation6 + $0x168] sm:$0xff] %vm658_vm4, %v3313_v26 }
  0x3a   :  { %1563 = vst.msk [vmem:[#allocation6 + $0x170] sm:$0xff] %vm658_vm4, %v3313_v26 }
  0x3b   :  { %1564 = vst.msk [vmem:[#allocation6 + $0x178] sm:$0xff] %vm658_vm4, %v3313_v26 }
  0x3c   :  { %1565 = vst.msk [vmem:[#allocation6 + $0x180] sm:$0xff] %vm658_vm4, %v3313_v26 }
  0x3d   :  { %1566 = vst.msk [vmem:[#allocation6 + $0x188] sm:$0xff] %vm658_vm4, %v3313_v26 }
  0x3e   :  { %1567 = vst.msk [vmem:[#allocation6 + $0x190] sm:$0xff] %vm658_vm4, %v3313_v26 }
  0x3f   :  { %2948 = vmatmul.msk.bf16.gmra.mxu0 %vm280_vm1, %v3454_v24  ;;  %2956 = vmatmul.msk.bf16.gmra.mxu1 %vm280_vm1, %v3454_v24  ;;  %1568 = vst.msk [vmem:[#allocation6 + $0x198] sm:$0xff] %vm658_vm4, %v3313_v26 }
  0x40   :  { %2960 = vmatmul.msk.bf16.gmra.mxu3 %vm280_vm1, %v3502_v40  ;;  %1569 = vst.msk [vmem:[#allocation6 + $0x1a0] sm:$0xff] %vm658_vm4, %v3313_v26  ;;  %2962 = vmatmul.msk.bf16.gmra.mxu2 %vm280_vm1, %v3420_v15 }
  0x41   :  { %1570 = vst.msk [vmem:[#allocation6 + $0x1a8] sm:$0xff] %vm658_vm4, %v3313_v26 }
  0x42   :  { %1571 = vst.msk [vmem:[#allocation6 + $0x1b0] sm:$0xff] %vm658_vm4, %v3313_v26 }
  0x43   :  { %1572 = vst.msk [vmem:[#allocation6 + $0x1b8] sm:$0xff] %vm658_vm4, %v3313_v26 }
  0x44   :  { %1573 = vst.msk [vmem:[#allocation6 + $0x1c0] sm:$0xff] %vm658_vm4, %v3313_v26 }
  0x45   :  { %1574 = vst.msk [vmem:[#allocation6 + $0x1c8] sm:$0xff] %vm658_vm4, %v3313_v26 }
  0x46   :  { %1575 = vst.msk [vmem:[#allocation6 + $0x1d0] sm:$0xff] %vm658_vm4, %v3313_v26 }
  0x47   :  { %1576 = vst.msk [vmem:[#allocation6 + $0x1d8] sm:$0xff] %vm658_vm4, %v3313_v26 }
  0x48   :  { %1577 = vst.msk [vmem:[#allocation6 + $0x1e0] sm:$0xff] %vm658_vm4, %v3313_v26 }
  0x49   :  { %1578 = vst.msk [vmem:[#allocation6 + $0x1e8] sm:$0xff] %vm658_vm4, %v3313_v26 }
  0x4a   :  { %1579 = vst.msk [vmem:[#allocation6 + $0x1f0] sm:$0xff] %vm658_vm4, %v3313_v26 }
  0x4b   :  { %1580 = vst.msk [vmem:[#allocation6 + $0x1f8] sm:$0xff] %vm658_vm4, %v3313_v26 }
  0x4c   :  { %1581 = vst.msk [vmem:[#allocation6 + $0x200] sm:$0xff] %vm658_vm4, %v3313_v26 }
  0x4d   :  { %1582 = vst.msk [vmem:[#allocation6 + $0x208] sm:$0xff] %vm658_vm4, %v3313_v26 }
  0x4e   :  { %1583 = vst.msk [vmem:[#allocation6 + $0x210] sm:$0xff] %vm658_vm4, %v3313_v26 }
  0x4f   :  { %2949 = vmatmul.msk.bf16.gmra.mxu0 %vm280_vm1, %v3406_v12  ;;  %1584 = vst.msk [vmem:[#allocation6 + $0x218] sm:$0xff] %vm658_vm4, %v3313_v26 }
  0x50   :  { %1585 = vst.msk [vmem:[#allocation6 + $0x220] sm:$0xff] %vm658_vm4, %v3313_v26  ;;  %2963 = vmatmul.msk.bf16.gmra.mxu2 %vm280_vm1, %v3442_v21 }
  0x51   :  { %1586 = vst.msk [vmem:[#allocation6 + $0x228] sm:$0xff] %vm658_vm4, %v3313_v26 }
  0x52   :  { %1587 = vst.msk [vmem:[#allocation6 + $0x230] sm:$0xff] %vm658_vm4, %v3313_v26 }
  0x53   :  { %1588 = vst.msk [vmem:[#allocation6 + $0x238] sm:$0xff] %vm658_vm4, %v3313_v26 }
  0x54   :  { %1589 = vst.msk [vmem:[#allocation6 + $0x240] sm:$0xff] %vm658_vm4, %v3313_v26 }
  0x55   :  { %1590 = vst.msk [vmem:[#allocation6 + $0x248] sm:$0xff] %vm658_vm4, %v3313_v26 }
  0x56   :  { %1591 = vst.msk [vmem:[#allocation6 + $0x250] sm:$0xff] %vm658_vm4, %v3313_v26 }
  0x57   :  { %1592 = vst.msk [vmem:[#allocation6 + $0x258] sm:$0xff] %vm658_vm4, %v3313_v26 }
  0x58   :  { %1593 = vst.msk [vmem:[#allocation6 + $0x260] sm:$0xff] %vm658_vm4, %v3313_v26 }
  0x59   :  { %1594 = vst.msk [vmem:[#allocation6 + $0x268] sm:$0xff] %vm658_vm4, %v3313_v26 }
  0x5a   :  { %1595 = vst.msk [vmem:[#allocation6 + $0x270] sm:$0xff] %vm658_vm4, %v3313_v26 }
  0x5b   :  { %1596 = vst.msk [vmem:[#allocation6 + $0x278] sm:$0xff] %vm658_vm4, %v3313_v26 }
  0x5c   :  { %1597 = vst.msk [vmem:[#allocation6 + $0x280] sm:$0xff] %vm658_vm4, %v3313_v26 }
  0x5d   :  { %1598 = vst.msk [vmem:[#allocation6 + $0x288] sm:$0xff] %vm658_vm4, %v3313_v26 }
  0x5e   :  { %1599 = vst.msk [vmem:[#allocation6 + $0x290] sm:$0xff] %vm658_vm4, %v3313_v26 }
  0x5f   :  { %2950 = vmatmul.msk.bf16.gmra.mxu0 %vm280_vm1, %v3432_v18  ;;  %1600 = vst.msk [vmem:[#allocation6 + $0x298] sm:$0xff] %vm658_vm4, %v3313_v26 }
  0x60   :  { %1601 = vst.msk [vmem:[#allocation6 + $0x2a0] sm:$0xff] %vm658_vm4, %v3313_v26  ;;  %2964 = vmatmul.msk.bf16.gmra.mxu2 %vm280_vm1, %v3454_v24 }
  0x61   :  { %1602 = vst.msk [vmem:[#allocation6 + $0x2a8] sm:$0xff] %vm658_vm4, %v3313_v26 }
  0x62   :  { %1603 = vst.msk [vmem:[#allocation6 + $0x2b0] sm:$0xff] %vm658_vm4, %v3313_v26 }
  0x63   :  { %1604 = vst.msk [vmem:[#allocation6 + $0x2b8] sm:$0xff] %vm658_vm4, %v3313_v26 }
  0x64   :  { %1605 = vst.msk [vmem:[#allocation6 + $0x2c0] sm:$0xff] %vm658_vm4, %v3313_v26 }
  0x65   :  { %1606 = vst.msk [vmem:[#allocation6 + $0x2c8] sm:$0xff] %vm658_vm4, %v3313_v26 }
  0x66   :  { %1607 = vst.msk [vmem:[#allocation6 + $0x2d0] sm:$0xff] %vm658_vm4, %v3313_v26 }
  0x67   :  { %v102_v25 = vpop.permute.xlu2 %101  ;;  %1608 = vst.msk [vmem:[#allocation6 + $0x2d8] sm:$0xff] %vm658_vm4, %v3313_v26 }
  0x68   :  { %vm140_vm5 = vcmp.eq.s32.totalorder %v3608_v23, %v102_v25  ;;  %1609 = vst.msk [vmem:[#allocation6 + $0x2e0] sm:$0xff] %vm658_vm4, %v3313_v26 }
  0x69   :  { %v156_v30 = vsel %vm140_vm5, 1.0, %v3313_v26  ;;  %1610 = vst.msk [vmem:[#allocation6 + $0x2e8] sm:$0xff] %vm658_vm4, %v3313_v26 }
  0x6a   :  { %v172_v32 = vpack.c.bf16 %v156_v30, %v156_v30  ;;  %1611 = vst.msk [vmem:[#allocation6 + $0x2f0] sm:$0xff] %vm658_vm4, %v3313_v26 }
  0x6b   :  { %1612 = vst.msk [vmem:[#allocation6 + $0x2f8] sm:$0xff] %vm658_vm4, %v3313_v26 }
  0x6c   :  { %189 = vst.msk [vmem:[#allocation2 + $0x10] sm:$0xf] %vm184_vm6, %v172_v32 }
  0x6f   :  { %2951 = vmatmul.msk.bf16.gmra.mxu0 %vm280_vm1, %v3467_v29  ;;  %v3789_v48 = vpop.permute.xlu2 %104 }
  0x70   :  { %vm141_vm7 = vcmp.eq.s32.totalorder %v3608_v23, %v3789_v48  ;;  %2965 = vmatmul.msk.bf16.gmra.mxu2 %vm280_vm1, %v3406_v12 }
  0x77   :  { %v3809_v51 = vpop.permute.xlu2 %113 }
  0x78   :  { %vm144_vm8 = vcmp.eq.s32.totalorder %v3608_v23, %v3809_v51 }
  0x7f   :  { %2952 = vmatmul.msk.bf16.gmra.mxu0 %vm280_vm1, %v3502_v40 }
  0x80   :  { %2966 = vmatmul.msk.bf16.gmra.mxu2 %vm280_vm1, %v3432_v18 }
  0x8c   :  { %v327_v56 = vpop.f32.mrf.mxu0  ;;  %v376_v57 = vpop.f32.mrf.mxu1 }
  0x8d   :  { %v328_v58 = vadd.f32 %v327_v56, %v3548_v53  ;;  %v377_v59 = vadd.f32 %v376_v57, %v3550_v54 }
  0x8f   :  { %514 = vst [vmem:[#allocation4] sm:$0xff] %v328_v58  ;;  %2977 = vmatmul.msk.bf16.vlgmr.msrb.gmra.mxu0 %vm1646_vm3, %v1639_v55  ;;  %707 = vrot.lane.b32.xlu2 %v328_v58, %s3310_s1  ;;  %v3816_v55 = vpop.permute.xlu0 %89 }
  0x90   :  { %610 = vrot.lane.b32.xlu1 %v328_v58, %s3311_s30  ;;  %804 = vrot.lane.b32.xlu0 %v328_v58, %s3312_s14  ;;  %886 = vst.msk [vmem:[#allocation5 + $0x180] sm:$0xff] %vm658_vm4, %v377_v59  ;;  %vm136_vm9 = vcmp.eq.s32.totalorder %v3608_v23, %v3816_v55 }
  0x91   :  { %v152_v20 = vsel %vm136_vm9, 1.0, %v3313_v26  ;;  %2967 = vmatmul.msk.bf16.gmra.mxu2 %vm280_vm1, %v3467_v29 }
  0x93   :  { %v396_v60 = vpop.f32.mrf.mxu3 }
  0x94   :  { %v329_v61 = vpop.f32.mrf.mxu0  ;;  %v397_v62 = vadd.f32 %v396_v60, %v3550_v54  ;;  %v378_v63 = vpop.f32.mrf.mxu1 }
  0x95   :  { %v330_v0 = vadd.f32 %v329_v61, %v3548_v53  ;;  %v379_v1 = vadd.f32 %v378_v63, %v3550_v54  ;;  %v3847_v60 = vpop.permute.xlu1 %95 }
  0x96   :  { %547 = vst [vmem:[#allocation4 + $0xb8] sm:$0xff] %v397_v62  ;;  %vm138_vm11 = vcmp.eq.s32.totalorder %v3608_v23, %v3847_v60 }
  0x97   :  { %518 = vst [vmem:[#allocation4 + $0x120] sm:$0xff] %v330_v0  ;;  %1031 = vrot.lane.b32.xlu2 %v377_v59, %s3310_s1  ;;  %v3851_v61 = vpop.permute.xlu0 %92  ;;  %v154_v35 = vsel %vm138_vm11, 1.0, %v3313_v26 }
  0x98   :  { %894 = vst.msk [vmem:[#allocation5 + $0x1c0] sm:$0xff] %vm658_vm4, %v397_v62  ;;  %934 = vrot.lane.b32.xlu1 %v377_v59, %s3311_s30  ;;  %1128 = vrot.lane.b32.xlu0 %v377_v59, %s3312_s14  ;;  %v3845_v59 = vpop.permute.xlu2 %122  ;;  %vm137_vm12 = vcmp.eq.s32.totalorder %v3608_v23, %v3851_v61 }
  0x99   :  { %887 = vst.msk [vmem:[#allocation5 + $0x188] sm:$0xff] %vm658_vm4, %v379_v1  ;;  %vm147_vm10 = vcmp.eq.s32.totalorder %v3608_v23, %v3845_v59  ;;  %v153_v36 = vsel %vm137_vm12, 1.0, %v3313_v26 }
  0x9a   :  { %v163_v32 = vsel %vm147_vm10, 1.0, %v3313_v26  ;;  %v169_v43 = vpack.c.bf16 %v153_v36, %v153_v36 }
  0x9b   :  { %v398_v5 = vpop.f32.mrf.mxu3 }
  0x9c   :  { %v332_v6 = vpop.f32.mrf.mxu0  ;;  %v399_v7 = vadd.f32 %v398_v5, %v3550_v54  ;;  %v381_v9 = vpop.f32.mrf.mxu1  ;;  %186 = vst.msk [vmem:[#allocation2 + $0x4] sm:$0xf] %vm184_vm6, %v169_v43 }
  0x9d   :  { %v3575_v8 = vadd.f32 %v332_v6, %v3548_v53  ;;  %v3581_v11 = vadd.f32 %v381_v9, %v3550_v54  ;;  %v3880_v2 = vpop.permute.xlu1 %98 }
  0x9e   :  { %551 = vst [vmem:[#allocation4 + $0xd8] sm:$0xff] %v399_v7  ;;  %vm139_vm14 = vcmp.eq.s32.totalorder %v3608_v23, %v3880_v2 }
  0x9f   :  { %522 = vst [vmem:[#allocation4 + $0x108] sm:$0xff] %v3575_v8  ;;  %2978 = vmatmul.msk.bf16.gmra.mxu0 %vm1646_vm3, %v1640_v4  ;;  %612 = vrot.lane.b32.xlu2 %v330_v0, %s3311_s30  ;;  %v3884_v3 = vpop.permute.xlu0 %107  ;;  %v155_v48 = vsel %vm139_vm14, 1.0, %v3313_v26 }
  0xa0   :  { %1047 = vrot.lane.b32.xlu1 %v397_v62, %s3310_s1  ;;  %950 = vrot.lane.b32.xlu0 %v397_v62, %s3311_s30  ;;  %895 = vst.msk [vmem:[#allocation5 + $0x1c8] sm:$0xff] %vm658_vm4, %v399_v7  ;;  %vm142_vm15 = vcmp.eq.s32.totalorder %v3608_v23, %v3884_v3 }
  0xa1   :  { %888 = vst.msk [vmem:[#allocation5 + $0x190] sm:$0xff] %vm658_vm4, %v3581_v11  ;;  %v158_v51 = vsel %vm142_vm15, 1.0, %v3313_v26  ;;  %2968 = vmatmul.msk.bf16.gmra.mxu2 %vm280_vm1, %v3502_v40 }
  0xa3   :  { %v401_v16 = vpop.f32.mrf.mxu3 }
  0xa4   :  { %v334_v13 = vpop.f32.mrf.mxu0  ;;  %v3592_v17 = vadd.f32 %v401_v16, %v3550_v54  ;;  %v383_v50 = vpop.f32.mrf.mxu1 }
  0xa5   :  { %v3589_v14 = vadd.f32 %v334_v13, %v3548_v53  ;;  %v3814_v52 = vadd.f32 %v383_v50, %v3550_v54  ;;  %v3918_v9 = vpop.permute.xlu1 %110 }
  0xa6   :  { %555 = vst [vmem:[#allocation4 + $0x1b0] sm:$0xff] %v3592_v17  ;;  %vm143_vm2 = vcmp.eq.s32.totalorder %v3608_v23, %v3918_v9 }
  0xa7   :  { %526 = vst [vmem:[#allocation4 + $0xf8] sm:$0xff] %v3589_v14  ;;  %936 = vrot.lane.b32.xlu2 %v379_v1, %s3311_s30  ;;  %v159_v60 = vsel %vm143_vm2, 1.0, %v3313_v26 }
  0xa8   :  { %806 = vrot.lane.b32.xlu1 %v330_v0, %s3312_s14  ;;  %709 = vrot.lane.b32.xlu0 %v330_v0, %s3310_s1  ;;  %896 = vst.msk [vmem:[#allocation5 + $0x1d0] sm:$0xff] %vm658_vm4, %v3592_v17 }
  0xa9   :  { %889 = vst.msk [vmem:[#allocation5 + $0x198] sm:$0xff] %vm658_vm4, %v3814_v52 }
  0xab   :  { %v403_v56 = vpop.f32.mrf.mxu3 }
  0xac   :  { %v337_v28 = vpop.f32.mrf.mxu0  ;;  %v3839_v58 = vadd.f32 %v403_v56, %v3550_v54  ;;  %v386_v62 = vpop.f32.mrf.mxu1  ;;  %v171_v56 = vpack.c.bf16 %v155_v48, %v155_v48 }
  0xad   :  { %v3619_v31 = vadd.f32 %v337_v28, %v3548_v53  ;;  %v3874_v0 = vadd.f32 %v386_v62, %v3550_v54  ;;  %v3965_v30 = vpop.permute.xlu1 %119 }
  0xae   :  { %559 = vst [vmem:[#allocation4 + $0x90] sm:$0xff] %v3839_v58  ;;  %vm146_vm5 = vcmp.eq.s32.totalorder %v3608_v23, %v3965_v30 }
  0xaf   :  { %530 = vst [vmem:[#allocation4 + $0x128] sm:$0xff] %v3619_v31  ;;  %2979 = vmatmul.msk.bf16.gmra.mxu0 %vm1646_vm3, %v1641_v27  ;;  %1049 = vrot.lane.b32.xlu2 %v399_v7, %s3310_s1  ;;  %v168_v27 = vpack.c.bf16 %v152_v20, %v152_v20 }
  0xb0   :  { %1130 = vrot.lane.b32.xlu1 %v379_v1, %s3312_s14  ;;  %1033 = vrot.lane.b32.xlu0 %v379_v1, %s3310_s1  ;;  %v3878_v1 = vpop.permute.xlu2 %131  ;;  %897 = vst.msk [vmem:[#allocation5 + $0x1d8] sm:$0xff] %vm658_vm4, %v3839_v58 }
  0xb1   :  { %185 = vst.msk [vmem:[#allocation2] sm:$0xf] %vm184_vm6, %v168_v27  ;;  %vm150_vm13 = vcmp.eq.s32.totalorder %v3608_v23, %v3878_v1  ;;  %v175_v1 = vpack.c.bf16 %v159_v60, %v159_v60 }
  0xb2   :  { %v166_v45 = vsel %vm150_vm13, 1.0, %v3313_v26  ;;  %890 = vst.msk [vmem:[#allocation5 + $0x1a0] sm:$0xff] %vm658_vm4, %v3874_v0 }
  0xb3   :  { %v406_v4 = vpop.f32.mrf.mxu3  ;;  %v182_v55 = vpack.c.bf16 %v166_v45, %v166_v45  ;;  %188 = vst.msk [vmem:[#allocation2 + $0xc] sm:$0xf] %vm184_vm6, %v171_v56 }
  0xb4   :  { %v339_v33 = vpop.f32.mrf.mxu0  ;;  %v3909_v6 = vadd.f32 %v406_v4, %v3550_v54  ;;  %v162_v4 = vsel %vm146_vm5, 1.0, %v3313_v26  ;;  %192 = vst.msk [vmem:[#allocation2 + $0x1c] sm:$0xf] %vm184_vm6, %v175_v1 }
  0xb5   :  { %v3640_v34 = vadd.f32 %v339_v33, %v3548_v53  ;;  %v129_v50 = vpop.permute.xlu1 %128  ;;  %199 = vst.msk [vmem:[#allocation2 + $0x38] sm:$0xf] %vm184_vm6, %v182_v55  ;;  %v178_v9 = vpack.c.bf16 %v162_v4, %v162_v4 }
  0xb6   :  { %898 = vst.msk [vmem:[#allocation5 + $0x1e0] sm:$0xff] %vm658_vm4, %v3909_v6 }
  0xb7   :  { %534 = vst [vmem:[#allocation4 + $0x1a8] sm:$0xff] %v3640_v34  ;;  %808 = vrot.lane.b32.xlu2 %v3575_v8, %s3312_s14 }
  0xb8   :  { %952 = vrot.lane.b32.xlu1 %v399_v7, %s3311_s30  ;;  %614 = vrot.lane.b32.xlu0 %v3575_v8, %s3311_s30  ;;  %v157_v7 = vsel %vm141_vm7, 1.0, %v3313_v26  ;;  %195 = vst.msk [vmem:[#allocation2 + $0x28] sm:$0xf] %vm184_vm6, %v178_v9 }
  0xbc   :  { %v342_v38 = vpop.f32.mrf.mxu0 }
  0xbd   :  { %v3669_v39 = vadd.f32 %v342_v38, %v3548_v53  ;;  %v388_v38 = vpop.f32.mrf.mxu1 }
  0xbf   :  { %538 = vst [vmem:[#allocation4 + $0x150] sm:$0xff] %v3669_v39  ;;  %2980 = vmatmul.msk.bf16.gmra.mxu0 %vm1646_vm3, %v1642_v37  ;;  %1132 = vrot.lane.b32.xlu2 %v3581_v11, %s3312_s14  ;;  %v179_v37 = vpack.c.bf16 %v163_v32, %v163_v32 }
  0xc0   :  { %711 = vrot.lane.b32.xlu1 %v3575_v8, %s3310_s1  ;;  %938 = vrot.lane.b32.xlu0 %v3581_v11, %s3311_s30 }
  0xc1   :  { %196 = vst.msk [vmem:[#allocation2 + $0x2c] sm:$0xf] %vm184_vm6, %v179_v37 }
  0xc4   :  { %v344_v41 = vpop.f32.mrf.mxu0 }
  0xc5   :  { %v3694_v42 = vadd.f32 %v344_v41, %v3548_v53  ;;  %v170_v41 = vpack.c.bf16 %v154_v35, %v154_v35  ;;  %v391_v30 = vpop.f32.mrf.mxu1 }
  0xc6   :  { %v4093_v35 = vadd.f32 %v391_v30, %v3550_v54 }
  0xc7   :  { %542 = vst [vmem:[#allocation4 + $0xe0] sm:$0xff] %v3694_v42  ;;  %954 = vrot.lane.b32.xlu2 %v3592_v17, %s3311_s30 }
  0xc8   :  { %1035 = vrot.lane.b32.xlu1 %v3581_v11, %s3310_s1  ;;  %1051 = vrot.lane.b32.xlu0 %v3592_v17, %s3310_s1  ;;  %v3924_v11 = vpop.permute.xlu0 %116  ;;  %v160_v17 = vsel %vm144_vm8, 1.0, %v3313_v26  ;;  %187 = vst.msk [vmem:[#allocation2 + $0x8] sm:$0xf] %vm184_vm6, %v170_v41  ;;  %vm149_vm8 = vcmp.eq.s32.totalorder %v3608_v23, %v129_v50 }
  0xc9   :  { %v176_v22 = vpack.c.bf16 %v160_v17, %v160_v17  ;;  %vm145_vm3 = vcmp.eq.s32.totalorder %v3608_v23, %v3924_v11  ;;  %892 = vst.msk [vmem:[#allocation5 + $0x1b0] sm:$0xff] %vm658_vm4, %v4093_v35 }
  0xcb   :  { %193 = vst.msk [vmem:[#allocation2 + $0x20] sm:$0xf] %vm184_vm6, %v176_v22 }
  0xcc   :  { %v3779_v47 = vpop.f32.mrf.mxu0 }
  0xcd   :  { %v3930_v13 = vadd.f32 %v3779_v47, %v3548_v53  ;;  %v4002_v47 = vadd.f32 %v388_v38, %v3550_v54 }
  0xcf   :  { %713 = vrot.lane.b32.xlu2 %v3589_v14, %s3310_s1  ;;  %546 = vst [vmem:[#allocation4 + $0xf0] sm:$0xff] %v3930_v13 }
  0xd0   :  { %616 = vrot.lane.b32.xlu1 %v3589_v14, %s3311_s30  ;;  %810 = vrot.lane.b32.xlu0 %v3589_v14, %s3312_s14  ;;  %v173_v14 = vpack.c.bf16 %v157_v7, %v157_v7  ;;  %v3972_v33 = vpop.permute.xlu0 %125  ;;  %891 = vst.msk [vmem:[#allocation5 + $0x1a8] sm:$0xff] %vm658_vm4, %v4002_v47 }
  0xd1   :  { %vm148_vm7 = vcmp.eq.s32.totalorder %v3608_v23, %v3972_v33 }
  0xd2   :  { %190 = vst.msk [vmem:[#allocation2 + $0x14] sm:$0xf] %vm184_vm6, %v173_v14  ;;  %v164_v7 = vsel %vm148_vm7, 1.0, %v3313_v26 }
  0xd3   :  { %v180_v11 = vpack.c.bf16 %v164_v7, %v164_v7 }
  0xd4   :  { %v3805_v49 = vpop.f32.mrf.mxu0 }
  0xd5   :  { %v3944_v16 = vadd.f32 %v3805_v49, %v3548_v53  ;;  %197 = vst.msk [vmem:[#allocation2 + $0x30] sm:$0xf] %vm184_vm6, %v180_v11 }
  0xd7   :  { %1037 = vrot.lane.b32.xlu2 %v3814_v52, %s3310_s1  ;;  %550 = vst [vmem:[#allocation4 + $0x10] sm:$0xff] %v3944_v16 }
  0xd8   :  { %940 = vrot.lane.b32.xlu1 %v3814_v52, %s3311_s30  ;;  %1134 = vrot.lane.b32.xlu0 %v3814_v52, %s3312_s14  ;;  %v135_v52 = vpop.permute.xlu0 %134 }
  0xd9   :  { %vm151_vm9 = vcmp.eq.s32.totalorder %v3608_v23, %v135_v52 }
  0xda   :  { %v167_v23 = vsel %vm151_vm9, 1.0, %v3313_v26 }
  0xdc   :  { %v3836_v57 = vpop.f32.mrf.mxu0 }
  0xdf   :  { %618 = vrot.lane.b32.xlu2 %v3619_v31, %s3311_s30 }
  0xe0   :  { %1053 = vrot.lane.b32.xlu1 %v3839_v58, %s3310_s1  ;;  %956 = vrot.lane.b32.xlu0 %v3839_v58, %s3311_s30  ;;  %v408_v58 = vpop.f32.mrf.mxu3 }
  0xe1   :  { %v4037_v62 = vadd.f32 %v408_v58, %v3550_v54 }
  0xe3   :  { %899 = vst.msk [vmem:[#allocation5 + $0x1e8] sm:$0xff] %vm658_vm4, %v4037_v62 }
  0xe4   :  { %v3871_v63 = vpop.f32.mrf.mxu0 }
  0xe5   :  { %v3998_v44 = vadd.f32 %v3871_v63, %v3548_v53 }
  0xe7   :  { %942 = vrot.lane.b32.xlu2 %v3874_v0, %s3311_s30  ;;  %558 = vst [vmem:[#allocation4 + $0x48] sm:$0xff] %v3998_v44 }
  0xe8   :  { %812 = vrot.lane.b32.xlu1 %v3619_v31, %s3312_s14  ;;  %715 = vrot.lane.b32.xlu0 %v3619_v31, %s3310_s1  ;;  %v3969_v31 = vadd.f32 %v3836_v57, %v3548_v53  ;;  %v174_v57 = vpack.c.bf16 %v158_v51, %v158_v51  ;;  %v411_v33 = vpop.f32.mrf.mxu3 }
  0xe9   :  { %v3916_v8 = vpop.permute.xlu2 %707 }
  0xea   :  { %554 = vst [vmem:[#allocation4 + $0x118] sm:$0xff] %v3969_v31 }
  0xeb   :  { %191 = vst.msk [vmem:[#allocation2 + $0x18] sm:$0xf] %vm184_vm6, %v174_v57 }
  0xec   :  { %v3906_v5 = vpop.f32.mrf.mxu0  ;;  %756 = vst.msk [vmem:[#allocation5 + $0x80] sm:$0xff] %vm658_vm4, %v3916_v8  ;;  %v165_v8 = vsel %vm149_vm8, 1.0, %v3313_v26 }
  0xed   :  { %v4028_v59 = vadd.f32 %v3906_v5, %v3548_v53  ;;  %v181_v27 = vpack.c.bf16 %v165_v8, %v165_v8 }
  0xef   :  { %1055 = vrot.lane.b32.xlu2 %v3909_v6, %s3310_s1  ;;  %562 = vst [vmem:[#allocation4 + $0x180] sm:$0xff] %v4028_v59 }
  0xf0   :  { %1136 = vrot.lane.b32.xlu1 %v3874_v0, %s3312_s14  ;;  %1039 = vrot.lane.b32.xlu0 %v3874_v0, %s3310_s1  ;;  %198 = vst.msk [vmem:[#allocation2 + $0x34] sm:$0xf] %vm184_vm6, %v181_v27  ;;  %v413_v55 = vpop.f32.mrf.mxu3 }
  0xf1   :  { %v3963_v28 = vpop.permute.xlu2 %1031  ;;  %v4152_v56 = vadd.f32 %v413_v55, %v3550_v54  ;;  %v3195_v55 = vld [vmem:[#allocation2 + $0x8] sm:$0xff] }
  0xf2   :  { %1080 = vst.msk [vmem:[#allocation5 + $0x280] sm:$0xff] %vm658_vm4, %v3963_v28  ;;  %v183_v28 = vpack.c.bf16 %v167_v23, %v167_v23 }
  0xf3   :  { %901 = vst.msk [vmem:[#allocation5 + $0x1f8] sm:$0xff] %vm658_vm4, %v4152_v56 }
  0xf4   :  { %v3958_v25 = vpop.f32.mrf.mxu0  ;;  %200 = vst.msk [vmem:[#allocation2 + $0x3c] sm:$0xf] %vm184_vm6, %v183_v28 }
  0xf5   :  { %v4048_v5 = vadd.f32 %v3958_v25, %v3548_v53 }
  0xf7   :  { %814 = vrot.lane.b32.xlu2 %v3640_v34, %s3312_s14  ;;  %566 = vst [vmem:[#allocation4 + $0xb0] sm:$0xff] %v4048_v5 }
  0xf8   :  { %958 = vrot.lane.b32.xlu1 %v3909_v6, %s3311_s30  ;;  %620 = vrot.lane.b32.xlu0 %v3640_v34, %s3311_s30 }
  0xf9   :  { %v4008_v49 = vpop.permute.xlu2 %612 }
  0xfa   :  { %660 = vst.msk [vmem:[#allocation5 + $0x8] sm:$0xff] %vm658_vm4, %v4008_v49 }
  0xfc   :  { %v362_v46 = vpop.f32.mrf.mxu0 }
  0xfd   :  { %v4065_v14 = vadd.f32 %v362_v46, %v3548_v53 }
  0xff   :  { %1138 = vrot.lane.b32.xlu2 %v4002_v47, %s3312_s14  ;;  %570 = vst [vmem:[#allocation4 + $0x28] sm:$0xff] %v4065_v14 }
 0x100   :  { %717 = vrot.lane.b32.xlu1 %v3640_v34, %s3310_s1  ;;  %944 = vrot.lane.b32.xlu0 %v4002_v47, %s3311_s30  ;;  %v161_v34 = vsel %vm145_vm3, 1.0, %v3313_v26 }
 0x101   :  { %v937_v63 = vpop.permute.xlu2 %936  ;;  %v177_v3 = vpack.c.bf16 %v161_v34, %v161_v34 }
 0x102   :  { %v611_v0 = vpop.permute.xlu1 %610  ;;  %v805_v2 = vpop.permute.xlu0 %804  ;;  %984 = vst.msk [vmem:[#allocation5 + $0x208] sm:$0xff] %vm658_vm4, %v937_v63 }
 0x103   :  { %194 = vst.msk [vmem:[#allocation2 + $0x24] sm:$0xf] %vm184_vm6, %v177_v3  ;;  %vm1752_vm6 = vcmask 523264  }
 0x104   :  { %v364_v61 = vpop.f32.mrf.mxu0  ;;  %659 = vst.msk [vmem:[#allocation5] sm:$0xff] %vm658_vm4, %v611_v0 }
 0x105   :  { %v4087_v32 = vadd.f32 %v364_v61, %v3548_v53  ;;  %853 = vst.msk [vmem:[#allocation5 + $0x100] sm:$0xff] %vm658_vm4, %v805_v2 }
 0x107   :  { %960 = vrot.lane.b32.xlu2 %v4037_v62, %s3311_s30  ;;  %574 = vst [vmem:[#allocation4 + $0x188] sm:$0xff] %v4087_v32 }
 0x108   :  { %1041 = vrot.lane.b32.xlu1 %v4002_v47, %s3310_s1  ;;  %1057 = vrot.lane.b32.xlu0 %v4037_v62, %s3310_s1  ;;  %v393_v47 = vpop.f32.mrf.mxu1 }
 0x109   :  { %v1050_v20 = vpop.permute.xlu2 %1049  ;;  %v4133_v48 = vadd.f32 %v393_v47, %v3550_v54 }
 0x10a   :  { %v935_v22 = vpop.permute.xlu1 %934  ;;  %v1129_v25 = vpop.permute.xlu0 %1128  ;;  %1089 = vst.msk [vmem:[#allocation5 + $0x2c8] sm:$0xff] %vm658_vm4, %v1050_v20 }
 0x10b   :  { %983 = vst.msk [vmem:[#allocation5 + $0x200] sm:$0xff] %vm658_vm4, %v935_v22 }
 0x10c   :  { %v4067_v17 = vpop.f32.mrf.mxu0  ;;  %1177 = vst.msk [vmem:[#allocation5 + $0x300] sm:$0xff] %vm658_vm4, %v1129_v25 }
 0x10d   :  { %893 = vst.msk [vmem:[#allocation5 + $0x1b8] sm:$0xff] %vm658_vm4, %v4133_v48 }
 0x10f   :  { %719 = vrot.lane.b32.xlu2 %v3669_v39, %s3310_s1 }
 0x110   :  { %622 = vrot.lane.b32.xlu1 %v3669_v39, %s3311_s30  ;;  %816 = vrot.lane.b32.xlu0 %v3669_v39, %s3312_s14  ;;  %v4099_v39 = vadd.f32 %v411_v33, %v3550_v54 }
 0x111   :  { %v809_v37 = vpop.permute.xlu2 %808 }
 0x112   :  { %v1048_v38 = vpop.permute.xlu1 %1047  ;;  %v951_v53 = vpop.permute.xlu0 %950  ;;  %900 = vst.msk [vmem:[#allocation5 + $0x1f0] sm:$0xff] %vm658_vm4, %v4099_v39 }
 0x113   :  { %855 = vst.msk [vmem:[#allocation5 + $0x110] sm:$0xff] %vm658_vm4, %v809_v37 }
 0x114   :  { %v4095_v36 = vpop.f32.mrf.mxu0  ;;  %1088 = vst.msk [vmem:[#allocation5 + $0x2c0] sm:$0xff] %vm658_vm4, %v1048_v38 }
 0x115   :  { %991 = vst.msk [vmem:[#allocation5 + $0x240] sm:$0xff] %vm658_vm4, %v951_v53 }
 0x117   :  { %1043 = vrot.lane.b32.xlu2 %v4093_v35, %s3310_s1 }
 0x118   :  { %946 = vrot.lane.b32.xlu1 %v4093_v35, %s3311_s30  ;;  %962 = vrot.lane.b32.xlu0 %v4099_v39, %s3311_s30 }
 0x119   :  { %v1133_v43 = vpop.permute.xlu2 %1132 }
 0x11a   :  { %v807_v45 = vpop.permute.xlu1 %806  ;;  %v710_v46 = vpop.permute.xlu0 %709  ;;  %1179 = vst.msk [vmem:[#allocation5 + $0x310] sm:$0xff] %vm658_vm4, %v1133_v43 }
 0x11b   :  { %854 = vst.msk [vmem:[#allocation5 + $0x108] sm:$0xff] %vm658_vm4, %v807_v45 }
 0x11c   :  { %v4114_v41 = vpop.f32.mrf.mxu0  ;;  %757 = vst.msk [vmem:[#allocation5 + $0x88] sm:$0xff] %vm658_vm4, %v710_v46  ;;  %v3194_v46 = vld [vmem:[#allocation2] sm:$0xff] }
 0x11f   :  { %624 = vrot.lane.b32.xlu2 %v3694_v42, %s3311_s30 }
 0x120   :  { %1059 = vrot.lane.b32.xlu1 %v4099_v39, %s3310_s1  ;;  %721 = vrot.lane.b32.xlu0 %v3694_v42, %s3310_s1 }
 0x121   :  { %v955_v50 = vpop.permute.xlu2 %954 }
 0x122   :  { %v1131_v51 = vpop.permute.xlu1 %1130  ;;  %v1034_v52 = vpop.permute.xlu0 %1033  ;;  %993 = vst.msk [vmem:[#allocation5 + $0x250] sm:$0xff] %vm658_vm4, %v955_v50 }
 0x123   :  { %1178 = vst.msk [vmem:[#allocation5 + $0x308] sm:$0xff] %vm658_vm4, %v1131_v51 }
 0x124   :  { %v4135_v49 = vpop.f32.mrf.mxu0  ;;  %1081 = vst.msk [vmem:[#allocation5 + $0x288] sm:$0xff] %vm658_vm4, %v1034_v52 }
 0x127   :  { %948 = vrot.lane.b32.xlu2 %v4133_v48, %s3311_s30 }
 0x128   :  { %818 = vrot.lane.b32.xlu1 %v3694_v42, %s3312_s14  ;;  %1045 = vrot.lane.b32.xlu0 %v4133_v48, %s3310_s1 }
 0x129   :  { %v714_v42 = vpop.permute.xlu2 %713 }
 0x12a   :  { %v953_v58 = vpop.permute.xlu1 %952  ;;  %v615_v60 = vpop.permute.xlu0 %614  ;;  %759 = vst.msk [vmem:[#allocation5 + $0x98] sm:$0xff] %vm658_vm4, %v714_v42 }
 0x12b   :  { %992 = vst.msk [vmem:[#allocation5 + $0x248] sm:$0xff] %vm658_vm4, %v953_v58 }
 0x12c   :  { %v1682_v57 = vpop.f32.mrf.mxu0  ;;  %661 = vst.msk [vmem:[#allocation5 + $0x10] sm:$0xff] %vm658_vm4, %v615_v60 }
 0x12f   :  { %1061 = vrot.lane.b32.xlu2 %v4152_v56, %s3310_s1 }
 0x130   :  { %964 = vrot.lane.b32.xlu1 %v4152_v56, %s3311_s30  ;;  %626 = vrot.lane.b32.xlu0 %v3930_v13, %s3311_s30 }
 0x131   :  { %v1038_v34 = vpop.permute.xlu2 %1037 }
 0x132   :  { %v712_v61 = vpop.permute.xlu1 %711  ;;  %1083 = vst.msk [vmem:[#allocation5 + $0x298] sm:$0xff] %vm658_vm4, %v1038_v34  ;;  %v939_v63 = vpop.permute.xlu0 %938 }
 0x133   :  { %758 = vst.msk [vmem:[#allocation5 + $0x90] sm:$0xff] %vm658_vm4, %v712_v61  ;;  %v3196_v61 = vld [vmem:[#allocation2 + $0x10] sm:$0xff] }
 0x134   :  { %v1684_v54 = vpop.f32.mrf.mxu0  ;;  %985 = vst.msk [vmem:[#allocation5 + $0x210] sm:$0xff] %vm658_vm4, %v939_v63 }
 0x137   :  { %820 = vrot.lane.b32.xlu2 %v3930_v13, %s3312_s14 }
 0x138   :  { %723 = vrot.lane.b32.xlu1 %v3930_v13, %s3310_s1  ;;  %822 = vrot.lane.b32.xlu0 %v3944_v16, %s3312_s14  ;;  %v3278_v13 = vld [vmem:[%s5012_s6] ss:$0 sm:$0xff] }
 0x139   :  { %v619_v1 = vpop.permute.xlu2 %618  ;;  %v1685_v22 = vadd.f32 %v3278_v13, %v1684_v54  ;;  %v1680_v25 = vadd.f32 %v3278_v13, %v4135_v49  ;;  %v1678_v28 = vadd.f32 %v3278_v13, %v4114_v41  ;;  %v1675_v38 = vadd.f32 %v3278_v13, %v4095_v36 }
 0x13a   :  { %v1036_v2 = vpop.permute.xlu1 %1035  ;;  %663 = vst.msk [vmem:[#allocation5 + $0x20] sm:$0xff] %vm658_vm4, %v619_v1  ;;  %v1052_v3 = vpop.permute.xlu0 %1051  ;;  %v1673_v41 = vadd.f32 %v3278_v13, %v4067_v17 }
 0x13b   :  { %1082 = vst.msk [vmem:[#allocation5 + $0x290] sm:$0xff] %vm658_vm4, %v1036_v2  ;;  %v1709_v53 = vpack.c.bf16 %v1680_v25, %v1678_v28 }
 0x13c   :  { %v1687_v0 = vpop.f32.mrf.mxu0  ;;  %1090 = vst.msk [vmem:[#allocation5 + $0x2d0] sm:$0xff] %vm658_vm4, %v1052_v3  ;;  %v1708_v36 = vpack.c.bf16 %v1675_v38, %v1673_v41  ;;  %v3198_v38 = vld [vmem:[#allocation2 + $0x20] sm:$0xff] }
 0x13d   :  { %v1688_v7 = vadd.f32 %v3278_v13, %v1687_v0  ;;  %v1104_v0 = vld [vmem:[#allocation4 + $0xb8] sm:$0xff] }
 0x13f   :  { %725 = vrot.lane.b32.xlu2 %v3944_v16, %s3310_s1 }
 0x140   :  { %628 = vrot.lane.b32.xlu1 %v3944_v16, %s3311_s30  ;;  %727 = vrot.lane.b32.xlu0 %v3969_v31, %s3310_s1  ;;  %v1683_v16 = vadd.f32 %v3278_v13, %v1682_v57 }
 0x141   :  { %v943_v11 = vpop.permute.xlu2 %942 }
 0x142   :  { %v617_v8 = vpop.permute.xlu1 %616  ;;  %987 = vst.msk [vmem:[#allocation5 + $0x220] sm:$0xff] %vm658_vm4, %v943_v11  ;;  %v811_v20 = vpop.permute.xlu0 %810  ;;  %v1710_v27 = vpack.c.bf16 %v1685_v22, %v1683_v16  ;;  %v1106_v16 = vld [vmem:[#allocation4 + $0x1b0] sm:$0xff] }
 0x143   :  { %662 = vst.msk [vmem:[#allocation5 + $0x18] sm:$0xff] %vm658_vm4, %v617_v8  ;;  %v3197_v8 = vld [vmem:[#allocation2 + $0x18] sm:$0xff] }
 0x144   :  { %v1689_v4 = vpop.f32.mrf.mxu0  ;;  %856 = vst.msk [vmem:[#allocation5 + $0x118] sm:$0xff] %vm658_vm4, %v811_v20 }
 0x145   :  { %v1690_v9 = vadd.f32 %v3278_v13, %v1689_v4  ;;  %v4279_v4 = vld [vmem:[%s5018_s12] sm:$0xf] }
 0x147   :  { %v1711_v23 = vpack.c.bf16 %v1690_v9, %v1688_v7  ;;  %630 = vrot.lane.b32.xlu2 %v3969_v31, %s3311_s30  ;;  %v4282_v7 = vperm.slane %v4279_v4, 2 }
 0x148   :  { %824 = vrot.lane.b32.xlu1 %v3969_v31, %s3312_s14  ;;  %632 = vrot.lane.b32.xlu0 %v3998_v44, %s3311_s30  ;;  %v4205_v31 = vpop.f32.mrf.mxu2 }
 0x149   :  { %1781 = vmatpush.bf16.msrb.mxu1 %v1711_v23  ;;  %v1056_v30 = vpop.permute.xlu2 %1055  ;;  %v1107_v23 = vld [vmem:[#allocation4 + $0x90] sm:$0xff] }
 0x14a   :  { %v941_v33 = vpop.permute.xlu1 %940  ;;  %1092 = vst.msk [vmem:[#allocation5 + $0x2e0] sm:$0xff] %vm658_vm4, %v1056_v30  ;;  %v1135_v37 = vpop.permute.xlu0 %1134 }
 0x14b   :  { %986 = vst.msk [vmem:[#allocation5 + $0x218] sm:$0xff] %vm658_vm4, %v941_v33 }
 0x14c   :  { %1180 = vst.msk [vmem:[#allocation5 + $0x318] sm:$0xff] %vm658_vm4, %v1135_v37 }
 0x14d   :  { %1782 = vmatpush.bf16.msrb.mxu1 %v1710_v27 }
 0x14f   :  { %826 = vrot.lane.b32.xlu2 %v3998_v44, %s3312_s14 }
 0x150   :  { %729 = vrot.lane.b32.xlu1 %v3998_v44, %s3310_s1  ;;  %828 = vrot.lane.b32.xlu0 %v4028_v59, %s3312_s14  ;;  %v4217_v49 = vpop.f32.mrf.mxu2 }
 0x151   :  { %1783 = vmatpush.bf16.msrb.mxu1 %v1709_v53  ;;  %v815_v43 = vpop.permute.xlu2 %814 }
 0x152   :  { %v1054_v45 = vpop.permute.xlu1 %1053  ;;  %858 = vst.msk [vmem:[#allocation5 + $0x128] sm:$0xff] %vm658_vm4, %v815_v43  ;;  %v957_v47 = vpop.permute.xlu0 %956 }
 0x153   :  { %1091 = vst.msk [vmem:[#allocation5 + $0x2d8] sm:$0xff] %vm658_vm4, %v1054_v45 }
 0x154   :  { %994 = vst.msk [vmem:[#allocation5 + $0x258] sm:$0xff] %vm658_vm4, %v957_v47 }
 0x155   :  { %1784 = vmatpush.bf16.msrb.mxu1 %v1708_v36 }
 0x157   :  { %731 = vrot.lane.b32.xlu2 %v4028_v59, %s3310_s1 }
 0x158   :  { %3013 = vmatmul.msk.bf16.vlgmr.msrb.gmra.mxu1 %vm1752_vm6, %v3194_v46  ;;  %634 = vrot.lane.b32.xlu1 %v4028_v59, %s3311_s30  ;;  %v4229_v51 = vpop.f32.mrf.mxu2 }
 0x159   :  { %733 = vrot.lane.b32.xlu0 %v4048_v5, %s3310_s1  ;;  %v1139_v44 = vpop.permute.xlu2 %1138 }
 0x15a   :  { %v813_v17 = vpop.permute.xlu1 %812  ;;  %1182 = vst.msk [vmem:[#allocation5 + $0x328] sm:$0xff] %vm658_vm4, %v1139_v44  ;;  %v716_v50 = vpop.permute.xlu0 %715 }
 0x15b   :  { %857 = vst.msk [vmem:[#allocation5 + $0x120] sm:$0xff] %vm658_vm4, %v813_v17 }
 0x15c   :  { %760 = vst.msk [vmem:[#allocation5 + $0xa0] sm:$0xff] %vm658_vm4, %v716_v50 }
 0x15f   :  { %636 = vrot.lane.b32.xlu2 %v4048_v5, %s3311_s30 }
 0x160   :  { %830 = vrot.lane.b32.xlu1 %v4048_v5, %s3312_s14  ;;  %v4240_v42 = vpop.f32.mrf.mxu2 }
 0x161   :  { %638 = vrot.lane.b32.xlu0 %v4065_v14, %s3311_s30  ;;  %v961_v59 = vpop.permute.xlu2 %960 }
 0x162   :  { %v1137_v52 = vpop.permute.xlu1 %1136  ;;  %996 = vst.msk [vmem:[#allocation5 + $0x268] sm:$0xff] %vm658_vm4, %v961_v59  ;;  %v1040_v57 = vpop.permute.xlu0 %1039 }
 0x163   :  { %1181 = vst.msk [vmem:[#allocation5 + $0x320] sm:$0xff] %vm658_vm4, %v1137_v52 }
 0x164   :  { %1084 = vst.msk [vmem:[#allocation5 + $0x2a0] sm:$0xff] %vm658_vm4, %v1040_v57 }
 0x167   :  { %832 = vrot.lane.b32.xlu2 %v4065_v14, %s3312_s14 }
 0x168   :  { %3014 = vmatmul.msk.bf16.gmra.mxu1 %vm1752_vm6, %v3195_v55  ;;  %735 = vrot.lane.b32.xlu1 %v4065_v14, %s3310_s1  ;;  %v4252_v54 = vpop.f32.mrf.mxu2 }
 0x169   :  { %834 = vrot.lane.b32.xlu0 %v4087_v32, %s3312_s14  ;;  %v720_v5 = vpop.permute.xlu2 %719  ;;  %v4346_v45 = vadd.f32 %v4252_v54, %v4282_v7 }
 0x16a   :  { %v959_v58 = vpop.permute.xlu1 %958  ;;  %762 = vst.msk [vmem:[#allocation5 + $0xb0] sm:$0xff] %vm658_vm4, %v720_v5  ;;  %v621_v60 = vpop.permute.xlu0 %620 }
 0x16b   :  { %995 = vst.msk [vmem:[#allocation5 + $0x260] sm:$0xff] %vm658_vm4, %v959_v58  ;;  %v3200_v58 = vld [vmem:[#allocation2 + $0x30] sm:$0xff] }
 0x16c   :  { %664 = vst.msk [vmem:[#allocation5 + $0x28] sm:$0xff] %vm658_vm4, %v621_v60 }
 0x16d   :  { %1214 = vst.msk [vmem:[#allocation5 + $0x3a0] sm:$0xff] %vm658_vm4, %v4346_v45 }
 0x16f   :  { %737 = vrot.lane.b32.xlu2 %v4087_v32, %s3310_s1 }
 0x170   :  { %640 = vrot.lane.b32.xlu1 %v4087_v32, %s3311_s30  ;;  %v4263_v1 = vpop.f32.mrf.mxu2  ;;  %v1105_v32 = vld [vmem:[#allocation4 + $0xd8] sm:$0xff] }
 0x171   :  { %1140 = vrot.lane.b32.xlu0 %v4093_v35, %s3312_s14  ;;  %v1044_v14 = vpop.permute.xlu2 %1043  ;;  %v4360_v50 = vadd.f32 %v4263_v1, %v4282_v7 }
 0x172   :  { %v718_v34 = vpop.permute.xlu1 %717  ;;  %1086 = vst.msk [vmem:[#allocation5 + $0x2b0] sm:$0xff] %vm658_vm4, %v1044_v14  ;;  %v945_v63 = vpop.permute.xlu0 %944 }
 0x173   :  { %761 = vst.msk [vmem:[#allocation5 + $0xa8] sm:$0xff] %vm658_vm4, %v718_v34 }
 0x174   :  { %988 = vst.msk [vmem:[#allocation5 + $0x228] sm:$0xff] %vm658_vm4, %v945_v63 }
 0x175   :  { %1215 = vst.msk [vmem:[#allocation5 + $0x3a8] sm:$0xff] %vm658_vm4, %v4360_v50 }
 0x177   :  { %1144 = vrot.lane.b32.xlu2 %v1104_v0, %s3312_s14 }
 0x178   :  { %3015 = vmatmul.msk.bf16.gmra.mxu1 %vm1752_vm6, %v3196_v61  ;;  %1142 = vrot.lane.b32.xlu1 %v4133_v48, %s3312_s14  ;;  %v4273_v13 = vpop.f32.mrf.mxu2  ;;  %v4288_v48 = vadd.f32 %v4205_v31, %v4282_v7 }
 0x179   :  { %1146 = vrot.lane.b32.xlu0 %v1105_v32, %s3312_s14  ;;  %v625_v35 = vpop.permute.xlu2 %624  ;;  %v4371_v57 = vadd.f32 %v4273_v13, %v4282_v7 }
 0x17a   :  { %v1042_v2 = vpop.permute.xlu1 %1041  ;;  %666 = vst.msk [vmem:[#allocation5 + $0x38] sm:$0xff] %vm658_vm4, %v625_v35  ;;  %v1058_v3 = vpop.permute.xlu0 %1057 }
 0x17b   :  { %1085 = vst.msk [vmem:[#allocation5 + $0x2a8] sm:$0xff] %vm658_vm4, %v1042_v2 }
 0x17c   :  { %1093 = vst.msk [vmem:[#allocation5 + $0x2e8] sm:$0xff] %vm658_vm4, %v1058_v3 }
 0x17d   :  { %1210 = vst.msk [vmem:[#allocation5 + $0x380] sm:$0xff] %vm658_vm4, %v4288_v48 }
 0x17e   :  { %1216 = vst.msk [vmem:[#allocation5 + $0x3b0] sm:$0xff] %vm658_vm4, %v4371_v57 }
 0x17f   :  { %1150 = vrot.lane.b32.xlu2 %v1107_v23, %s3312_s14 }
 0x180   :  { %v4294_v22 = vpop.f32.mrf.mxu2  ;;  %1148 = vrot.lane.b32.xlu1 %v1106_v16, %s3312_s14 }
 0x181   :  { %1152 = vrot.lane.b32.xlu0 %v3909_v6, %s3312_s14  ;;  %v949_v9 = vpop.permute.xlu2 %948  ;;  %v4300_v6 = vadd.f32 %v4217_v49, %v4282_v7  ;;  %v3199_v49 = vld [vmem:[#allocation2 + $0x28] sm:$0xff]  ;;  %v4383_v14 = vadd.f32 %v4294_v22, %v4282_v7 }
 0x182   :  { %v623_v11 = vpop.permute.xlu1 %622  ;;  %990 = vst.msk [vmem:[#allocation5 + $0x238] sm:$0xff] %vm658_vm4, %v949_v9  ;;  %v817_v20 = vpop.permute.xlu0 %816  ;;  %v3201_v9 = vld [vmem:[#allocation2 + $0x38] sm:$0xff] }
 0x183   :  { %665 = vst.msk [vmem:[#allocation5 + $0x30] sm:$0xff] %vm658_vm4, %v623_v11 }
 0x184   :  { %859 = vst.msk [vmem:[#allocation5 + $0x130] sm:$0xff] %vm658_vm4, %v817_v20 }
 0x185   :  { %1211 = vst.msk [vmem:[#allocation5 + $0x388] sm:$0xff] %vm658_vm4, %v4300_v6 }
 0x186   :  { %1217 = vst.msk [vmem:[#allocation5 + $0x3b8] sm:$0xff] %vm658_vm4, %v4383_v14 }
 0x187   :  { %1156 = vrot.lane.b32.xlu2 %v4099_v39, %s3312_s14 }
 0x188   :  { %3016 = vmatmul.msk.bf16.gmra.mxu1 %vm1752_vm6, %v3197_v8  ;;  %v4310_v30 = vpop.f32.mrf.mxu2  ;;  %1154 = vrot.lane.b32.xlu1 %v4037_v62, %s3312_s14  ;;  %v4331_v62 = vadd.f32 %v4240_v42, %v4282_v7 }
 0x189   :  { %1158 = vrot.lane.b32.xlu0 %v4152_v56, %s3312_s14  ;;  %v1062_v25 = vpop.permute.xlu2 %1061  ;;  %v4315_v56 = vadd.f32 %v4229_v51, %v4282_v7  ;;  %v4387_v34 = vadd.f32 %v4310_v30, %v4282_v7 }
 0x18a   :  { %v947_v27 = vpop.permute.xlu1 %946  ;;  %1095 = vst.msk [vmem:[#allocation5 + $0x2f8] sm:$0xff] %vm658_vm4, %v1062_v25  ;;  %v963_v28 = vpop.permute.xlu0 %962 }
 0x18b   :  { %989 = vst.msk [vmem:[#allocation5 + $0x230] sm:$0xff] %vm658_vm4, %v947_v27 }
 0x18c   :  { %997 = vst.msk [vmem:[#allocation5 + $0x270] sm:$0xff] %vm658_vm4, %v963_v28 }
 0x18d   :  { %1212 = vst.msk [vmem:[#allocation5 + $0x390] sm:$0xff] %vm658_vm4, %v4315_v56 }
 0x18e   :  { %1213 = vst.msk [vmem:[#allocation5 + $0x398] sm:$0xff] %vm658_vm4, %v4331_v62 }
 0x18f   :  { %1260 = vrot.lane.b32.xlu2 %v4300_v6, %s3311_s30  ;;  %1218 = vst.msk [vmem:[#allocation5 + $0x3c0] sm:$0xff] %vm658_vm4, %v4387_v34 }
 0x190   :  { %v447_v31 = vpop.f32.mrf.mxu2  ;;  %1258 = vrot.lane.b32.xlu1 %v4288_v48, %s3311_s30 }
 0x191   :  { %1262 = vrot.lane.b32.xlu0 %v4315_v56, %s3311_s30  ;;  %v821_v33 = vpop.permute.xlu2 %820  ;;  %v4390_v61 = vadd.f32 %v447_v31, %v4282_v7 }
 0x192   :  { %v1060_v37 = vpop.permute.xlu1 %1059  ;;  %861 = vst.msk [vmem:[#allocation5 + $0x140] sm:$0xff] %vm658_vm4, %v821_v33  ;;  %v722_v53 = vpop.permute.xlu0 %721 }
 0x193   :  { %1094 = vst.msk [vmem:[#allocation5 + $0x2f0] sm:$0xff] %vm658_vm4, %v1060_v37 }
 0x194   :  { %763 = vst.msk [vmem:[#allocation5 + $0xb8] sm:$0xff] %vm658_vm4, %v722_v53 }
 0x195   :  { %1219 = vst.msk [vmem:[#allocation5 + $0x3c8] sm:$0xff] %vm658_vm4, %v4390_v61 }
 0x197   :  { %1266 = vrot.lane.b32.xlu2 %v4346_v45, %s3311_s30 }
 0x198   :  { %3017 = vmatmul.msk.bf16.gmra.mxu1 %vm1752_vm6, %v3198_v38  ;;  %v4341_v43 = vpop.f32.mrf.mxu2  ;;  %1264 = vrot.lane.b32.xlu1 %v4331_v62, %s3311_s30  ;;  %v1624_v38 = vld [vmem:[#allocation4 + $0x120] sm:$0xff] }
 0x199   :  { %v726_v39 = vpop.permute.xlu2 %725  ;;  %1268 = vrot.lane.b32.xlu0 %v4360_v50, %s3311_s30  ;;  %v4425_v20 = vadd.f32 %v4341_v43, %v4282_v7 }
 0x19a   :  { %v819_v41 = vpop.permute.xlu1 %818  ;;  %765 = vst.msk [vmem:[#allocation5 + $0xc8] sm:$0xff] %vm658_vm4, %v726_v39  ;;  %v1046_v36 = vpop.permute.xlu0 %1045 }
 0x19b   :  { %860 = vst.msk [vmem:[#allocation5 + $0x138] sm:$0xff] %vm658_vm4, %v819_v41 }
 0x19c   :  { %1087 = vst.msk [vmem:[#allocation5 + $0x2b8] sm:$0xff] %vm658_vm4, %v1046_v36  ;;  %v1623_v36 = vld [vmem:[#allocation4] sm:$0xff] }
 0x19d   :  { %1220 = vst.msk [vmem:[#allocation5 + $0x3d0] sm:$0xff] %vm658_vm4, %v4425_v20 }
 0x19f   :  { %1272 = vrot.lane.b32.xlu2 %v4383_v14, %s3311_s30 }
 0x1a0   :  { %v452_v17 = vpop.f32.mrf.mxu2  ;;  %1270 = vrot.lane.b32.xlu1 %v4371_v57, %s3311_s30 }
 0x1a1   :  { %v631_v46 = vpop.permute.xlu2 %630  ;;  %1274 = vrot.lane.b32.xlu0 %v4387_v34, %s3311_s30  ;;  %v4406_v35 = vadd.f32 %v452_v17, %v4282_v7 }
 0x1a2   :  { %v965_v47 = vpop.permute.xlu1 %964  ;;  %669 = vst.msk [vmem:[#allocation5 + $0x50] sm:$0xff] %vm658_vm4, %v631_v46  ;;  %v627_v44 = vpop.permute.xlu0 %626 }
 0x1a3   :  { %998 = vst.msk [vmem:[#allocation5 + $0x278] sm:$0xff] %vm658_vm4, %v965_v47 }
 0x1a4   :  { %667 = vst.msk [vmem:[#allocation5 + $0x40] sm:$0xff] %vm658_vm4, %v627_v44 }
 0x1a5   :  { %1221 = vst.msk [vmem:[#allocation5 + $0x3d8] sm:$0xff] %vm658_vm4, %v4406_v35 }
 0x1a7   :  { %1278 = vrot.lane.b32.xlu2 %v4425_v20, %s3311_s30 }
 0x1a8   :  { %3018 = vmatmul.msk.bf16.gmra.mxu1 %vm1752_vm6, %v3199_v49  ;;  %v455_v55 = vpop.f32.mrf.mxu2  ;;  %1276 = vrot.lane.b32.xlu1 %v4390_v61, %s3311_s30 }
 0x1a9   :  { %v827_v51 = vpop.permute.xlu2 %826  ;;  %v4409_v2 = vadd.f32 %v455_v55, %v4282_v7  ;;  %1280 = vrot.lane.b32.xlu0 %v4406_v35, %s3311_s30 }
 0x1aa   :  { %v724_v59 = vpop.permute.xlu1 %723  ;;  %864 = vst.msk [vmem:[#allocation5 + $0x158] sm:$0xff] %vm658_vm4, %v827_v51  ;;  %v823_v52 = vpop.permute.xlu0 %822 }
 0x1ab   :  { %764 = vst.msk [vmem:[#allocation5 + $0xc0] sm:$0xff] %vm658_vm4, %v724_v59 }
 0x1ac   :  { %862 = vst.msk [vmem:[#allocation5 + $0x148] sm:$0xff] %vm658_vm4, %v823_v52  ;;  %v1626_v52 = vld [vmem:[#allocation4 + $0xf8] sm:$0xff] }
 0x1ad   :  { %1222 = vst.msk [vmem:[#allocation5 + $0x3e0] sm:$0xff] %vm658_vm4, %v4409_v2 }
 0x1b0   :  { %v457_v54 = vpop.f32.mrf.mxu2  ;;  %1282 = vrot.lane.b32.xlu1 %v4409_v2, %s3311_s30 }
 0x1b1   :  { %v732_v42 = vpop.permute.xlu2 %731  ;;  %v4449_v28 = vadd.f32 %v457_v54, %v4282_v7 }
 0x1b2   :  { %v629_v5 = vpop.permute.xlu1 %628  ;;  %768 = vst.msk [vmem:[#allocation5 + $0xe0] sm:$0xff] %vm658_vm4, %v732_v42  ;;  %v728_v60 = vpop.permute.xlu0 %727 }
 0x1b3   :  { %668 = vst.msk [vmem:[#allocation5 + $0x48] sm:$0xff] %vm658_vm4, %v629_v5  ;;  %1284 = vrot.lane.b32.xlu2 %v4449_v28, %s3311_s30 }
 0x1b4   :  { %766 = vst.msk [vmem:[#allocation5 + $0xd0] sm:$0xff] %vm658_vm4, %v728_v60 }
 0x1b5   :  { %1223 = vst.msk [vmem:[#allocation5 + $0x3e8] sm:$0xff] %vm658_vm4, %v4449_v28 }
 0x1b8   :  { %3019 = vmatmul.msk.bf16.gmra.mxu1 %vm1752_vm6, %v3200_v58  ;;  %v460_v32 = vpop.f32.mrf.mxu2  ;;  %v1625_v58 = vld [vmem:[#allocation4 + $0x108] sm:$0xff] }
 0x1b9   :  { %v637_v63 = vpop.permute.xlu2 %636  ;;  %v4428_v22 = vadd.f32 %v460_v32, %v4282_v7 }
 0x1ba   :  { %v825_v0 = vpop.permute.xlu1 %824  ;;  %672 = vst.msk [vmem:[#allocation5 + $0x68] sm:$0xff] %vm658_vm4, %v637_v63  ;;  %v633_v1 = vpop.permute.xlu0 %632 }
 0x1bb   :  { %863 = vst.msk [vmem:[#allocation5 + $0x150] sm:$0xff] %vm658_vm4, %v825_v0  ;;  %1286 = vrot.lane.b32.xlu0 %v4428_v22, %s3311_s30  ;;  %1355 = vrot.lane.b32.xlu2 %v4288_v48, %s3310_s1 }
 0x1bc   :  { %670 = vst.msk [vmem:[#allocation5 + $0x58] sm:$0xff] %vm658_vm4, %v633_v1 }
 0x1bd   :  { %1224 = vst.msk [vmem:[#allocation5 + $0x3f0] sm:$0xff] %vm658_vm4, %v4428_v22 }
 0x1c0   :  { %v462_v8 = vpop.f32.mrf.mxu2 }
 0x1c1   :  { %v833_v3 = vpop.permute.xlu2 %832  ;;  %v4431_v23 = vadd.f32 %v462_v8, %v4282_v7  ;;  %v1627_v8 = vld [vmem:[#allocation4 + $0x128] sm:$0xff] }
 0x1c2   :  { %v730_v13 = vpop.permute.xlu1 %729  ;;  %867 = vst.msk [vmem:[#allocation5 + $0x170] sm:$0xff] %vm658_vm4, %v833_v3  ;;  %v829_v11 = vpop.permute.xlu0 %828 }
 0x1c3   :  { %767 = vst.msk [vmem:[#allocation5 + $0xd8] sm:$0xff] %vm658_vm4, %v730_v13  ;;  %1288 = vrot.lane.b32.xlu1 %v4431_v23, %s3311_s30  ;;  %1357 = vrot.lane.b32.xlu0 %v4300_v6, %s3310_s1  ;;  %v1628_v13 = vld [vmem:[#allocation4 + $0x1a8] sm:$0xff] }
 0x1c4   :  { %865 = vst.msk [vmem:[#allocation5 + $0x160] sm:$0xff] %vm658_vm4, %v829_v11  ;;  %1361 = vrot.lane.b32.xlu2 %v4331_v62, %s3310_s1 }
 0x1c5   :  { %1225 = vst.msk [vmem:[#allocation5 + $0x3f8] sm:$0xff] %vm658_vm4, %v4431_v23 }
 0x1c8   :  { %3020 = vmatmul.msk.bf16.gmra.mxu1 %vm1752_vm6, %v3201_v9 }
 0x1c9   :  { %v738_v16 = vpop.permute.xlu2 %737 }
 0x1ca   :  { %v635_v25 = vpop.permute.xlu1 %634  ;;  %771 = vst.msk [vmem:[#allocation5 + $0xf8] sm:$0xff] %vm658_vm4, %v738_v16 }
 0x1cb   :  { %v734_v27 = vpop.permute.xlu0 %733  ;;  %671 = vst.msk [vmem:[#allocation5 + $0x60] sm:$0xff] %vm658_vm4, %v635_v25  ;;  %1359 = vrot.lane.b32.xlu1 %v4315_v56, %s3310_s1  ;;  %1363 = vrot.lane.b32.xlu0 %v4346_v45, %s3310_s1 }
 0x1cc   :  { %769 = vst.msk [vmem:[#allocation5 + $0xe8] sm:$0xff] %vm658_vm4, %v734_v27  ;;  %1367 = vrot.lane.b32.xlu2 %v4371_v57, %s3310_s1 }
 0x1d1   :  { %v1145_v37 = vpop.permute.xlu2 %1144 }
 0x1d2   :  { %v831_v33 = vpop.permute.xlu1 %830  ;;  %1185 = vst.msk [vmem:[#allocation5 + $0x340] sm:$0xff] %vm658_vm4, %v1145_v37 }
 0x1d3   :  { %866 = vst.msk [vmem:[#allocation5 + $0x168] sm:$0xff] %vm658_vm4, %v831_v33  ;;  %v639_v7 = vpop.permute.xlu0 %638  ;;  %1365 = vrot.lane.b32.xlu1 %v4360_v50, %s3310_s1  ;;  %1369 = vrot.lane.b32.xlu0 %v4383_v14, %s3310_s1 }
 0x1d4   :  { %673 = vst.msk [vmem:[#allocation5 + $0x70] sm:$0xff] %vm658_vm4, %v639_v7  ;;  %1373 = vrot.lane.b32.xlu2 %v4390_v61, %s3310_s1  ;;  %v1630_v7 = vld [vmem:[#allocation4 + $0xe0] sm:$0xff] }
 0x1d5   :  { %v1786_v30 = vpop.f32.mrf.mxu1 }
 0x1d6   :  { %v1787_v43 = vadd.f32 %v1786_v30, %v1623_v36 }
 0x1d8   :  { %v1826_v47 = vmax.f32 %v1787_v43, 0.0 }
 0x1d9   :  { %v1151_v49 = vpop.permute.xlu2 %1150 }
 0x1da   :  { %v736_v31 = vpop.permute.xlu1 %735  ;;  %1188 = vst.msk [vmem:[#allocation5 + $0x358] sm:$0xff] %vm658_vm4, %v1151_v49  ;;  %v3281_v49 = vld [vmem:[%s5017_s11 + $0x8] sm:$0x77] }
 0x1db   :  { %770 = vst.msk [vmem:[#allocation5 + $0xf0] sm:$0xff] %vm658_vm4, %v736_v31  ;;  %v835_v41 = vpop.permute.xlu0 %834  ;;  %1371 = vrot.lane.b32.xlu1 %v4387_v34, %s3310_s1  ;;  %1375 = vrot.lane.b32.xlu0 %v4425_v20, %s3310_s1 }
 0x1dc   :  { %868 = vst.msk [vmem:[#allocation5 + $0x178] sm:$0xff] %vm658_vm4, %v835_v41  ;;  %1379 = vrot.lane.b32.xlu2 %v4409_v2, %s3310_s1 }
 0x1dd   :  { %v1788_v53 = vpop.f32.mrf.mxu1 }
 0x1de   :  { %v1789_v39 = vadd.f32 %v1788_v53, %v1624_v38  ;;  %v1629_v53 = vld [vmem:[#allocation4 + $0x150] sm:$0xff] }
 0x1e0   :  { %v1827_v46 = vmax.f32 %v1789_v39, 0.0 }
 0x1e2   :  { %v641_v17 = vpop.permute.xlu1 %640  ;;  %v4480_v59 = vpack.c.bf16 %v1827_v46, %v1826_v47 }
 0x1e3   :  { %674 = vst.msk [vmem:[#allocation5 + $0x78] sm:$0xff] %vm658_vm4, %v641_v17  ;;  %v1141_v51 = vpop.permute.xlu0 %1140  ;;  %1377 = vrot.lane.b32.xlu1 %v4406_v35, %s3310_s1  ;;  %1381 = vrot.lane.b32.xlu0 %v4449_v28, %s3310_s1 }
 0x1e4   :  { %1183 = vst.msk [vmem:[#allocation5 + $0x330] sm:$0xff] %vm658_vm4, %v1141_v51  ;;  %1385 = vrot.lane.b32.xlu2 %v4431_v23, %s3310_s1 }
 0x1e5   :  { %v1791_v44 = vpop.f32.mrf.mxu1 }
 0x1e6   :  { %v1792_v60 = vadd.f32 %v1791_v44, %v1625_v58  ;;  %v275_v44 = vunpack.c.h.b16 %v3281_v49 }
 0x1e8   :  { %v1828_v63 = vmax.f32 %v1792_v60, 0.0 }
 0x1ea   :  { %v1143_v0 = vpop.permute.xlu1 %1142 }
 0x1eb   :  { %v1147_v5 = vpop.permute.xlu0 %1146  ;;  %1383 = vrot.lane.b32.xlu1 %v4428_v22, %s3310_s1  ;;  %1184 = vst.msk [vmem:[#allocation5 + $0x338] sm:$0xff] %vm658_vm4, %v1143_v0  ;;  %1452 = vrot.lane.b32.xlu0 %v4288_v48, %s3312_s14  ;;  %v1157_v48 = vpop.permute.xlu2 %1156 }
 0x1ec   :  { %1186 = vst.msk [vmem:[#allocation5 + $0x348] sm:$0xff] %vm658_vm4, %v1147_v5  ;;  %1456 = vrot.lane.b32.xlu2 %v4315_v56, %s3312_s14 }
 0x1ed   :  { %v1793_v55 = vpop.f32.mrf.mxu1  ;;  %1191 = vst.msk [vmem:[#allocation5 + $0x370] sm:$0xff] %vm658_vm4, %v1157_v48 }
 0x1ee   :  { %v1794_v42 = vadd.f32 %v1793_v55, %v1626_v52 }
 0x1f0   :  { %v1829_v54 = vmax.f32 %v1794_v42, 0.0 }
 0x1f2   :  { %v4497_v32 = vpack.c.bf16 %v1829_v54, %v1828_v63  ;;  %v1149_v3 = vpop.permute.xlu1 %1148 }
 0x1f3   :  { %1454 = vrot.lane.b32.xlu1 %v4300_v6, %s3312_s14  ;;  %1187 = vst.msk [vmem:[#allocation5 + $0x350] sm:$0xff] %vm658_vm4, %v1149_v3  ;;  %1458 = vrot.lane.b32.xlu0 %v4331_v62, %s3312_s14  ;;  %v1153_v37 = vpop.permute.xlu0 %1152 }
 0x1f4   :  { %1189 = vst.msk [vmem:[#allocation5 + $0x360] sm:$0xff] %vm658_vm4, %v1153_v37  ;;  %1462 = vrot.lane.b32.xlu2 %v4360_v50, %s3312_s14 }
 0x1f5   :  { %v1796_v1 = vpop.f32.mrf.mxu1 }
 0x1f6   :  { %v1797_v16 = vadd.f32 %v1796_v1, %v1627_v8 }
 0x1f8   :  { %v1830_v6 = vmax.f32 %v1797_v16, 0.0 }
 0x1fa   :  { %v1155_v33 = vpop.permute.xlu1 %1154 }
 0x1fb   :  { %1460 = vrot.lane.b32.xlu1 %v4346_v45, %s3312_s14  ;;  %1464 = vrot.lane.b32.xlu0 %v4371_v57, %s3312_s14  ;;  %v1261_v45 = vpop.permute.xlu2 %1260  ;;  %1190 = vst.msk [vmem:[#allocation5 + $0x368] sm:$0xff] %vm658_vm4, %v1155_v33  ;;  %v1159_v36 = vpop.permute.xlu0 %1158  ;;  %v1635_v33 = vld [vmem:[#allocation4 + $0x180] sm:$0xff] }
 0x1fc   :  { %1308 = vst.msk [vmem:[#allocation5 + $0x408] sm:$0xff] %vm658_vm4, %v1261_v45  ;;  %1468 = vrot.lane.b32.xlu2 %v4387_v34, %s3312_s14 }
 0x1fd   :  { %v1798_v9 = vpop.f32.mrf.mxu1  ;;  %1192 = vst.msk [vmem:[#allocation5 + $0x378] sm:$0xff] %vm658_vm4, %v1159_v36 }
 0x1fe   :  { %v1799_v11 = vadd.f32 %v1798_v9, %v1628_v13  ;;  %v1637_v9 = vld [vmem:[#allocation4 + $0x28] sm:$0xff] }
 0x200   :  { %v1831_v25 = vmax.f32 %v1799_v11, 0.0 }
 0x202   :  { %v4513_v30 = vpack.c.bf16 %v1831_v25, %v1830_v6  ;;  %v1259_v39 = vpop.permute.xlu1 %1258  ;;  %v1636_v25 = vld [vmem:[#allocation4 + $0xb0] sm:$0xff]  ;;  %v1638_v6 = vld [vmem:[#allocation4 + $0x188] sm:$0xff] }
 0x203   :  { %1466 = vrot.lane.b32.xlu1 %v4383_v14, %s3312_s14  ;;  %1470 = vrot.lane.b32.xlu0 %v4390_v61, %s3312_s14  ;;  %v1267_v14 = vpop.permute.xlu2 %1266  ;;  %1307 = vst.msk [vmem:[#allocation5 + $0x400] sm:$0xff] %vm658_vm4, %v1259_v39  ;;  %v1263_v46 = vpop.permute.xlu0 %1262 }
 0x204   :  { %1311 = vst.msk [vmem:[#allocation5 + $0x420] sm:$0xff] %vm658_vm4, %v1267_v14  ;;  %1474 = vrot.lane.b32.xlu2 %v4406_v35, %s3312_s14  ;;  %v279_v35 = vpack.c.b16 %v275_v44, %v275_v44 }
 0x205   :  { %v1801_v27 = vpop.f32.mrf.mxu1  ;;  %1309 = vst.msk [vmem:[#allocation5 + $0x410] sm:$0xff] %vm658_vm4, %v1263_v46 }
 0x206   :  { %v1802_v56 = vadd.f32 %v1801_v27, %v1629_v53  ;;  %v4585_v53 = vshrl.u32 %v77_v19, 7 }
 0x208   :  { %v1832_v57 = vmax.f32 %v1802_v56, 0.0  ;;  %v4590_v56 = vld [vmem:[%s5008_s2] ss:$0 sm:$0xff]  ;;  %v81_v39 = vadd.s32 8, %v4585_v53  ;;  %s4684_s2 = smov 0  }
 0x20a   :  { %v1265_v61 = vpop.permute.xlu1 %1264  ;;  %vm203_vm10 = vcmp.eq.s32.totalorder %v81_v39, %v4590_v56 }
 0x20b   :  { %1472 = vrot.lane.b32.xlu1 %v4425_v20, %s3312_s14  ;;  %1476 = vrot.lane.b32.xlu0 %v4409_v2, %s3312_s14  ;;  %v1273_v50 = vpop.permute.xlu2 %1272  ;;  %1310 = vst.msk [vmem:[#allocation5 + $0x418] sm:$0xff] %vm658_vm4, %v1265_v61  ;;  %v1269_v47 = vpop.permute.xlu0 %1268 }
 0x20c   :  { %1314 = vst.msk [vmem:[#allocation5 + $0x438] sm:$0xff] %vm658_vm4, %v1273_v50  ;;  %1480 = vrot.lane.b32.xlu2 %v4428_v22, %s3312_s14 }
 0x20d   :  { %v1803_v62 = vpop.f32.mrf.mxu1  ;;  %1312 = vst.msk [vmem:[#allocation5 + $0x428] sm:$0xff] %vm658_vm4, %v1269_v47  ;;  %v211_v47 = vsel %vm203_vm10, 1.0, %v3313_v26 }
 0x20e   :  { %v1804_v38 = vadd.f32 %v1803_v62, %v1630_v7  ;;  %v1634_v7 = vld [vmem:[#allocation4 + $0x48] sm:$0xff] }
 0x210   :  { %v1833_v31 = vmax.f32 %v1804_v38, 0.0 }
 0x212   :  { %v4533_v43 = vpack.c.bf16 %v1833_v31, %v1832_v57 }
 0x213   :  { %1478 = vrot.lane.b32.xlu1 %v4449_v28, %s3312_s14  ;;  %1482 = vrot.lane.b32.xlu0 %v4431_v23, %s3312_s14  ;;  %v1279_v34 = vpop.permute.xlu2 %1278  ;;  %v1271_v28 = vpop.permute.xlu1 %1270  ;;  %v316_v23 = vsel %vm305_vm0, %v279_v35, 0  ;;  %vm202_vm0 = vcmp.eq.s32.totalorder %v4585_v53, %v4590_v56 }
 0x214   :  { %1317 = vst.msk [vmem:[#allocation5 + $0x450] sm:$0xff] %vm658_vm4, %v1279_v34  ;;  %472 = vmatpush.bf16.msrb.mxu3 %v316_v23  ;;  %v1275_v55 = vpop.permute.xlu0 %1274  ;;  %v210_v36 = vsel %vm202_vm0, 1.0, %v3313_v26  ;;  %v1632_v34 = vld [vmem:[#allocation4 + $0x10] sm:$0xff] }
 0x215   :  { %v4530_v41 = vpop.f32.mrf.mxu1  ;;  %1313 = vst.msk [vmem:[#allocation5 + $0x430] sm:$0xff] %vm658_vm4, %v1271_v28  ;;  %v3236_v23 = vpack.c.bf16 %v211_v47, %v210_v36 }
 0x216   :  { %1315 = vst.msk [vmem:[#allocation5 + $0x440] sm:$0xff] %vm658_vm4, %v1275_v55 }
 0x217   :  { %2969 = vmatmul.msk.bf16.vlgmr.msrb.gmra.mxu3 %vm280_vm1, %v3403_v10  ;;  %3237 = vst [vmem:[#allocation3 + $0x10] sm:$0xff] %v3236_v23  }
 0x21b   :  { %v1285_v17 = vpop.permute.xlu2 %1284  ;;  %v1277_v51 = vpop.permute.xlu1 %1276 }
 0x21c   :  { %1320 = vst.msk [vmem:[#allocation5 + $0x468] sm:$0xff] %vm658_vm4, %v1285_v17  ;;  %v1281_v22 = vpop.permute.xlu0 %1280 }
 0x21d   :  { %v4543_v20 = vpop.f32.mrf.mxu1  ;;  %1316 = vst.msk [vmem:[#allocation5 + $0x448] sm:$0xff] %vm658_vm4, %v1277_v51 }
 0x21e   :  { %1318 = vst.msk [vmem:[#allocation5 + $0x458] sm:$0xff] %vm658_vm4, %v1281_v22  ;;  %v1809_v49 = vadd.f32 %v4543_v20, %v1632_v34 }
 0x223   :  { %v1356_v42 = vpop.permute.xlu2 %1355  ;;  %v1283_v5 = vpop.permute.xlu1 %1282 }
 0x224   :  { %1404 = vst.msk [vmem:[#allocation5 + $0x480] sm:$0xff] %vm658_vm4, %v1356_v42 }
 0x225   :  { %v4552_v2 = vpop.f32.mrf.mxu1  ;;  %1319 = vst.msk [vmem:[#allocation5 + $0x460] sm:$0xff] %vm658_vm4, %v1283_v5 }
 0x227   :  { %2970 = vmatmul.msk.bf16.gmra.mxu3 %vm280_vm1, %v3420_v15 }
 0x22b   :  { %v1362_v60 = vpop.permute.xlu2 %1361 }
 0x22c   :  { %1407 = vst.msk [vmem:[#allocation5 + $0x498] sm:$0xff] %vm658_vm4, %v1362_v60  ;;  %v83_v60 = vadd.s32 24, %v4585_v53 }
 0x22d   :  { %v1813_v52 = vpop.f32.mrf.mxu1  ;;  %v1287_v0 = vpop.permute.xlu0 %1286 }
 0x22e   :  { %1321 = vst.msk [vmem:[#allocation5 + $0x470] sm:$0xff] %vm658_vm4, %v1287_v0  ;;  %v1814_v31 = vadd.f32 %v1813_v52, %v1634_v7  ;;  %v1835_v52 = vmax.f32 %v1809_v49, 0.0  ;;  %vm205_vm12 = vcmp.eq.s32.totalorder %v83_v60, %v4590_v56 }
 0x230   :  { %v1837_v44 = vmax.f32 %v1814_v31, 0.0 }
 0x233   :  { %v1368_v10 = vpop.permute.xlu2 %1367 }
 0x234   :  { %1410 = vst.msk [vmem:[#allocation5 + $0x4b0] sm:$0xff] %vm658_vm4, %v1368_v10 }
 0x235   :  { %v1816_v58 = vpop.f32.mrf.mxu1  ;;  %v1289_v54 = vpop.permute.xlu1 %1288 }
 0x236   :  { %1322 = vst.msk [vmem:[#allocation5 + $0x478] sm:$0xff] %vm658_vm4, %v1289_v54  ;;  %v1358_v13 = vpop.permute.xlu0 %1357  ;;  %v1817_v62 = vadd.f32 %v1816_v58, %v1635_v33 }
 0x237   :  { %1405 = vst.msk [vmem:[#allocation5 + $0x488] sm:$0xff] %vm658_vm4, %v1358_v13  ;;  %2971 = vmatmul.msk.bf16.gmra.mxu3 %vm280_vm1, %v3442_v21  ;;  %v1633_v21 = vld [vmem:[#allocation4 + $0x118] sm:$0xff] }
 0x238   :  { %v1812_v50 = vadd.f32 %v4552_v2, %v1633_v21  ;;  %v1838_v19 = vmax.f32 %v1817_v62, 0.0  ;;  %v1631_v2 = vld [vmem:[#allocation4 + $0xf0] sm:$0xff] }
 0x239   :  { %v1807_v17 = vadd.f32 %v4530_v41, %v1631_v2  ;;  %v82_v41 = vadd.s32 16, %v4585_v53 }
 0x23a   :  { %v1836_v51 = vmax.f32 %v1812_v50, 0.0 }
 0x23b   :  { %v1374_v8 = vpop.permute.xlu2 %1373  ;;  %v1834_v42 = vmax.f32 %v1807_v17, 0.0  ;;  %vm204_vm11 = vcmp.eq.s32.totalorder %v82_v41, %v4590_v56 }
 0x23c   :  { %1413 = vst.msk [vmem:[#allocation5 + $0x4c8] sm:$0xff] %vm658_vm4, %v1374_v8  ;;  %v1855_v55 = vpack.c.bf16 %v1837_v44, %v1836_v51  ;;  %v212_v54 = vsel %vm204_vm11, 1.0, %v3313_v26 }
 0x23d   :  { %v1818_v63 = vpop.f32.mrf.mxu1  ;;  %v1360_v1 = vpop.permute.xlu1 %1359  ;;  %v1854_v22 = vpack.c.bf16 %v1835_v52, %v1834_v42 }
 0x23e   :  { %1406 = vst.msk [vmem:[#allocation5 + $0x490] sm:$0xff] %vm658_vm4, %v1360_v1  ;;  %v1364_v15 = vpop.permute.xlu0 %1363  ;;  %v1819_v27 = vadd.f32 %v1818_v63, %v1636_v25  ;;  %v213_v63 = vsel %vm205_vm12, 1.0, %v3313_v26 }
 0x23f   :  { %1408 = vst.msk [vmem:[#allocation5 + $0x4a0] sm:$0xff] %vm658_vm4, %v1364_v15  ;;  %v3239_v1 = vpack.c.bf16 %v213_v63, %v212_v54 }
 0x240   :  { %v1839_v57 = vmax.f32 %v1819_v27, 0.0  ;;  %v86_v27 = vadd.s32 48, %v4585_v53 }
 0x241   :  { %3247 = vst [vmem:[#allocation3] sm:$0xff] %v3239_v1  }
 0x242   :  { %v1856_v35 = vpack.c.bf16 %v1839_v57, %v1838_v19  ;;  %vm208_vm15 = vcmp.eq.s32.totalorder %v86_v27, %v4590_v56 }
 0x243   :  { %v1380_v61 = vpop.permute.xlu2 %1379  ;;  %v216_v33 = vsel %vm208_vm15, 1.0, %v3313_v26 }
 0x244   :  { %1416 = vst.msk [vmem:[#allocation5 + $0x4e0] sm:$0xff] %vm658_vm4, %v1380_v61 }
 0x245   :  { %v1821_v3 = vpop.f32.mrf.mxu1  ;;  %v1366_v16 = vpop.permute.xlu1 %1365 }
 0x246   :  { %v1822_v11 = vadd.f32 %v1821_v3, %v1637_v9  ;;  %1409 = vst.msk [vmem:[#allocation5 + $0x4a8] sm:$0xff] %vm658_vm4, %v1366_v16  ;;  %v1370_v28 = vpop.permute.xlu0 %1369  ;;  %v3202_v9 = vld [vmem:[#allocation3 + $0x10] sm:$0xff] }
 0x247   :  { %1411 = vst.msk [vmem:[#allocation5 + $0x4b8] sm:$0xff] %vm658_vm4, %v1370_v28  ;;  %2972 = vmatmul.msk.bf16.gmra.mxu3 %vm280_vm1, %v3454_v24 }
 0x248   :  { %v1840_v37 = vmax.f32 %v1822_v11, 0.0  ;;  %v84_v11 = vadd.s32 32, %v4585_v53  ;;  %v3203_v15 = vld [vmem:[#allocation3] sm:$0xff] }
 0x24a   :  { %vm206_vm13 = vcmp.eq.s32.totalorder %v84_v11, %v4590_v56 }
 0x24b   :  { %v1386_v5 = vpop.permute.xlu2 %1385 }
 0x24c   :  { %1419 = vst.msk [vmem:[#allocation5 + $0x4f8] sm:$0xff] %vm658_vm4, %v1386_v5 }
 0x24d   :  { %v1823_v48 = vpop.f32.mrf.mxu1  ;;  %v1372_v46 = vpop.permute.xlu1 %1371 }
 0x24e   :  { %v1824_v45 = vadd.f32 %v1823_v48, %v1638_v6  ;;  %1412 = vst.msk [vmem:[#allocation5 + $0x4c0] sm:$0xff] %vm658_vm4, %v1372_v46  ;;  %v1376_v20 = vpop.permute.xlu0 %1375 }
 0x24f   :  { %1414 = vst.msk [vmem:[#allocation5 + $0x4d0] sm:$0xff] %vm658_vm4, %v1376_v20 }
 0x250   :  { %v1841_v38 = vmax.f32 %v1824_v45, 0.0  ;;  %v87_v45 = vadd.s32 56, %v4585_v53 }
 0x252   :  { %v1857_v14 = vpack.c.bf16 %v1841_v38, %v1840_v37  ;;  %vm209_vm2 = vcmp.eq.s32.totalorder %v87_v45, %v4590_v56 }
 0x253   :  { %v1457_v0 = vpop.permute.xlu2 %1456  ;;  %v217_v7 = vsel %vm209_vm2, 1.0, %v3313_v26 }
 0x254   :  { %1882 = vmatpush.bf16.msrb.mxu2 %v1857_v14  ;;  %1503 = vst.msk [vmem:[#allocation5 + $0x510] sm:$0xff] %vm658_vm4, %v1457_v0  ;;  %v3245_v62 = vpack.c.bf16 %v217_v7, %v216_v33  ;;  %v4656_v14 = vperm.slane %v4279_v4, 3 }
 0x255   :  { %v1378_v58 = vpop.permute.xlu1 %1377 }
 0x256   :  { %1415 = vst.msk [vmem:[#allocation5 + $0x4d8] sm:$0xff] %vm658_vm4, %v1378_v58  ;;  %v1382_v24 = vpop.permute.xlu0 %1381 }
 0x257   :  { %1417 = vst.msk [vmem:[#allocation5 + $0x4e8] sm:$0xff] %vm658_vm4, %v1382_v24  ;;  %2973 = vmatmul.msk.bf16.gmra.mxu3 %vm280_vm1, %v3406_v12 }
 0x258   :  { %1883 = vmatpush.bf16.msrb.mxu2 %v1856_v35  ;;  %3249 = vst [vmem:[#allocation3 + $0x8] sm:$0xff] %v3245_v62  }
 0x25b   :  { %v1463_v13 = vpop.permute.xlu2 %1462 }
 0x25c   :  { %1884 = vmatpush.bf16.msrb.mxu2 %v1855_v55  ;;  %1506 = vst.msk [vmem:[#allocation5 + $0x528] sm:$0xff] %vm658_vm4, %v1463_v13 }
 0x25d   :  { %v1384_v10 = vpop.permute.xlu1 %1383 }
 0x25e   :  { %1418 = vst.msk [vmem:[#allocation5 + $0x4f0] sm:$0xff] %vm658_vm4, %v1384_v10 }
 0x260   :  { %1885 = vmatpush.bf16.msrb.mxu2 %v1854_v22 }
 0x263   :  { %v1469_v6 = vpop.permute.xlu2 %1468 }
 0x264   :  { %1886 = vmatpush.bf16.msrb.mxu2 %v4533_v43  ;;  %v1453_v43 = vpop.permute.xlu0 %1452  ;;  %1509 = vst.msk [vmem:[#allocation5 + $0x540] sm:$0xff] %vm658_vm4, %v1469_v6 }
 0x265   :  { %v1455_v3 = vpop.permute.xlu1 %1454  ;;  %1501 = vst.msk [vmem:[#allocation5 + $0x500] sm:$0xff] %vm658_vm4, %v1453_v43 }
 0x266   :  { %1502 = vst.msk [vmem:[#allocation5 + $0x508] sm:$0xff] %vm658_vm4, %v1455_v3 }
 0x267   :  { %2974 = vmatmul.msk.bf16.gmra.mxu3 %vm280_vm1, %v3432_v18 }
 0x268   :  { %1887 = vmatpush.bf16.msrb.mxu2 %v4513_v30  ;;  %v85_v30 = vadd.s32 40, %v4585_v53 }
 0x26a   :  { %vm207_vm14 = vcmp.eq.s32.totalorder %v85_v30, %v4590_v56 }
 0x26b   :  { %v215_v8 = vsel %vm207_vm14, 1.0, %v3313_v26  ;;  %v1475_v37 = vpop.permute.xlu2 %1474 }
 0x26c   :  { %1888 = vmatpush.bf16.msrb.mxu2 %v4497_v32  ;;  %v214_v32 = vsel %vm206_vm13, 1.0, %v3313_v26  ;;  %v1459_v25 = vpop.permute.xlu0 %1458  ;;  %1512 = vst.msk [vmem:[#allocation5 + $0x558] sm:$0xff] %vm658_vm4, %v1475_v37  ;;  %v3205_v26 = vld [vmem:[#allocation3 + $0x8] sm:$0xff] }
 0x26d   :  { %v3242_v16 = vpack.c.bf16 %v215_v8, %v214_v32  ;;  %v1461_v12 = vpop.permute.xlu1 %1460  ;;  %1504 = vst.msk [vmem:[#allocation5 + $0x518] sm:$0xff] %vm658_vm4, %v1459_v25 }
 0x26e   :  { %1505 = vst.msk [vmem:[#allocation5 + $0x520] sm:$0xff] %vm658_vm4, %v1461_v12 }
 0x26f   :  { %3248 = vst [vmem:[#allocation3 + $0x18] sm:$0xff] %v3242_v16  }
 0x270   :  { %1889 = vmatpush.bf16.msrb.mxu2 %v4480_v59 }
 0x273   :  { %1890 = vmatmul.bf16.vlgmr.msrb.gmra.mxu2 %v3202_v9  ;;  %v1481_v56 = vpop.permute.xlu2 %1480 }
 0x274   :  { %v1465_v48 = vpop.permute.xlu0 %1464  ;;  %1515 = vst.msk [vmem:[#allocation5 + $0x570] sm:$0xff] %vm658_vm4, %v1481_v56 }
 0x275   :  { %v1467_v59 = vpop.permute.xlu1 %1466  ;;  %1507 = vst.msk [vmem:[#allocation5 + $0x530] sm:$0xff] %vm658_vm4, %v1465_v48 }
 0x276   :  { %1508 = vst.msk [vmem:[#allocation5 + $0x538] sm:$0xff] %vm658_vm4, %v1467_v59  ;;  %v3204_v38 = vld [vmem:[#allocation3 + $0x18] sm:$0xff] }
 0x277   :  { %2975 = vmatmul.msk.bf16.gmra.mxu3 %vm280_vm1, %v3467_v29 }
 0x27c   :  { %v1471_v18 = vpop.permute.xlu0 %1470 }
 0x27d   :  { %1510 = vst.msk [vmem:[#allocation5 + $0x548] sm:$0xff] %vm658_vm4, %v1471_v18  ;;  %v1473_v53 = vpop.permute.xlu1 %1472 }
 0x27e   :  { %1511 = vst.msk [vmem:[#allocation5 + $0x550] sm:$0xff] %vm658_vm4, %v1473_v53 }
 0x283   :  { %1895 = vmatmul.bf16.gmra.mxu2 %v3203_v15 }
 0x284   :  { %v1477_v57 = vpop.permute.xlu0 %1476 }
 0x285   :  { %v1479_v31 = vpop.permute.xlu1 %1478  ;;  %1513 = vst.msk [vmem:[#allocation5 + $0x560] sm:$0xff] %vm658_vm4, %v1477_v57 }
 0x286   :  { %1514 = vst.msk [vmem:[#allocation5 + $0x568] sm:$0xff] %vm658_vm4, %v1479_v31 }
 0x287   :  { %2976 = vmatmul.msk.bf16.gmra.mxu3 %vm280_vm1, %v3502_v40 }
 0x28c   :  { %v1483_v36 = vpop.permute.xlu0 %1482 }
 0x28d   :  { %1516 = vst.msk [vmem:[#allocation5 + $0x578] sm:$0xff] %vm658_vm4, %v1483_v36 }
 0x293   :  { %1900 = vmatmul.bf16.gmra.mxu2 %v3204_v38 }
 0x29a   :  { %v474_v29 = vpop.f32.mrf.mxu3 }
 0x29b   :  { %v475_v39 = vadd.f32 %v474_v29, %v4656_v14 }
 0x29d   :  { %517 = vst [vmem:[#allocation4 + $0x158] sm:$0xff] %v475_v39 }
 0x2a2   :  { %v476_v21 = vpop.f32.mrf.mxu3 }
 0x2a3   :  { %1905 = vmatmul.bf16.gmra.mxu2 %v3205_v26  ;;  %v477_v40 = vadd.f32 %v476_v21, %v4656_v14 }
 0x2a5   :  { %521 = vst [vmem:[#allocation4 + $0x100] sm:$0xff] %v477_v40 }
 0x2aa   :  { %v479_v50 = vpop.f32.mrf.mxu3 }
 0x2ab   :  { %v480_v19 = vadd.f32 %v479_v50, %v4656_v14 }
 0x2ad   :  { %525 = vst [vmem:[#allocation4 + $0x140] sm:$0xff] %v480_v19 }
 0x2b2   :  { %v481_v61 = vpop.f32.mrf.mxu3 }
 0x2b3   :  { %v482_v4 = vadd.f32 %v481_v61, %v4656_v14 }
 0x2b5   :  { %529 = vst [vmem:[#allocation4 + $0x178] sm:$0xff] %v482_v4 }
 0x2ba   :  { %v484_v46 = vpop.f32.mrf.mxu3 }
 0x2bb   :  { %v485_v34 = vadd.f32 %v484_v46, %v4656_v14 }
 0x2bd   :  { %533 = vst [vmem:[#allocation4 + $0x198] sm:$0xff] %v485_v34 }
 0x2c2   :  { %v486_v28 = vpop.f32.mrf.mxu3 }
 0x2c3   :  { %v487_v47 = vadd.f32 %v486_v28, %v4656_v14 }
 0x2c5   :  { %537 = vst [vmem:[#allocation4 + $0xe8] sm:$0xff] %v487_v47 }
 0x2ca   :  { %v489_v49 = vpop.f32.mrf.mxu3 }
 0x2cb   :  { %v490_v44 = vadd.f32 %v489_v49, %v4656_v14 }
 0x2cd   :  { %541 = vst [vmem:[#allocation4 + $0xa0] sm:$0xff] %v490_v44 }
 0x2d2   :  { %v491_v35 = vpop.f32.mrf.mxu3 }
 0x2d3   :  { %v492_v23 = vadd.f32 %v491_v35, %v4656_v14 }
 0x2d5   :  { %545 = vst [vmem:[#allocation4 + $0x1c0] sm:$0xff] %v492_v23 }
 0x2da   :  { %v494_v2 = vpop.f32.mrf.mxu3 }
 0x2db   :  { %v495_v17 = vadd.f32 %v494_v2, %v4656_v14 }
 0x2dd   :  { %549 = vst [vmem:[#allocation4 + $0x1e8] sm:$0xff] %v495_v17 }
 0x2e2   :  { %v496_v55 = vpop.f32.mrf.mxu3 }
 0x2e3   :  { %v497_v42 = vadd.f32 %v496_v55, %v4656_v14 }
 0x2e5   :  { %553 = vst [vmem:[#allocation4 + $0x98] sm:$0xff] %v497_v42 }
 0x2ea   :  { %v499_v20 = vpop.f32.mrf.mxu3 }
 0x2eb   :  { %v500_v22 = vadd.f32 %v499_v20, %v4656_v14 }
 0x2ed   :  { %557 = vst [vmem:[#allocation4 + $0x1c8] sm:$0xff] %v500_v22 }
 0x2f2   :  { %v501_v54 = vpop.f32.mrf.mxu3 }
 0x2f3   :  { %v502_v63 = vadd.f32 %v501_v54, %v4656_v14 }
 0x2f5   :  { %561 = vst [vmem:[#allocation4 + $0x160] sm:$0xff] %v502_v63 }
 0x2f6   :  { %v1891_v51 = vpop.f32.mrf.mxu2 }
 0x2f7   :  { %v1911_v52 = vmax.f32 %v1891_v51, 0.0 }
 0x2f9   :  { %1919 = vst.msk [vmem:[#allocation6] sm:$0xff] %vm658_vm4, %v1911_v52 }
 0x2fa   :  { %v504_v1 = vpop.f32.mrf.mxu3 }
 0x2fb   :  { %v505_v24 = vadd.f32 %v504_v1, %v4656_v14 }
 0x2fd   :  { %565 = vst [vmem:[#allocation4 + $0x68] sm:$0xff] %v505_v24 }
 0x2fe   :  { %v1893_v5 = vpop.f32.mrf.mxu2 }
 0x2ff   :  { %v1912_v58 = vmax.f32 %v1893_v5, 0.0 }
 0x301   :  { %1920 = vst.msk [vmem:[#allocation6 + $0x8] sm:$0xff] %vm658_vm4, %v1912_v58 }
 0x302   :  { %v506_v43 = vpop.f32.mrf.mxu3 }
 0x303   :  { %v507_v9 = vadd.f32 %v506_v43, %v4656_v14 }
 0x305   :  { %569 = vst [vmem:[#allocation4 + $0x190] sm:$0xff] %v507_v9 }
 0x306   :  { %v1896_v41 = vpop.f32.mrf.mxu2 }
 0x307   :  { %v1913_v60 = vmax.f32 %v1896_v41, 0.0 }
 0x309   :  { %1921 = vst.msk [vmem:[#allocation6 + $0x10] sm:$0xff] %vm658_vm4, %v1913_v60 }
 0x30a   :  { %v509_v32 = vpop.f32.mrf.mxu3 }
 0x30b   :  { %v510_v8 = vadd.f32 %v509_v32, %v4656_v14 }
 0x30d   :  { %573 = vst [vmem:[#allocation4 + $0x60] sm:$0xff] %v510_v8 }
 0x30e   :  { %v1898_v0 = vpop.f32.mrf.mxu2 }
 0x30f   :  { %v1914_v10 = vmax.f32 %v1898_v0, 0.0 }
 0x311   :  { %1922 = vst.msk [vmem:[#allocation6 + $0x18] sm:$0xff] %vm658_vm4, %v1914_v10 }
 0x312   :  { %v511_v25 = vpop.f32.mrf.mxu3 }
 0x313   :  { %v512_v6 = vadd.f32 %v511_v25, %v4656_v14 }
 0x315   :  { %577 = vst [vmem:[#allocation4 + $0x1e0] sm:$0xff] %v512_v6 }
 0x316   :  { %v1901_v3 = vpop.f32.mrf.mxu2 }
 0x317   :  { %v1915_v13 = vmax.f32 %v1901_v3, 0.0 }
 0x319   :  { %1923 = vst.msk [vmem:[#allocation6 + $0x20] sm:$0xff] %vm658_vm4, %v1915_v13 }
 0x31e   :  { %v1903_v11 = vpop.f32.mrf.mxu2 }
 0x31f   :  { %v1916_v30 = vmax.f32 %v1903_v11, 0.0 }
 0x321   :  { %1924 = vst.msk [vmem:[#allocation6 + $0x28] sm:$0xff] %vm658_vm4, %v1916_v30 }
 0x326   :  { %v1906_v16 = vpop.f32.mrf.mxu2 }
 0x327   :  { %v1917_v12 = vmax.f32 %v1906_v16, 0.0 }
 0x329   :  { %1925 = vst.msk [vmem:[#allocation6 + $0x30] sm:$0xff] %vm658_vm4, %v1917_v12 }
 0x32e   :  { %v1908_v59 = vpop.f32.mrf.mxu2 }
 0x32f   :  { %v1918_v48 = vmax.f32 %v1908_v59, 0.0 }
 0x331   :  { %1926 = vst.msk [vmem:[#allocation6 + $0x38] sm:$0xff] %vm658_vm4, %v1918_v48 }
 0x332 LB: > { %s3037_s1 = sshll.u32 %s3304_s2, 6  ;;  %s3206_s30 = sshll.u32 %s3304_s2, 4  ;;  %v3209_v52 = vld [vmem:[#allocation2] sm:$0xff]  ;;  %v3214_v55 = vld [vmem:[#allocation2 + $0x28] sm:$0xff]  ;;  %v3215_v5 = vld [vmem:[#allocation2 + $0x30] sm:$0xff]  ;;  %s3304_s2 = sphi %s4684_s2, %s1932_s2  }
 0x333   : > { %s1945_s15 = scalar_lea.vmem %s5013_s7, %s3206_s30  ;;  %s1950_s0 = scalar_lea.vmem %s5014_s8, %s3304_s2  ;;  %v3210_v42 = vld [vmem:[#allocation2 + $0x8] sm:$0xff]  ;;  %v3211_v58 = vld [vmem:[#allocation2 + $0x10] sm:$0xff]  ;;  %v3216_v20 = vld [vmem:[#allocation2 + $0x38] sm:$0xff] }
 0x334   : > { %v3208_v15 = vld [vmem:[%s1945_s15 + $0x8] sm:$0xff]  ;;  %v3207_v27 = vld [vmem:[%s1945_s15] sm:$0xff]  ;;  %s4698_s18 = scalar_lea.vmem [#allocation6], %s3037_s1  ;;  %v3212_v22 = vld [vmem:[#allocation2 + $0x18] sm:$0xff]  ;;  %s4721_s19 = sshll.u32 %s3304_s2, 7 }
 0x335   : > { %2007 = vmatpush.bf16.msra.mxu0 %v3208_v15  ;;  %v3282_v14 = vld [vmem:[%s1950_s0] ss:$0 sm:$0xff]  ;;  %s4724_s20 = scalar_lea.vmem [#allocation5], %s4721_s19  ;;  %s2268_s21 = sadd.s32 1, %s4721_s19 }
 0x336   : > { %v3213_v41 = vld [vmem:[#allocation2 + $0x20] sm:$0xff]  ;;  %v1955_v10 = vld [vmem:[%s4724_s20 + $0x8] sm:$0xff]  ;;  %v1956_v11 = vld [vmem:[%s4724_s20 + $0x10] sm:$0xff]  ;;  %s2270_s22 = sadd.s32 2, %s4721_s19  ;;  %s2267_s23 = sld [smem:[#allocation7 + %s4721_s19]] }
 0x337   : > { %v1954_v60 = vld [vmem:[%s4724_s20] sm:$0xff]  ;;  %v1957_v16 = vld [vmem:[%s4724_s20 + $0x18] sm:$0xff]  ;;  %s2272_s24 = sadd.s32 3, %s4721_s19  ;;  %s2269_s3 = sld [smem:[#allocation7 + %s2268_s21]] }
 0x338   : > { %v1935_v45 = vld [vmem:[%s4698_s18] sm:$0xff]  ;;  %v1936_v33 = vld [vmem:[%s4698_s18 + $0x8] sm:$0xff]  ;;  %v1937_v62 = vld [vmem:[%s4698_s18 + $0x10] sm:$0xff]  ;;  %s2274_s25 = sadd.s32 4, %s4721_s19  ;;  %s2271_s26 = sld [smem:[#allocation7 + %s2270_s22]] }
 0x339   : > { %v1970_v7 = vpack.c.bf16 %v1936_v33, %v1935_v45  ;;  %2008 = vmatpush.bf16.msra.mxu0 %v3207_v27  ;;  %v1938_v37 = vld [vmem:[%s4698_s18 + $0x18] sm:$0xff]  ;;  %v1939_v38 = vld [vmem:[%s4698_s18 + $0x20] sm:$0xff]  ;;  %v1940_v53 = vld [vmem:[%s4698_s18 + $0x28] sm:$0xff]  ;;  %s2276_s5 = sadd.s32 5, %s4721_s19  ;;  %s2273_s6 = sld [smem:[#allocation7 + %s2272_s24]] }
 0x33a   : > { %v1971_v18 = vpack.c.bf16 %v1938_v37, %v1937_v62  ;;  %v1972_v26 = vpack.c.bf16 %v1940_v53, %v1939_v38  ;;  %v1941_v56 = vld [vmem:[%s4698_s18 + $0x30] sm:$0xff]  ;;  %v1942_v31 = vld [vmem:[%s4698_s18 + $0x38] sm:$0xff]  ;;  %v1966_v37 = vld [vmem:[%s4724_s20 + $0x60] sm:$0xff]  ;;  %s2278_s27 = sadd.s32 6, %s4721_s19  ;;  %s2275_s12 = sld [smem:[#allocation7 + %s2274_s25]] }
 0x33b   : > { %v1973_v57 = vpack.c.bf16 %v1942_v31, %v1941_v56  ;;  %v1968_v33 = vld [vmem:[%s4724_s20 + $0x70] sm:$0xff]  ;;  %v1969_v38 = vld [vmem:[%s4724_s20 + $0x78] sm:$0xff]  ;;  %s2280_s28 = sadd.s32 7, %s4721_s19  ;;  %s2277_s11 = sld [smem:[#allocation7 + %s2276_s5]] }
 0x33c   : > { %3049 = vmatmul.msk.bf16.vlgmr.msra.gmra.mxu0 %vm658_vm4, %v1970_v7  ;;  %s2282_s29 = sadd.s32 8, %s4721_s19  ;;  %s2279_s1 = sld [smem:[#allocation7 + %s2278_s27]] }
 0x33d   : > { %s2284_s30 = sadd.s32 9, %s4721_s19  ;;  %s4771_s14 = sld [smem:[#allocation7 + %s2280_s28]] }
 0x33e   : > { %s2286_s4 = sadd.s32 10, %s4721_s19  ;;  %s4774_s15 = sld [smem:[#allocation7 + %s2282_s29]] }
 0x33f   : > { %s2288_s16 = sadd.s32 11, %s4721_s19  ;;  %s4777_s17 = sld [smem:[#allocation7 + %s2284_s30]] }
 0x340   : > { %s4779_s0 = sld [smem:[#allocation7 + %s2286_s4]]  ;;  %s1932_s2 = sadd.s32 1, %s3304_s2  }
 0x341   : > { %p1929_p0 = scmp.ge.s32.totalorder %s1932_s2, 11  }
 0x34c   : > { %3050 = vmatmul.msk.bf16.gmra.mxu0 %vm658_vm4, %v1971_v18  ;;  %v1967_v18 = vld [vmem:[%s4724_s20 + $0x68] sm:$0xff] }
 0x35c   : > { %3051 = vmatmul.msk.bf16.gmra.mxu0 %vm658_vm4, %v1972_v26  ;;  %v1964_v26 = vld [vmem:[%s4724_s20 + $0x50] sm:$0xff] }
 0x36c   : > { %3052 = vmatmul.msk.bf16.gmra.mxu0 %vm658_vm4, %v1973_v57 }
 0x3b9   : > { %v2010_v29 = vpop.f32.mrf.mxu0 }
 0x3ba   : > { %v2011_v39 = vadd.f32 %v3282_v14, %v2010_v29  ;;  %v1965_v29 = vld [vmem:[%s4724_s20 + $0x58] sm:$0xff] }
 0x3c1   : > { %v2012_v21 = vpop.f32.mrf.mxu0 }
 0x3c2   : > { %v2013_v40 = vadd.f32 %v3282_v14, %v2012_v21 }
 0x3c4   : > { %v2046_v36 = vpack.c.bf16 %v2013_v40, %v2011_v39 }
 0x3c9   : > { %v2015_v50 = vpop.f32.mrf.mxu0 }
 0x3ca   : > { %v2016_v17 = vadd.f32 %v3282_v14, %v2015_v50 }
 0x3d1   : > { %v2017_v19 = vpop.f32.mrf.mxu0 }
 0x3d2   : > { %v2018_v23 = vadd.f32 %v3282_v14, %v2017_v19 }
 0x3d4   : > { %v2047_v51 = vpack.c.bf16 %v2018_v23, %v2016_v17  ;;  %v1963_v23 = vld [vmem:[%s4724_s20 + $0x48] sm:$0xff]  ;;  %v1960_v17 = vld [vmem:[%s4724_s20 + $0x30] sm:$0xff] }
 0x3d9   : > { %v2020_v61 = vpop.f32.mrf.mxu0 }
 0x3da   : > { %v2021_v35 = vadd.f32 %v3282_v14, %v2020_v61 }
 0x3e1   : > { %v2022_v4 = vpop.f32.mrf.mxu0 }
 0x3e2   : > { %v2023_v49 = vadd.f32 %v3282_v14, %v2022_v4 }
 0x3e4   : > { %v2048_v2 = vpack.c.bf16 %v2023_v49, %v2021_v35  ;;  %v1961_v35 = vld [vmem:[%s4724_s20 + $0x38] sm:$0xff] }
 0x3e9   : > { %v2025_v46 = vpop.f32.mrf.mxu0 }
 0x3ea   : > { %v2026_v28 = vadd.f32 %v3282_v14, %v2025_v46 }
 0x3f1   : > { %v2027_v34 = vpop.f32.mrf.mxu0 }
 0x3f2   : > { %v2028_v47 = vadd.f32 %v3282_v14, %v2027_v34 }
 0x3f4   : > { %v2049_v44 = vpack.c.bf16 %v2028_v47, %v2026_v28 }
 0x3f6   : > { %2118 = vmatpush.bf16.msra.mxu1 %v2049_v44  ;;  %3251 = vmatpush.bf16.msra.mxu3 %v2049_v44  ;;  %v1962_v44 = vld [vmem:[%s4724_s20 + $0x40] sm:$0xff] }
 0x3fa   : > { %2119 = vmatpush.bf16.msra.mxu1 %v2048_v2  ;;  %3252 = vmatpush.bf16.msra.mxu3 %v2048_v2 }
 0x3fe   : > { %2120 = vmatpush.bf16.msra.mxu1 %v2047_v51  ;;  %3253 = vmatpush.bf16.msra.mxu3 %v2047_v51 }
 0x402   : > { %2121 = vmatpush.bf16.msra.mxu1 %v2046_v36  ;;  %3254 = vmatpush.bf16.msra.mxu3 %v2046_v36 }
 0x405   : > { %3085 = vmatmul.msk.bf16.vlgmr.msra.gmra.mxu1 %vm1752_vm6, %v3209_v52  ;;  %3090 = vmatmul.msk.bf16.vlgmr.msra.gmra.mxu3 %vm1752_vm6, %v3214_v55 }
 0x415   : > { %3086 = vmatmul.msk.bf16.gmra.mxu1 %vm1752_vm6, %v3210_v42  ;;  %3091 = vmatmul.msk.bf16.gmra.mxu3 %vm1752_vm6, %v3215_v5  ;;  %v1959_v42 = vld [vmem:[%s4724_s20 + $0x28] sm:$0xff] }
 0x425   : > { %3087 = vmatmul.msk.bf16.gmra.mxu1 %vm1752_vm6, %v3211_v58  ;;  %3092 = vmatmul.msk.bf16.gmra.mxu3 %vm1752_vm6, %v3216_v20 }
 0x435   : > { %3088 = vmatmul.msk.bf16.gmra.mxu1 %vm1752_vm6, %v3212_v22  ;;  %v1958_v22 = vld [vmem:[%s4724_s20 + $0x20] sm:$0xff]  ;;  %s4781_s20 = sld [smem:[#allocation7 + %s2288_s16]] }
 0x445   : > { %3089 = vmatmul.msk.bf16.gmra.mxu1 %vm1752_vm6, %v3213_v41 }
 0x482   : > { %v2123_v54 = vpop.f32.mrf.mxu1 }
 0x483   : > { %v2124_v63 = vadd.f32 %v2123_v54, %v1954_v60 }
 0x485   : > { %v2163_v3 = vmax.f32 %v2124_v63, 0.0 }
 0x488   : > { %v2148_v0 = vpop.f32.mrf.mxu3 }
 0x489   : > { %v2149_v40 = vadd.f32 %v2148_v0, %v1964_v26 }
 0x48a   : > { %v2125_v1 = vpop.f32.mrf.mxu1 }
 0x48b   : > { %v2126_v24 = vadd.f32 %v2125_v1, %v1955_v10  ;;  %v2173_v4 = vmax.f32 %v2149_v40, 0.0 }
 0x48d   : > { %v2164_v13 = vmax.f32 %v2126_v24, 0.0 }
 0x48f   : > { %v4728_v43 = vpack.c.bf16 %v2164_v13, %v2163_v3  ;;  %v3217_v13 = vld [vmem:[#allocation3 + $0x10] sm:$0xff] }
 0x490   : > { %v2150_v9 = vpop.f32.mrf.mxu3 }
 0x491   : > { %v2151_v36 = vadd.f32 %v2150_v9, %v1965_v29  ;;  %v3218_v9 = vld [vmem:[#allocation3] sm:$0xff]  ;;  %v4789_v29 = vstv %s2277_s11 }
 0x492   : > { %v2128_v30 = vpop.f32.mrf.mxu1 }
 0x493   : > { %v2129_v32 = vadd.f32 %v2128_v30, %v1956_v11  ;;  %v2174_v46 = vmax.f32 %v2151_v36, 0.0  ;;  %v3219_v11 = vld [vmem:[#allocation3 + $0x18] sm:$0xff]  ;;  %v3220_v30 = vld [vmem:[#allocation3 + $0x8] sm:$0xff]  ;;  %v4791_v36 = vstv %s2279_s1 }
 0x495   : > { %v2165_v6 = vmax.f32 %v2129_v32, 0.0  ;;  %v2192_v47 = vpack.c.bf16 %v2174_v46, %v2173_v4 }
 0x498   : > { %v2153_v8 = vpop.f32.mrf.mxu3 }
 0x499   : > { %v2154_v56 = vadd.f32 %v2153_v8, %v1966_v37 }
 0x49a   : > { %v2130_v12 = vpop.f32.mrf.mxu1 }
 0x49b   : > { %v2131_v25 = vadd.f32 %v2130_v12, %v1957_v16  ;;  %v2175_v50 = vmax.f32 %v2154_v56, 0.0 }
 0x49d   : > { %v2166_v59 = vmax.f32 %v2131_v25, 0.0 }
 0x49f   : > { %v2188_v48 = vpack.c.bf16 %v2166_v59, %v2165_v6 }
 0x4a0   : > { %v2155_v15 = vpop.f32.mrf.mxu3 }
 0x4a1   : > { %v2156_v31 = vadd.f32 %v2155_v15, %v1967_v18  ;;  %v2298_v18 = vstv %s2267_s23 }
 0x4a2   : > { %v2133_v27 = vpop.f32.mrf.mxu1 }
 0x4a3   : > { %v2176_v19 = vmax.f32 %v2156_v31, 0.0  ;;  %v2134_v63 = vadd.f32 %v2133_v27, %v1958_v22  ;;  %v4783_v31 = vstv %s2271_s26 }
 0x4a5   : > { %v2193_v34 = vpack.c.bf16 %v2176_v19, %v2175_v50  ;;  %v2167_v24 = vmax.f32 %v2134_v63, 0.0  ;;  %v4794_v63 = vstv %s4771_s14 }
 0x4a8   : > { %v2158_v45 = vpop.f32.mrf.mxu3 }
 0x4a9   : > { %v2159_v62 = vadd.f32 %v2158_v45, %v1968_v33 }
 0x4aa   : > { %v2135_v7 = vpop.f32.mrf.mxu1 }
 0x4ab   : > { %v2177_v57 = vmax.f32 %v2159_v62, 0.0  ;;  %v2136_v41 = vadd.f32 %v2135_v7, %v1959_v42 }
 0x4ad   : > { %v2168_v10 = vmax.f32 %v2136_v41, 0.0 }
 0x4af   : > { %v2189_v3 = vpack.c.bf16 %v2168_v10, %v2167_v24  ;;  %v4800_v10 = vstv %s4777_s17 }
 0x4b0   : > { %v2160_v53 = vpop.f32.mrf.mxu3 }
 0x4b1   : > { %v2161_v14 = vadd.f32 %v2160_v53, %v1969_v38  ;;  %v2316_v38 = vstv %s2269_s3 }
 0x4b2   : > { %v2138_v39 = vpop.f32.mrf.mxu1 }
 0x4b3   : > { %v2178_v21 = vmax.f32 %v2161_v14, 0.0  ;;  %v2139_v5 = vadd.f32 %v2138_v39, %v1960_v17  ;;  %v4787_v14 = vstv %s2275_s12 }
 0x4b5   : > { %v2194_v61 = vpack.c.bf16 %v2178_v21, %v2177_v57  ;;  %v2169_v0 = vmax.f32 %v2139_v5, 0.0  ;;  %v4785_v57 = vstv %s2273_s6 }
 0x4b7   : > { %2219 = vmatpush.bf16.msra.mxu2 %v2194_v61 }
 0x4ba   : > { %v2140_v28 = vpop.f32.mrf.mxu1 }
 0x4bb   : > { %2220 = vmatpush.bf16.msra.mxu2 %v2193_v34  ;;  %v2141_v52 = vadd.f32 %v2140_v28, %v1961_v35 }
 0x4bd   : > { %v2170_v60 = vmax.f32 %v2141_v52, 0.0 }
 0x4bf   : > { %2221 = vmatpush.bf16.msra.mxu2 %v2192_v47  ;;  %v2190_v1 = vpack.c.bf16 %v2170_v60, %v2169_v0  ;;  %v4797_v0 = vstv %s4774_s15 }
 0x4c2   : > { %v2143_v49 = vpop.f32.mrf.mxu1 }
 0x4c3   : > { %v2144_v2 = vadd.f32 %v2143_v49, %v1962_v44 }
 0x4c5   : > { %v2171_v58 = vmax.f32 %v2144_v2, 0.0 }
 0x4ca   : > { %v2145_v51 = vpop.f32.mrf.mxu1 }
 0x4cb   : > { %v2146_v55 = vadd.f32 %v2145_v51, %v1963_v23 }
 0x4cd   : > { %v2172_v20 = vmax.f32 %v2146_v55, 0.0 }
 0x4cf   : > { %v2191_v54 = vpack.c.bf16 %v2172_v20, %v2171_v58 }
 0x4d1   : > { %2222 = vmatpush.bf16.msra.mxu2 %v2191_v54 }
 0x4d5   : > { %2223 = vmatpush.bf16.msra.mxu2 %v2190_v1 }
 0x4d9   : > { %2224 = vmatpush.bf16.msra.mxu2 %v2189_v3 }
 0x4dd   : > { %2225 = vmatpush.bf16.msra.mxu2 %v2188_v48 }
 0x4e1   : > { %2226 = vmatpush.bf16.msra.mxu2 %v4728_v43 }
 0x4e4   : > { %2227 = vmatmul.bf16.vlgmr.msra.gmra.mxu2 %v3217_v13 }
 0x4f4   : > { %2232 = vmatmul.bf16.gmra.mxu2 %v3218_v9  ;;  %v4803_v9 = vstv %s4779_s0 }
 0x504   : > { %2237 = vmatmul.bf16.gmra.mxu2 %v3219_v11  ;;  %v4806_v11 = vstv %s4781_s20 }
 0x514   : > { %2242 = vmatmul.bf16.gmra.mxu2 %v3220_v30 }
 0x567   : > { %v2228_v32 = vpop.f32.mrf.mxu2 }
 0x568   : > { %v2248_v8 = vmax.f32 %v2228_v32, 0.0 }
 0x56a   : > { %3110 = vst.msk [vmem:[%s4698_s18 + $0x40] sm:$0xff] %vm658_vm4, %v2248_v8 }
 0x56f   : > { %v2230_v16 = vpop.f32.mrf.mxu2 }
 0x570   : > { %v2249_v12 = vmax.f32 %v2230_v16, 0.0 }
 0x572   : > { %3111 = vst.msk [vmem:[%s4698_s18 + $0x48] sm:$0xff] %vm658_vm4, %v2249_v12 }
 0x577   : > { %v2233_v43 = vpop.f32.mrf.mxu2 }
 0x578   : > { %v2250_v25 = vmax.f32 %v2233_v43, 0.0 }
 0x57a   : > { %3112 = vst.msk [vmem:[%s4698_s18 + $0x50] sm:$0xff] %vm658_vm4, %v2250_v25 }
 0x57f   : > { %v2235_v6 = vpop.f32.mrf.mxu2 }
 0x580   : > { %v2251_v59 = vmax.f32 %v2235_v6, 0.0 }
 0x582   : > { %3113 = vst.msk [vmem:[%s4698_s18 + $0x58] sm:$0xff] %vm658_vm4, %v2251_v59 }
 0x587   : > { %v2238_v48 = vpop.f32.mrf.mxu2 }
 0x588   : > { %v2252_v15 = vmax.f32 %v2238_v48, 0.0 }
 0x58a   : > { %3114 = vst.msk [vmem:[%s4698_s18 + $0x60] sm:$0xff] %vm658_vm4, %v2252_v15 }
 0x58f   : > { %v2240_v27 = vpop.f32.mrf.mxu2 }
 0x590   : > { %v2253_v45 = vmax.f32 %v2240_v27, 0.0 }
 0x592   : > { %3115 = vst.msk [vmem:[%s4698_s18 + $0x68] sm:$0xff] %vm658_vm4, %v2253_v45 }
 0x597   : > { %v2243_v33 = vpop.f32.mrf.mxu2 }
 0x598   : > { %v2254_v7 = vmax.f32 %v2243_v33, 0.0 }
 0x59a   : > { %3116 = vst.msk [vmem:[%s4698_s18 + $0x70] sm:$0xff] %vm658_vm4, %v2254_v7 }
 0x59f   : > { %v2245_v62 = vpop.f32.mrf.mxu2 }
 0x5a0   : > { %v2255_v37 = vmax.f32 %v2245_v62, 0.0 }
 0x5a2   : > { %3117 = vst.msk [vmem:[%s4698_s18 + $0x78] sm:$0xff] %vm658_vm4, %v2255_v37 }
 0x5a9   : > { %v2290_v53 = vld [vmem:[#allocation6] sm:$0xff]  ;;  %v2291_v26 = vld [vmem:[#allocation6 + $0x8] sm:$0xff]  ;;  %v2292_v56 = vld [vmem:[#allocation6 + $0x10] sm:$0xff] }
 0x5aa   : > { %v2293_v39 = vld [vmem:[#allocation6 + $0x18] sm:$0xff]  ;;  %v2294_v21 = vld [vmem:[#allocation6 + $0x20] sm:$0xff]  ;;  %v2295_v40 = vld [vmem:[#allocation6 + $0x28] sm:$0xff]  ;;  %v2299_v61 = vmul.f32 %v2298_v18, %v2290_v53  ;;  %v2300_v4 = vmul.f32 %v2298_v18, %v2291_v26  ;;  %v2301_v46 = vmul.f32 %v2298_v18, %v2292_v56 }
 0x5ab   : > { %v2296_v50 = vld [vmem:[#allocation6 + $0x30] sm:$0xff]  ;;  %v2297_v19 = vld [vmem:[#allocation6 + $0x38] sm:$0xff]  ;;  %v2308_v34 = vld [vmem:[#allocation6 + $0x40] sm:$0xff]  ;;  %v2302_v28 = vmul.f32 %v2298_v18, %v2293_v39  ;;  %v2303_v47 = vmul.f32 %v2298_v18, %v2294_v21  ;;  %v2304_v49 = vmul.f32 %v2298_v18, %v2295_v40 }
 0x5ac   : > { %v2309_v44 = vld [vmem:[#allocation6 + $0x48] sm:$0xff]  ;;  %v2310_v35 = vld [vmem:[#allocation6 + $0x50] sm:$0xff]  ;;  %v2311_v23 = vld [vmem:[#allocation6 + $0x58] sm:$0xff]  ;;  %v2317_v2 = vmul.f32 %v2316_v38, %v2308_v34  ;;  %v2305_v17 = vmul.f32 %v2298_v18, %v2296_v50  ;;  %v2306_v20 = vmul.f32 %v2298_v18, %v2297_v19 }
 0x5ad   : > { %v2312_v51 = vld [vmem:[#allocation6 + $0x60] sm:$0xff]  ;;  %v2313_v52 = vld [vmem:[#allocation6 + $0x68] sm:$0xff]  ;;  %v2314_v55 = vld [vmem:[#allocation6 + $0x70] sm:$0xff]  ;;  %v2318_v42 = vmul.f32 %v2316_v38, %v2309_v44  ;;  %v2319_v5 = vmul.f32 %v2316_v38, %v2310_v35  ;;  %v2320_v58 = vmul.f32 %v2316_v38, %v2311_v23 }
 0x5ae   : > { %v2315_v22 = vld [vmem:[#allocation6 + $0x78] sm:$0xff]  ;;  %v2321_v41 = vmul.f32 %v2316_v38, %v2312_v51  ;;  %v2322_v60 = vmul.f32 %v2316_v38, %v2313_v52  ;;  %v2323_v54 = vmul.f32 %v2316_v38, %v2314_v55  ;;  %v2334_v24 = vld [vmem:[#allocation6 + $0x80] sm:$0xff]  ;;  %v2335_v3 = vld [vmem:[#allocation6 + $0x88] sm:$0xff]  ;;  %v2325_v30 = vadd.f32 %v2317_v2, %v2299_v61 }
 0x5af   : > { %v2324_v1 = vmul.f32 %v2316_v38, %v2315_v22  ;;  %v2336_v13 = vld [vmem:[#allocation6 + $0x90] sm:$0xff]  ;;  %v2326_v32 = vadd.f32 %v2318_v42, %v2300_v4  ;;  %v2337_v8 = vld [vmem:[#allocation6 + $0x98] sm:$0xff]  ;;  %v2338_v16 = vld [vmem:[#allocation6 + $0xa0] sm:$0xff]  ;;  %v2327_v43 = vadd.f32 %v2319_v5, %v2301_v46  ;;  %v2328_v25 = vadd.f32 %v2320_v58, %v2302_v28 }
 0x5b0   : > { %v2339_v12 = vld [vmem:[#allocation6 + $0xa8] sm:$0xff]  ;;  %v2329_v6 = vadd.f32 %v2321_v41, %v2303_v47  ;;  %v2330_v59 = vadd.f32 %v2322_v60, %v2304_v49  ;;  %v2340_v48 = vld [vmem:[#allocation6 + $0xb0] sm:$0xff]  ;;  %v2341_v15 = vld [vmem:[#allocation6 + $0xb8] sm:$0xff]  ;;  %v2331_v27 = vadd.f32 %v2323_v54, %v2305_v17  ;;  %v2343_v33 = vmul.f32 %v4783_v31, %v2334_v24 }
 0x5b1   : > { %v2332_v45 = vadd.f32 %v2324_v1, %v2306_v20  ;;  %v2344_v7 = vmul.f32 %v4783_v31, %v2335_v3  ;;  %v2360_v62 = vld [vmem:[#allocation6 + $0xc0] sm:$0xff]  ;;  %v2361_v37 = vld [vmem:[#allocation6 + $0xc8] sm:$0xff]  ;;  %v2362_v18 = vld [vmem:[#allocation6 + $0xd0] sm:$0xff]  ;;  %v2345_v38 = vmul.f32 %v4783_v31, %v2336_v13  ;;  %v2346_v53 = vmul.f32 %v4783_v31, %v2337_v8 }
 0x5b2   : > { %v2347_v26 = vmul.f32 %v4783_v31, %v2338_v16  ;;  %v2348_v56 = vmul.f32 %v4783_v31, %v2339_v12  ;;  %v2363_v39 = vld [vmem:[#allocation6 + $0xd8] sm:$0xff]  ;;  %v2364_v21 = vld [vmem:[#allocation6 + $0xe0] sm:$0xff]  ;;  %v2365_v40 = vld [vmem:[#allocation6 + $0xe8] sm:$0xff]  ;;  %v2349_v50 = vmul.f32 %v4783_v31, %v2340_v48  ;;  %v2350_v19 = vmul.f32 %v4783_v31, %v2341_v15 }
 0x5b3   : > { %v2351_v61 = vadd.f32 %v2343_v33, %v2325_v30  ;;  %v2352_v4 = vadd.f32 %v2344_v7, %v2326_v32  ;;  %v2366_v46 = vld [vmem:[#allocation6 + $0xf0] sm:$0xff]  ;;  %v2367_v34 = vld [vmem:[#allocation6 + $0xf8] sm:$0xff]  ;;  %v2386_v28 = vld [vmem:[#allocation6 + $0x100] sm:$0xff]  ;;  %v2353_v47 = vadd.f32 %v2345_v38, %v2327_v43  ;;  %v2354_v49 = vadd.f32 %v2346_v53, %v2328_v25 }
 0x5b4   : > { %v2355_v44 = vadd.f32 %v2347_v26, %v2329_v6  ;;  %v4816_v35 = vadd.f32 %v2348_v56, %v2330_v59  ;;  %v2387_v23 = vld [vmem:[#allocation6 + $0x108] sm:$0xff]  ;;  %v2388_v2 = vld [vmem:[#allocation6 + $0x110] sm:$0xff]  ;;  %v2389_v17 = vld [vmem:[#allocation6 + $0x118] sm:$0xff]  ;;  %v4818_v51 = vadd.f32 %v2349_v50, %v2331_v27  ;;  %v4820_v52 = vadd.f32 %v2350_v19, %v2332_v45 }
 0x5b5   : > { %v2369_v55 = vmul.f32 %v4785_v57, %v2360_v62  ;;  %v2370_v31 = vmul.f32 %v4785_v57, %v2361_v37  ;;  %v2390_v42 = vld [vmem:[#allocation6 + $0x120] sm:$0xff]  ;;  %v2391_v5 = vld [vmem:[#allocation6 + $0x128] sm:$0xff]  ;;  %v2392_v58 = vld [vmem:[#allocation6 + $0x130] sm:$0xff]  ;;  %v2371_v20 = vmul.f32 %v4785_v57, %v2362_v18  ;;  %v2372_v22 = vmul.f32 %v4785_v57, %v2363_v39 }
 0x5b6   : > { %v2373_v41 = vmul.f32 %v4785_v57, %v2364_v21  ;;  %v4828_v60 = vmul.f32 %v4785_v57, %v2365_v40  ;;  %v2393_v54 = vld [vmem:[#allocation6 + $0x138] sm:$0xff]  ;;  %v2404_v1 = vld [vmem:[#allocation6 + $0x140] sm:$0xff]  ;;  %v2405_v24 = vld [vmem:[#allocation6 + $0x148] sm:$0xff]  ;;  %v4831_v3 = vmul.f32 %v4785_v57, %v2366_v46  ;;  %v4834_v13 = vmul.f32 %v4785_v57, %v2367_v34 }
 0x5b7   : > { %v4836_v30 = vadd.f32 %v2369_v55, %v2351_v61  ;;  %v4838_v32 = vadd.f32 %v2370_v31, %v2352_v4  ;;  %v2406_v8 = vld [vmem:[#allocation6 + $0x150] sm:$0xff]  ;;  %v2407_v16 = vld [vmem:[#allocation6 + $0x158] sm:$0xff]  ;;  %v2408_v12 = vld [vmem:[#allocation6 + $0x160] sm:$0xff]  ;;  %v2395_v43 = vmul.f32 %v4787_v14, %v2386_v28  ;;  %v2396_v25 = vmul.f32 %v4787_v14, %v2387_v23 }
 0x5b8   : > { %v2397_v6 = vmul.f32 %v4787_v14, %v2388_v2  ;;  %v2398_v59 = vmul.f32 %v4787_v14, %v2389_v17  ;;  %v2409_v48 = vld [vmem:[#allocation6 + $0x168] sm:$0xff]  ;;  %v2410_v15 = vld [vmem:[#allocation6 + $0x170] sm:$0xff]  ;;  %v2411_v27 = vld [vmem:[#allocation6 + $0x178] sm:$0xff]  ;;  %v2399_v57 = vmul.f32 %v4787_v14, %v2390_v42  ;;  %v2400_v45 = vmul.f32 %v4787_v14, %v2391_v5 }
 0x5b9   : > { %v2401_v33 = vmul.f32 %v4787_v14, %v2392_v58  ;;  %v2402_v7 = vmul.f32 %v4787_v14, %v2393_v54  ;;  %v2413_v62 = vmul.f32 %v4789_v29, %v2404_v1  ;;  %v2414_v37 = vmul.f32 %v4789_v29, %v2405_v24  ;;  %v2430_v21 = vld [vmem:[#allocation6 + $0x180] sm:$0xff]  ;;  %v2431_v40 = vld [vmem:[#allocation6 + $0x188] sm:$0xff]  ;;  %v2432_v50 = vld [vmem:[#allocation6 + $0x190] sm:$0xff] }
 0x5ba   : > { %v2415_v18 = vmul.f32 %v4789_v29, %v2406_v8  ;;  %v2416_v38 = vmul.f32 %v4789_v29, %v2407_v16  ;;  %v2417_v53 = vmul.f32 %v4789_v29, %v2408_v12  ;;  %v2418_v26 = vmul.f32 %v4789_v29, %v2409_v48  ;;  %v2433_v46 = vld [vmem:[#allocation6 + $0x198] sm:$0xff]  ;;  %v2434_v34 = vld [vmem:[#allocation6 + $0x1a0] sm:$0xff]  ;;  %v2435_v55 = vld [vmem:[#allocation6 + $0x1a8] sm:$0xff] }
 0x5bb   : > { %v2419_v56 = vmul.f32 %v4789_v29, %v2410_v15  ;;  %v2420_v39 = vmul.f32 %v4789_v29, %v2411_v27  ;;  %v4856_v14 = vadd.f32 %v2371_v20, %v2353_v47  ;;  %v2421_v19 = vadd.f32 %v2413_v62, %v2395_v43  ;;  %v2436_v42 = vld [vmem:[#allocation6 + $0x1b0] sm:$0xff]  ;;  %v2437_v29 = vld [vmem:[#allocation6 + $0x1b8] sm:$0xff]  ;;  %v2461_v27 = vld [vmem:[#allocation6 + $0x1e8] sm:$0xff] }
 0x5bc   : > { %v2422_v61 = vadd.f32 %v2414_v37, %v2396_v25  ;;  %v2423_v4 = vadd.f32 %v2415_v18, %v2397_v6  ;;  %v4858_v28 = vadd.f32 %v2372_v22, %v2354_v49  ;;  %v4860_v23 = vadd.f32 %v2373_v41, %v2355_v44  ;;  %v2456_v44 = vld [vmem:[#allocation6 + $0x1c0] sm:$0xff]  ;;  %v2457_v22 = vld [vmem:[#allocation6 + $0x1c8] sm:$0xff]  ;;  %v2458_v41 = vld [vmem:[#allocation6 + $0x1d0] sm:$0xff] }
 0x5bd   : > { %v2424_v2 = vadd.f32 %v2416_v38, %v2398_v59  ;;  %v2425_v17 = vadd.f32 %v2417_v53, %v2399_v57  ;;  %v2426_v31 = vadd.f32 %v2418_v26, %v2400_v45  ;;  %v2439_v5 = vmul.f32 %v4791_v36, %v2430_v21  ;;  %v2459_v43 = vld [vmem:[#allocation6 + $0x1d8] sm:$0xff]  ;;  %v2460_v25 = vld [vmem:[#allocation6 + $0x1e0] sm:$0xff]  ;;  %v2462_v45 = vld [vmem:[#allocation6 + $0x1f0] sm:$0xff] }
 0x5be   : > { %v2440_v47 = vmul.f32 %v4791_v36, %v2431_v40  ;;  %v2441_v58 = vmul.f32 %v4791_v36, %v2432_v50  ;;  %v2427_v20 = vadd.f32 %v2419_v56, %v2401_v33  ;;  %v2428_v54 = vadd.f32 %v2420_v39, %v2402_v7  ;;  %v2463_v33 = vld [vmem:[#allocation6 + $0x1f8] sm:$0xff]  ;;  %v2490_v40 = vld [vmem:[#allocation6 + $0x200] sm:$0xff]  ;;  %v2491_v50 = vld [vmem:[#allocation6 + $0x208] sm:$0xff] }
 0x5bf   : > { %v2442_v1 = vmul.f32 %v4791_v36, %v2433_v46  ;;  %v2443_v49 = vmul.f32 %v4791_v36, %v2434_v34  ;;  %v2444_v24 = vmul.f32 %v4791_v36, %v2435_v55  ;;  %v2447_v8 = vadd.f32 %v2439_v5, %v2421_v19  ;;  %v2492_v34 = vld [vmem:[#allocation6 + $0x210] sm:$0xff]  ;;  %v2495_v5 = vld [vmem:[#allocation6 + $0x228] sm:$0xff] }
 0x5c0   : > { %v2448_v16 = vadd.f32 %v2440_v47, %v2422_v61  ;;  %v2449_v12 = vadd.f32 %v2441_v58, %v2423_v4  ;;  %v2445_v6 = vmul.f32 %v4791_v36, %v2436_v42  ;;  %v2446_v59 = vmul.f32 %v4791_v36, %v2437_v29  ;;  %v2496_v47 = vld [vmem:[#allocation6 + $0x230] sm:$0xff] }
 0x5c1   : > { %v2450_v48 = vadd.f32 %v2442_v1, %v2424_v2  ;;  %v2451_v15 = vadd.f32 %v2443_v49, %v2425_v17  ;;  %v2452_v57 = vadd.f32 %v2444_v24, %v2426_v31  ;;  %v2465_v7 = vmul.f32 %v4794_v63, %v2456_v44  ;;  %v2493_v2 = vld [vmem:[#allocation6 + $0x218] sm:$0xff]  ;;  %v2494_v17 = vld [vmem:[#allocation6 + $0x220] sm:$0xff] }
 0x5c2   : > { %v2466_v62 = vmul.f32 %v4794_v63, %v2457_v22  ;;  %v2467_v37 = vmul.f32 %v4794_v63, %v2458_v41  ;;  %v2453_v18 = vadd.f32 %v2445_v6, %v2427_v20  ;;  %v2454_v38 = vadd.f32 %v2446_v59, %v2428_v54  ;;  %v2509_v54 = vld [vmem:[#allocation6 + $0x248] sm:$0xff]  ;;  %v2512_v44 = vld [vmem:[#allocation6 + $0x260] sm:$0xff]  ;;  %v2514_v41 = vld [vmem:[#allocation6 + $0x270] sm:$0xff] }
 0x5c3   : > { %v2468_v53 = vmul.f32 %v4794_v63, %v2459_v43  ;;  %v2469_v26 = vmul.f32 %v4794_v63, %v2460_v25  ;;  %v2470_v36 = vmul.f32 %v4794_v63, %v2461_v27  ;;  %v2473_v56 = vadd.f32 %v2465_v7, %v2447_v8  ;;  %v2513_v22 = vld [vmem:[#allocation6 + $0x268] sm:$0xff]  ;;  %v2534_v27 = vld [vmem:[#allocation6 + $0x280] sm:$0xff] }
 0x5c4   : > { %v2474_v39 = vadd.f32 %v2466_v62, %v2448_v16  ;;  %v2475_v21 = vadd.f32 %v2467_v37, %v2449_v12  ;;  %v2382_v19 = vadd.f32 %v4828_v60, %v4816_v35  ;;  %v2471_v61 = vmul.f32 %v4794_v63, %v2462_v45  ;;  %v2508_v35 = vld [vmem:[#allocation6 + $0x240] sm:$0xff]  ;;  %v2515_v16 = vld [vmem:[#allocation6 + $0x278] sm:$0xff]  ;;  %v2536_v45 = vld [vmem:[#allocation6 + $0x290] sm:$0xff] }
 0x5c5   : > { %v2472_v4 = vmul.f32 %v4794_v63, %v2463_v33  ;;  %v2476_v46 = vadd.f32 %v2468_v53, %v2450_v48  ;;  %v2383_v55 = vadd.f32 %v4831_v3, %v4818_v51  ;;  %v4884_v31 = vadd.f32 %v4834_v13, %v4820_v52  ;;  %v2510_v51 = vld [vmem:[#allocation6 + $0x250] sm:$0xff]  ;;  %v2511_v3 = vld [vmem:[#allocation6 + $0x258] sm:$0xff] }
 0x5c6   : > { %v2477_v42 = vadd.f32 %v2469_v26, %v2451_v15  ;;  %v2478_v29 = vadd.f32 %v2470_v36, %v2452_v57  ;;  %v2479_v60 = vadd.f32 %v2471_v61, %v2453_v18  ;;  %v4889_v63 = vadd.f32 %v2473_v56, %v4836_v30  ;;  %v2535_v57 = vld [vmem:[#allocation6 + $0x288] sm:$0xff]  ;;  %v2537_v18 = vld [vmem:[#allocation6 + $0x298] sm:$0xff]  ;;  %v2538_v56 = vld [vmem:[#allocation6 + $0x2a0] sm:$0xff] }
 0x5c7   : > { %v4886_v58 = vadd.f32 %v2472_v4, %v2454_v38  ;;  %v4892_v20 = vadd.f32 %v2474_v39, %v4838_v32  ;;  %v4895_v52 = vadd.f32 %v2475_v21, %v4856_v14  ;;  %v2499_v13 = vmul.f32 %v4797_v0, %v2490_v40  ;;  %v2497_v14 = vld [vmem:[#allocation6 + $0x238] sm:$0xff]  ;;  %v2539_v21 = vld [vmem:[#allocation6 + $0x2a8] sm:$0xff]  ;;  %v2540_v40 = vld [vmem:[#allocation6 + $0x2b0] sm:$0xff] }
 0x5c8   : > { %v2500_v1 = vmul.f32 %v4797_v0, %v2491_v50  ;;  %v2501_v49 = vmul.f32 %v4797_v0, %v2492_v34  ;;  %v4901_v30 = vadd.f32 %v2476_v46, %v4858_v28  ;;  %v2502_v32 = vmul.f32 %v4797_v0, %v2493_v2  ;;  %v2560_v2 = vld [vmem:[#allocation6 + $0x2c0] sm:$0xff] }
 0x5c9   : > { %v2503_v24 = vmul.f32 %v4797_v0, %v2494_v17  ;;  %v2504_v8 = vmul.f32 %v4797_v0, %v2495_v5  ;;  %v2517_v12 = vmul.f32 %v4800_v10, %v2508_v35  ;;  %v2518_v43 = vmul.f32 %v4800_v10, %v2509_v54  ;;  %v2562_v17 = vld [vmem:[#allocation6 + $0x2d0] sm:$0xff]  ;;  %v2563_v35 = vld [vmem:[#allocation6 + $0x2d8] sm:$0xff] }
 0x5ca   : > { %v2519_v25 = vmul.f32 %v4800_v10, %v2510_v51  ;;  %v2520_v6 = vmul.f32 %v4800_v10, %v2511_v3  ;;  %v2505_v59 = vmul.f32 %v4797_v0, %v2496_v47  ;;  %v2521_v28 = vmul.f32 %v4800_v10, %v2512_v44 }
 0x5cb   : > { %v2522_v48 = vmul.f32 %v4800_v10, %v2513_v22  ;;  %v2523_v15 = vmul.f32 %v4800_v10, %v2514_v41  ;;  %v2485_v33 = vadd.f32 %v2477_v42, %v4860_v23  ;;  %v2525_v7 = vadd.f32 %v2517_v12, %v2499_v13 }
 0x5cc   : > { %v2526_v62 = vadd.f32 %v2518_v43, %v2500_v1  ;;  %v2527_v37 = vadd.f32 %v2519_v25, %v2501_v49  ;;  %v2486_v38 = vadd.f32 %v2478_v29, %v2382_v19  ;;  %v2506_v53 = vmul.f32 %v4797_v0, %v2497_v14  ;;  %v2561_v0 = vld [vmem:[#allocation6 + $0x2c8] sm:$0xff]  ;;  %v2566_v49 = vld [vmem:[#allocation6 + $0x2f0] sm:$0xff] }
 0x5cd   : > { %v2524_v26 = vmul.f32 %v4800_v10, %v2515_v16  ;;  %v2528_v36 = vadd.f32 %v2520_v6, %v2502_v32  ;;  %v2529_v39 = vadd.f32 %v2521_v28, %v2503_v24  ;;  %v2543_v50 = vmul.f32 %v4803_v9, %v2534_v27  ;;  %v2541_v10 = vld [vmem:[#allocation6 + $0x2b8] sm:$0xff]  ;;  %v2565_v1 = vld [vmem:[#allocation6 + $0x2e8] sm:$0xff] }
 0x5ce   : > { %v2544_v61 = vmul.f32 %v4803_v9, %v2535_v57  ;;  %v2545_v23 = vmul.f32 %v4803_v9, %v2536_v45  ;;  %v2487_v4 = vadd.f32 %v2479_v60, %v2383_v55  ;;  %v2530_v46 = vadd.f32 %v2522_v48, %v2504_v8  ;;  %v2564_v60 = vld [vmem:[#allocation6 + $0x2e0] sm:$0xff]  ;;  %v2567_v16 = vld [vmem:[#allocation6 + $0x2f8] sm:$0xff] }
 0x5cf   : > { %v2531_v34 = vadd.f32 %v2523_v15, %v2505_v59  ;;  %v2546_v19 = vmul.f32 %v4803_v9, %v2537_v18  ;;  %v2547_v42 = vmul.f32 %v4803_v9, %v2538_v56  ;;  %v2551_v29 = vadd.f32 %v2543_v50, %v2525_v7 }
 0x5d0   : > { %v2552_v5 = vadd.f32 %v2544_v61, %v2526_v62  ;;  %v2553_v47 = vadd.f32 %v2545_v23, %v2527_v37  ;;  %v2532_v54 = vadd.f32 %v2524_v26, %v2506_v53  ;;  %v2548_v51 = vmul.f32 %v4803_v9, %v2539_v21 }
 0x5d1   : > { %v2549_v3 = vmul.f32 %v4803_v9, %v2540_v40  ;;  %v2554_v55 = vadd.f32 %v2546_v19, %v2528_v36  ;;  %v2555_v13 = vadd.f32 %v2547_v42, %v2529_v39  ;;  %v2569_v44 = vmul.f32 %v4806_v11, %v2560_v2  ;;  %v3283_v42 = vld [vmem:[%s5016_s10] ss:$0 sm:$0xff] (%p1929_p0) }
 0x5d2   : > { %v2570_v22 = vmul.f32 %v4806_v11, %v2561_v0  ;;  %v2571_v41 = vmul.f32 %v4806_v11, %v2562_v17  ;;  %v2550_v32 = vmul.f32 %v4803_v9, %v2541_v10  ;;  %v2556_v24 = vadd.f32 %v2548_v51, %v2530_v46 }
 0x5d3   : > { %v2557_v8 = vadd.f32 %v2549_v3, %v2531_v34  ;;  %v2572_v14 = vmul.f32 %v4806_v11, %v2563_v35  ;;  %v2573_v12 = vmul.f32 %v4806_v11, %v2564_v60  ;;  %v2577_v43 = vadd.f32 %v2569_v44, %v2551_v29 }
 0x5d4   : > { %v2578_v25 = vadd.f32 %v2570_v22, %v2552_v5  ;;  %v2579_v6 = vadd.f32 %v2571_v41, %v2553_v47  ;;  %v2558_v59 = vadd.f32 %v2550_v32, %v2532_v54  ;;  %v2574_v28 = vmul.f32 %v4806_v11, %v2565_v1  ;;  %v3223_v22 = vld [vmem:[#allocation2] sm:$0xff] (%p1929_p0)  ;;  %v3228_v41 = vld [vmem:[#allocation2 + $0x28] sm:$0xff] (%p1929_p0) }
 0x5d5   : > { %v2575_v48 = vmul.f32 %v4806_v11, %v2566_v49  ;;  %v2580_v15 = vadd.f32 %v2572_v14, %v2554_v55  ;;  %v2581_v9 = vadd.f32 %v2573_v12, %v2555_v13  ;;  %v2585_v27 = vadd.f32 %v2577_v43, %v4889_v63  ;;  %v3224_v32 = vld [vmem:[#allocation2 + $0x8] sm:$0xff] (%p1929_p0)  ;;  %v3230_v14 = vld [vmem:[#allocation2 + $0x38] sm:$0xff] (%p1929_p0)  ;;  %v3227_v12 = vld [vmem:[#allocation2 + $0x20] sm:$0xff] (%p1929_p0) }
 0x5d6   : > { %v2586_v57 = vadd.f32 %v2578_v25, %v4892_v20  ;;  %v2587_v45 = vadd.f32 %v2579_v6, %v4895_v52  ;;  %v2488_v7 = vadd.f32 %v4886_v58, %v4884_v31  ;;  %v2576_v62 = vmul.f32 %v4806_v11, %v2567_v16  ;;  %v3222_v11 = vld [vmem:[%s5015_s9 + $0x8] sm:$0xff] (%p1929_p0)  ;;  %v3221_v31 = vld [vmem:[%s5015_s9] sm:$0xff] (%p1929_p0)  ;;  %v3226_v16 = vld [vmem:[#allocation2 + $0x18] sm:$0xff] (%p1929_p0) }
 0x5d7   : > { %v2582_v37 = vadd.f32 %v2574_v28, %v2556_v24  ;;  %v2588_v18 = vadd.f32 %v2580_v15, %v4901_v30  ;;  %v2583_v53 = vadd.f32 %v2575_v48, %v2557_v8  ;;  %v2589_v26 = vadd.f32 %v2581_v9, %v2485_v33  ;;  %3118 = vst.msk [vmem:[%s4698_s18 + $0x40] sm:$0xff] %vm658_vm4, %v2585_v27  ;;  %v3229_v24 = vld [vmem:[#allocation2 + $0x30] sm:$0xff] (%p1929_p0)  ;;  %v2615_v25 = vld [vmem:[#allocation4 + $0x158] sm:$0xff] (%p1929_p0) }
 0x5d8   : > { %v2584_v63 = vadd.f32 %v2576_v62, %v2558_v59  ;;  %3119 = vst.msk [vmem:[%s4698_s18 + $0x48] sm:$0xff] %vm658_vm4, %v2586_v57  ;;  %2668 = vmatpush.bf16.msra.mxu0 (%p1929_p0), %v3222_v11  ;;  %v3225_v8 = vld [vmem:[#allocation2 + $0x10] sm:$0xff] (%p1929_p0)  ;;  %v2616_v59 = vld [vmem:[#allocation4 + $0x100] sm:$0xff] (%p1929_p0) }
 0x5d9   : > { %v2590_v20 = vadd.f32 %v2582_v37, %v2486_v38  ;;  %v2591_v52 = vadd.f32 %v2583_v53, %v2487_v4  ;;  %3120 = vst.msk [vmem:[%s4698_s18 + $0x50] sm:$0xff] %vm658_vm4, %v2587_v45  ;;  %v2628_v11 = vld [vmem:[#allocation4 + $0x190] sm:$0xff] (%p1929_p0) }
 0x5da   : > { %v2592_v36 = vadd.f32 %v2584_v63, %v2488_v7  ;;  %3121 = vst.msk [vmem:[%s4698_s18 + $0x58] sm:$0xff] %vm658_vm4, %v2588_v18  ;;  %1931 = sbr.rel (!%p1929_p0) target bundleno = 818 (0x332), region = 110  ;;  %v2629_v63 = vld [vmem:[#allocation4 + $0x60] sm:$0xff] (%p1929_p0) }
 0x5db   : > { %3122 = vst.msk [vmem:[%s4698_s18 + $0x60] sm:$0xff] %vm658_vm4, %v2589_v26 }
 0x5dc   : > { %3123 = vst.msk [vmem:[%s4698_s18 + $0x68] sm:$0xff] %vm658_vm4, %v2590_v20  ;;  %2669 = vmatpush.bf16.msra.mxu0 (%p1929_p0), %v3221_v31  ;;  %v2630_v31 = vld [vmem:[#allocation4 + $0x1e0] sm:$0xff] (%p1929_p0) }
 0x5dd   : > { %3124 = vst.msk [vmem:[%s4698_s18 + $0x70] sm:$0xff] %vm658_vm4, %v2591_v52 }
 0x5de   : > { %3125 = vst.msk [vmem:[%s4698_s18 + $0x78] sm:$0xff] %vm658_vm4, %v2592_v36  ;;  %v2627_v36 = vld [vmem:[#allocation4 + $0x68] sm:$0xff] (%p1929_p0) }
 0x5e5   :  { %v2602_v58 = vld [vmem:[#allocation6 + $0x2c0] sm:$0xff]  ;;  %v2603_v30 = vld [vmem:[#allocation6 + $0x2c8] sm:$0xff]  ;;  %v2604_v38 = vld [vmem:[#allocation6 + $0x2d0] sm:$0xff] }
 0x5e6   :  { %v2631_v33 = vpack.c.bf16 %v2603_v30, %v2602_v58  ;;  %v2605_v56 = vld [vmem:[#allocation6 + $0x2d8] sm:$0xff]  ;;  %v2606_v21 = vld [vmem:[#allocation6 + $0x2e0] sm:$0xff]  ;;  %v2607_v40 = vld [vmem:[#allocation6 + $0x2e8] sm:$0xff] }
 0x5e7   :  { %v2632_v39 = vpack.c.bf16 %v2605_v56, %v2604_v38  ;;  %v2633_v50 = vpack.c.bf16 %v2607_v40, %v2606_v21  ;;  %v2608_v61 = vld [vmem:[#allocation6 + $0x2f0] sm:$0xff]  ;;  %v2609_v23 = vld [vmem:[#allocation6 + $0x2f8] sm:$0xff]  ;;  %v2625_v30 = vld [vmem:[#allocation4 + $0x1c8] sm:$0xff] }
 0x5e8   :  { %3134 = vmatmul.msk.bf16.vlgmr.msra.gmra.mxu0 %vm658_vm4, %v2631_v33  ;;  %v2634_v4 = vpack.c.bf16 %v2609_v23, %v2608_v61  ;;  %v2626_v21 = vld [vmem:[#allocation4 + $0x160] sm:$0xff] }
 0x5f8   :  { %3135 = vmatmul.msk.bf16.gmra.mxu0 %vm658_vm4, %v2632_v39 }
 0x608   :  { %3136 = vmatmul.msk.bf16.gmra.mxu0 %vm658_vm4, %v2633_v50 }
 0x618   :  { %3137 = vmatmul.msk.bf16.gmra.mxu0 %vm658_vm4, %v2634_v4 }
 0x665   :  { %v2671_v46 = vpop.f32.mrf.mxu0 }
 0x666   :  { %v2672_v49 = vadd.f32 %v3283_v42, %v2671_v46 }
 0x66d   :  { %v2673_v34 = vpop.f32.mrf.mxu0 }
 0x66e   :  { %v2674_v13 = vadd.f32 %v3283_v42, %v2673_v34 }
 0x670   :  { %v2707_v44 = vpack.c.bf16 %v2674_v13, %v2672_v49 }
 0x675   :  { %v2676_v19 = vpop.f32.mrf.mxu0 }
 0x676   :  { %v2677_v60 = vadd.f32 %v3283_v42, %v2676_v19 }
 0x67d   :  { %v2678_v2 = vpop.f32.mrf.mxu0 }
 0x67e   :  { %v2679_v3 = vadd.f32 %v3283_v42, %v2678_v2 }
 0x680   :  { %v2708_v1 = vpack.c.bf16 %v2679_v3, %v2677_v60  ;;  %v2620_v60 = vld [vmem:[#allocation4 + $0xe8] sm:$0xff] }
 0x685   :  { %v2681_v0 = vpop.f32.mrf.mxu0 }
 0x686   :  { %v2682_v51 = vadd.f32 %v3283_v42, %v2681_v0 }
 0x68d   :  { %v2683_v17 = vpop.f32.mrf.mxu0 }
 0x68e   :  { %v2684_v35 = vadd.f32 %v3283_v42, %v2683_v17 }
 0x690   :  { %v2709_v55 = vpack.c.bf16 %v2684_v35, %v2682_v51 }
 0x695   :  { %v2686_v10 = vpop.f32.mrf.mxu0 }
 0x696   :  { %v2687_v5 = vadd.f32 %v3283_v42, %v2686_v10 }
 0x69d   :  { %v2688_v29 = vpop.f32.mrf.mxu0 }
 0x69e   :  { %v2689_v47 = vadd.f32 %v3283_v42, %v2688_v29  ;;  %v2623_v29 = vld [vmem:[#allocation4 + $0x1e8] sm:$0xff] }
 0x6a0   :  { %v2710_v54 = vpack.c.bf16 %v2689_v47, %v2687_v5  ;;  %v2622_v5 = vld [vmem:[#allocation4 + $0x1c0] sm:$0xff]  ;;  %v2624_v47 = vld [vmem:[#allocation4 + $0x98] sm:$0xff] }
 0x6a2   :  { %2779 = vmatpush.bf16.msra.mxu1 %v2710_v54  ;;  %3255 = vmatpush.bf16.msra.mxu3 %v2710_v54  ;;  %v2621_v54 = vld [vmem:[#allocation4 + $0xa0] sm:$0xff] }
 0x6a6   :  { %2780 = vmatpush.bf16.msra.mxu1 %v2709_v55  ;;  %3256 = vmatpush.bf16.msra.mxu3 %v2709_v55 }
 0x6aa   :  { %2781 = vmatpush.bf16.msra.mxu1 %v2708_v1  ;;  %3257 = vmatpush.bf16.msra.mxu3 %v2708_v1 }
 0x6ae   :  { %2782 = vmatpush.bf16.msra.mxu1 %v2707_v44  ;;  %3258 = vmatpush.bf16.msra.mxu3 %v2707_v44  ;;  %v2619_v44 = vld [vmem:[#allocation4 + $0x198] sm:$0xff] }
 0x6b1   :  { %3170 = vmatmul.msk.bf16.vlgmr.msra.gmra.mxu1 %vm1752_vm6, %v3223_v22  ;;  %3175 = vmatmul.msk.bf16.vlgmr.msra.gmra.mxu3 %vm1752_vm6, %v3228_v41 }
 0x6c1   :  { %3171 = vmatmul.msk.bf16.gmra.mxu1 %vm1752_vm6, %v3224_v32  ;;  %3176 = vmatmul.msk.bf16.gmra.mxu3 %vm1752_vm6, %v3229_v24  ;;  %v2618_v24 = vld [vmem:[#allocation4 + $0x178] sm:$0xff] }
 0x6d1   :  { %3172 = vmatmul.msk.bf16.gmra.mxu1 %vm1752_vm6, %v3225_v8  ;;  %3177 = vmatmul.msk.bf16.gmra.mxu3 %vm1752_vm6, %v3230_v14 }
 0x6e1   :  { %3173 = vmatmul.msk.bf16.gmra.mxu1 %vm1752_vm6, %v3226_v16  ;;  %v2617_v16 = vld [vmem:[#allocation4 + $0x140] sm:$0xff] }
 0x6f1   :  { %3174 = vmatmul.msk.bf16.gmra.mxu1 %vm1752_vm6, %v3227_v12 }
 0x72e   :  { %v2784_v43 = vpop.f32.mrf.mxu1 }
 0x72f   :  { %v2785_v28 = vadd.f32 %v2784_v43, %v2615_v25 }
 0x731   :  { %v2824_v9 = vmax.f32 %v2785_v28, 0.0 }
 0x734   :  { %v2809_v6 = vpop.f32.mrf.mxu3 }
 0x735   :  { %v2810_v61 = vadd.f32 %v2809_v6, %v2625_v30 }
 0x736   :  { %v2786_v48 = vpop.f32.mrf.mxu1 }
 0x737   :  { %v2787_v15 = vadd.f32 %v2786_v48, %v2616_v59  ;;  %v2834_v19 = vmax.f32 %v2810_v61, 0.0 }
 0x739   :  { %v2825_v27 = vmax.f32 %v2787_v15, 0.0 }
 0x73b   :  { %v4979_v57 = vpack.c.bf16 %v2825_v27, %v2824_v9  ;;  %v3231_v27 = vld [vmem:[#allocation3 + $0x10] sm:$0xff] }
 0x73c   :  { %v2811_v45 = vpop.f32.mrf.mxu3 }
 0x73d   :  { %v2812_v23 = vadd.f32 %v2811_v45, %v2626_v21  ;;  %v3232_v45 = vld [vmem:[#allocation3] sm:$0xff] }
 0x73e   :  { %v2789_v7 = vpop.f32.mrf.mxu1 }
 0x73f   :  { %v2835_v2 = vmax.f32 %v2812_v23, 0.0  ;;  %v2790_v6 = vadd.f32 %v2789_v7, %v2617_v16 }
 0x741   :  { %v2853_v10 = vpack.c.bf16 %v2835_v2, %v2834_v19  ;;  %v2826_v15 = vmax.f32 %v2790_v6, 0.0 }
 0x744   :  { %v2814_v62 = vpop.f32.mrf.mxu3 }
 0x745   :  { %v2815_v33 = vadd.f32 %v2814_v62, %v2627_v36  ;;  %v3233_v62 = vld [vmem:[#allocation3 + $0x18] sm:$0xff] }
 0x746   :  { %v2791_v37 = vpop.f32.mrf.mxu1 }
 0x747   :  { %v2836_v4 = vmax.f32 %v2815_v33, 0.0  ;;  %v2792_v12 = vadd.f32 %v2791_v37, %v2618_v24  ;;  %v3234_v37 = vld [vmem:[#allocation3 + $0x8] sm:$0xff] }
 0x749   :  { %v2827_v28 = vmax.f32 %v2792_v12, 0.0 }
 0x74b   :  { %v2849_v9 = vpack.c.bf16 %v2827_v28, %v2826_v15 }
 0x74c   :  { %v2816_v18 = vpop.f32.mrf.mxu3 }
 0x74d   :  { %v2817_v38 = vadd.f32 %v2816_v18, %v2628_v11 }
 0x74e   :  { %v2794_v53 = vpop.f32.mrf.mxu1 }
 0x74f   :  { %v2837_v46 = vmax.f32 %v2817_v38, 0.0  ;;  %v2795_v8 = vadd.f32 %v2794_v53, %v2619_v44 }
 0x751   :  { %v2854_v0 = vpack.c.bf16 %v2837_v46, %v2836_v4  ;;  %v2828_v59 = vmax.f32 %v2795_v8, 0.0 }
 0x754   :  { %v2819_v26 = vpop.f32.mrf.mxu3 }
 0x755   :  { %v2820_v52 = vadd.f32 %v2819_v26, %v2629_v63 }
 0x756   :  { %v2796_v20 = vpop.f32.mrf.mxu1 }
 0x757   :  { %v2838_v56 = vmax.f32 %v2820_v52, 0.0  ;;  %v2797_v22 = vadd.f32 %v2796_v20, %v2620_v60 }
 0x759   :  { %v2829_v43 = vmax.f32 %v2797_v22, 0.0 }
 0x75b   :  { %v2850_v48 = vpack.c.bf16 %v2829_v43, %v2828_v59 }
 0x75c   :  { %v2821_v58 = vpop.f32.mrf.mxu3 }
 0x75d   :  { %v2822_v39 = vadd.f32 %v2821_v58, %v2630_v31 }
 0x75e   :  { %v2799_v40 = vpop.f32.mrf.mxu1 }
 0x75f   :  { %v2839_v50 = vmax.f32 %v2822_v39, 0.0  ;;  %v2800_v13 = vadd.f32 %v2799_v40, %v2621_v54 }
 0x761   :  { %v2855_v34 = vpack.c.bf16 %v2839_v50, %v2838_v56  ;;  %v2830_v14 = vmax.f32 %v2800_v13, 0.0 }
 0x763   :  { %2880 = vmatpush.bf16.msra.mxu2 %v2855_v34 }
 0x766   :  { %v2801_v17 = vpop.f32.mrf.mxu1 }
 0x767   :  { %2881 = vmatpush.bf16.msra.mxu2 %v2854_v0  ;;  %v2802_v3 = vadd.f32 %v2801_v17, %v2622_v5 }
 0x769   :  { %v2831_v41 = vmax.f32 %v2802_v3, 0.0 }
 0x76b   :  { %2882 = vmatpush.bf16.msra.mxu2 %v2853_v10  ;;  %v2851_v25 = vpack.c.bf16 %v2831_v41, %v2830_v14 }
 0x76e   :  { %v2804_v42 = vpop.f32.mrf.mxu1 }
 0x76f   :  { %v2805_v35 = vadd.f32 %v2804_v42, %v2623_v29 }
 0x771   :  { %v2832_v1 = vmax.f32 %v2805_v35, 0.0 }
 0x776   :  { %v2806_v51 = vpop.f32.mrf.mxu1 }
 0x777   :  { %v2807_v55 = vadd.f32 %v2806_v51, %v2624_v47 }
 0x779   :  { %v2833_v49 = vmax.f32 %v2807_v55, 0.0 }
 0x77b   :  { %v2852_v32 = vpack.c.bf16 %v2833_v49, %v2832_v1 }
 0x77d   :  { %2883 = vmatpush.bf16.msra.mxu2 %v2852_v32 }
 0x781   :  { %2884 = vmatpush.bf16.msra.mxu2 %v2851_v25 }
 0x785   :  { %2885 = vmatpush.bf16.msra.mxu2 %v2850_v48 }
 0x789   :  { %2886 = vmatpush.bf16.msra.mxu2 %v2849_v9 }
 0x78d   :  { %2887 = vmatpush.bf16.msra.mxu2 %v4979_v57 }
 0x790   :  { %2888 = vmatmul.bf16.vlgmr.msra.gmra.mxu2 %v3231_v27 }
 0x7a0   :  { %2893 = vmatmul.bf16.gmra.mxu2 %v3232_v45 }
 0x7b0   :  { %2898 = vmatmul.bf16.gmra.mxu2 %v3233_v62 }
 0x7c0   :  { %2903 = vmatmul.bf16.gmra.mxu2 %v3234_v37 }
 0x813   :  { %v2889_v18 = vpop.f32.mrf.mxu2 }
 0x814   :  { %v2909_v7 = vmax.f32 %v2889_v18, 0.0 }
 0x816   :  { %2917 = vst [vmem:[%s5019_s13] sm:$0xff] %v2909_v7 }
 0x81b   :  { %v2891_v53 = vpop.f32.mrf.mxu2 }
 0x81c   :  { %v2910_v26 = vmax.f32 %v2891_v53, 0.0 }
 0x81e   :  { %2918 = vst [vmem:[%s5019_s13 + $0x8] sm:$0xff] %v2910_v26 }
 0x823   :  { %v2894_v57 = vpop.f32.mrf.mxu2 }
 0x824   :  { %v2911_v63 = vmax.f32 %v2894_v57, 0.0 }
 0x826   :  { %2919 = vst [vmem:[%s5019_s13 + $0x10] sm:$0xff] %v2911_v63 }
 0x82b   :  { %v2896_v20 = vpop.f32.mrf.mxu2 }
 0x82c   :  { %v2912_v52 = vmax.f32 %v2896_v20, 0.0 }
 0x82e   :  { %2920 = vst [vmem:[%s5019_s13 + $0x18] sm:$0xff] %v2912_v52 }
 0x833   :  { %v2899_v36 = vpop.f32.mrf.mxu2 }
 0x834   :  { %v2913_v11 = vmax.f32 %v2899_v36, 0.0 }
 0x836   :  { %2921 = vst [vmem:[%s5019_s13 + $0x20] sm:$0xff] %v2913_v11 }
 0x83b   :  { %v2901_v31 = vpop.f32.mrf.mxu2 }
 0x83c   :  { %v2914_v58 = vmax.f32 %v2901_v31, 0.0 }
 0x83e   :  { %2922 = vst [vmem:[%s5019_s13 + $0x28] sm:$0xff] %v2914_v58 }
 0x843   :  { %v2904_v30 = vpop.f32.mrf.mxu2 }
 0x844   :  { %v2915_v33 = vmax.f32 %v2904_v30, 0.0 }
 0x846   :  { %2923 = vst [vmem:[%s5019_s13 + $0x30] sm:$0xff] %v2915_v33 }
 0x84b   :  { %v2906_v38 = vpop.f32.mrf.mxu2 }
 0x84c   :  { %v2916_v56 = vmax.f32 %v2906_v38, 0.0 }
 0x84e   :  { %2924 = vst [vmem:[%s5019_s13 + $0x38] sm:$0xff] %v2916_v56 }
 0x84f   :  { %2929 = vsyncpa [#allocation8], 1 }

</bundles_post_ra>
